<compile_context>
chip_gen: v6e
topology: v6e:2x2x1
jax: 0.10.0
libtpu: 0.0.40
codegen_flags: <defaults>
</compile_context>

<pallas_src>
import math
import functools

import jax
import jax.numpy as jnp
from jax.experimental import pallas as pl
from jax.experimental.pallas import tpu as pltpu


# ----------------------------------------------------------------------------
# Tiling helper: largest aligned divisor of `dim` that is <= cap.
# ----------------------------------------------------------------------------

def _tile(dim, cap, aligns):
    if dim <= cap:
        return dim
    for align in aligns:
        t = (cap // align) * align
        while t >= align:
            if dim % t == 0:
                return t
            t -= align
    return dim  # fallback: single full-dim block


_VMEM_LIMIT = 40 * 1024 * 1024  # leaves headroom under v7x's 64 MiB physical VMEM

_PARAMS_3D = pltpu.CompilerParams(
    dimension_semantics=("parallel", "parallel", "arbitrary"),
    vmem_limit_bytes=_VMEM_LIMIT)
_PARAMS_2D = pltpu.CompilerParams(
    dimension_semantics=("parallel", "parallel"),
    vmem_limit_bytes=_VMEM_LIMIT)
_PARAMS_1D = pltpu.CompilerParams(
    dimension_semantics=("parallel",),
    vmem_limit_bytes=_VMEM_LIMIT)


# ----------------------------------------------------------------------------
# Tiled matmul (+bias, optional ReLU): bf16 operands, f32 accumulator in VMEM.
# ----------------------------------------------------------------------------

def _matmul_kernel(x_ref, w_ref, b_ref, o_ref, acc_ref, *, relu):
    @pl.when(pl.program_id(2) == 0)
    def _():
        acc_ref[...] = jnp.zeros_like(acc_ref)

    acc_ref[...] += jnp.dot(x_ref[...].astype(jnp.bfloat16),
                            w_ref[...].astype(jnp.bfloat16),
                            preferred_element_type=jnp.float32)

    @pl.when(pl.program_id(2) == pl.num_programs(2) - 1)
    def _():
        y = acc_ref[...] + b_ref[...]
        if relu:
            y = jnp.maximum(y, 0.0)
        o_ref[...] = y.astype(o_ref.dtype)


def matmul_bias(x, w, b, relu=False, out_dtype=jnp.float32,
                tm_cap=256, tn_cap=512, tk_cap=512):
    """x: (M, K), w: (K, N) bf16, b: (N,) f32 -> (M, N) out_dtype."""
    M, K = x.shape
    N = w.shape[1]
    tm = _tile(M, tm_cap, (256, 128, 8))
    tn = _tile(N, tn_cap, (512, 256, 128))
    tk = _tile(K, tk_cap, (512, 256, 128))
    kern = functools.partial(_matmul_kernel, relu=relu)
    return pl.pallas_call(
        kern,
        out_shape=jax.ShapeDtypeStruct((M, N), out_dtype),
        grid=(M // tm, N // tn, K // tk),
        in_specs=[
            pl.BlockSpec((tm, tk), lambda i, j, k: (i, k)),
            pl.BlockSpec((tk, tn), lambda i, j, k: (k, j)),
            pl.BlockSpec((1, tn), lambda i, j, k: (0, j)),
        ],
        out_specs=pl.BlockSpec((tm, tn), lambda i, j, k: (i, j)),
        scratch_shapes=[pltpu.VMEM((tm, tn), jnp.float32)],
        compiler_params=_PARAMS_3D,
    )(x, w, b.reshape(1, N).astype(jnp.float32))


# ----------------------------------------------------------------------------
# Fused FFN: LayerNorm(x + relu(x@W1 + b1) @ W2 + b2), hidden stays in VMEM.
# ----------------------------------------------------------------------------

def _ffn_ln_kernel(x_ref, w1_ref, b1_ref, w2_ref, b2_ref, g_ref, beta_ref,
                   o_ref, *, eps):
    x = x_ref[...]                                                 # (tm, D) f32
    h = jnp.maximum(
        jnp.dot(x.astype(jnp.bfloat16), w1_ref[...],
                preferred_element_type=jnp.float32) + b1_ref[...], 0.0)
    y = jnp.dot(h.astype(jnp.bfloat16), w2_ref[...],
                preferred_element_type=jnp.float32) + b2_ref[...]
    z = x + y
    mu = jnp.mean(z, axis=-1, keepdims=True)
    var = jnp.mean(jnp.square(z - mu), axis=-1, keepdims=True)
    o_ref[...] = (z - mu) * jax.lax.rsqrt(var + eps) * g_ref[...] + beta_ref[...]


def ffn_layernorm(x2, w1, b1, w2, b2, g, beta, eps=1e-5, tm_cap=256):
    # TODO(synk): for very large D/F add an F-tile accumulation axis and
    # pl.Buffered(1) on the grid-invariant weight specs to cut VMEM residency.
    M, D = x2.shape
    F = w1.shape[1]
    tm = _tile(M, tm_cap, (256, 128, 8))
    kern = functools.partial(_ffn_ln_kernel, eps=eps)
    return pl.pallas_call(
        kern,
        out_shape=jax.ShapeDtypeStruct((M, D), jnp.float32),
        grid=(M // tm,),
        in_specs=[
            pl.BlockSpec((tm, D), lambda i: (i, 0)),
            pl.BlockSpec((D, F), lambda i: (0, 0)),
            pl.BlockSpec((1, F), lambda i: (0, 0)),
            pl.BlockSpec((F, D), lambda i: (0, 0)),
            pl.BlockSpec((1, D), lambda i: (0, 0)),
            pl.BlockSpec((1, D), lambda i: (0, 0)),
            pl.BlockSpec((1, D), lambda i: (0, 0)),
        ],
        out_specs=pl.BlockSpec((tm, D), lambda i: (i, 0)),
        compiler_params=_PARAMS_1D,
    )(x2, w1, b1.reshape(1, F), w2, b2.reshape(1, D),
      g.reshape(1, D), beta.reshape(1, D))


# ----------------------------------------------------------------------------
# Plain LayerNorm (final encoder/decoder norms).
# ----------------------------------------------------------------------------

def _ln_kernel(x_ref, g_ref, b_ref, o_ref, *, eps):
    z = x_ref[...]
    mu = jnp.mean(z, axis=-1, keepdims=True)
    var = jnp.mean(jnp.square(z - mu), axis=-1, keepdims=True)
    o_ref[...] = (z - mu) * jax.lax.rsqrt(var + eps) * g_ref[...] + b_ref[...]


def layernorm(x2, g, b, eps=1e-5, tm_cap=512):
    M, D = x2.shape
    tm = _tile(M, tm_cap, (256, 128, 8))
    kern = functools.partial(_ln_kernel, eps=eps)
    return pl.pallas_call(
        kern,
        out_shape=jax.ShapeDtypeStruct((M, D), jnp.float32),
        grid=(M // tm,),
        in_specs=[
            pl.BlockSpec((tm, D), lambda i: (i, 0)),
            pl.BlockSpec((1, D), lambda i: (0, 0)),
            pl.BlockSpec((1, D), lambda i: (0, 0)),
        ],
        out_specs=pl.BlockSpec((tm, D), lambda i: (i, 0)),
        compiler_params=_PARAMS_1D,
    )(x2, g.reshape(1, D), b.reshape(1, D))


# ----------------------------------------------------------------------------
# Fused multi-head attention + out-projection + residual + LayerNorm.
#   grid = (batch, query tiles); heads batched with einsum; masks optional.
# ----------------------------------------------------------------------------

def _make_attn_ln_kernel(has_mask, has_kpad, eps):
    def kernel(*refs):
        it = iter(refs)
        q_ref, k_ref, v_ref = next(it), next(it), next(it)
        mask_ref = next(it) if has_mask else None
        kpad_ref = next(it) if has_kpad else None
        wo_ref, bo_ref, res_ref, g_ref, beta_ref, o_ref = (
            next(it), next(it), next(it), next(it), next(it), next(it))

        q = q_ref[0]          # (H, tq, hd) bf16  (1/sqrt(hd) folded into Wq)
        k = k_ref[0]          # (H, Lk, hd) bf16
        v = v_ref[0]          # (H, Lk, hd) bf16

        s = jnp.einsum("hqd,hkd->hqk", q, k,
                       preferred_element_type=jnp.float32)   # (H, tq, Lk)
        if has_mask:
            s = s + mask_ref[...]                            # (tq, Lk) bcast
        if has_kpad:
            s = s + kpad_ref[0]                              # (1, Lk) bcast
        m = jnp.max(s, axis=-1, keepdims=True)
        p = jnp.exp(s - m)
        denom = jnp.sum(p, axis=-1, keepdims=True)           # (H, tq, 1)
        oh = jnp.einsum("hqk,hkd->hqd", p.astype(v.dtype), v,
                        preferred_element_type=jnp.float32)  # (H, tq, hd)
        # normalize AFTER the PV matmul (Lq*hd multiplies instead of Lq*Lk)
        oh = oh * pl.reciprocal(denom)

        # Output projection as a batched head contraction + sum over heads
        # (== concat-then-matmul with wo), fused with residual + LayerNorm.
        # TODO(synk): a single D-wide MXU contraction would fill the MXU
        # better once in-kernel head-merge reshapes are worthwhile.
        projh = jnp.einsum("hqd,hde->hqe", oh.astype(jnp.bfloat16), wo_ref[...],
                           preferred_element_type=jnp.float32)  # (H, tq, D)
        proj = jnp.sum(projh, axis=0) + bo_ref[...]              # (tq, D)

        z = res_ref[0] + proj
        mu = jnp.mean(z, axis=-1, keepdims=True)
        var = jnp.mean(jnp.square(z - mu), axis=-1, keepdims=True)
        o_ref[0] = (z - mu) * jax.lax.rsqrt(var + eps) * g_ref[...] + beta_ref[...]
    return kernel


def attention_ln(q, k, v, res, wo, bo, g, beta, num_heads,
                 mask=None, kpad=None, eps=1e-5, tq_cap=256):
    """q: (N, Lq, D) bf16, k/v: (N, Lk, D) bf16, res: (N, Lq, D) f32,
    mask: (Lq, Lk) additive or None, kpad: (N, 1, Lk) additive or None."""
    N, Lq, D = q.shape
    Lk = k.shape[1]
    H = num_heads
    hd = D // H
    tq = _tile(Lq, tq_cap, (128, 8))

    def split_heads(t):                       # (N, L, D) -> (N, H, L, hd)
        L = t.shape[1]
        return t.reshape(N, L, H, hd).transpose(0, 2, 1, 3)

    q4, k4, v4 = split_heads(q), split_heads(k), split_heads(v)
    wo3 = wo.reshape(H, hd, D)                # rows grouped per head

    in_specs = [
        pl.BlockSpec((1, H, tq, hd), lambda n, i: (n, 0, i, 0)),
        pl.BlockSpec((1, H, Lk, hd), lambda n, i: (n, 0, 0, 0)),
        pl.BlockSpec((1, H, Lk, hd), lambda n, i: (n, 0, 0, 0)),
    ]
    args = [q4, k4, v4]
    if mask is not None:
        in_specs.append(pl.BlockSpec((tq, Lk), lambda n, i: (i, 0)))
        args.append(mask.astype(jnp.float32))
    if kpad is not None:
        in_specs.append(pl.BlockSpec((1, 1, Lk), lambda n, i: (n, 0, 0)))
        args.append(kpad)
    in_specs += [
        pl.BlockSpec((H, hd, D), lambda n, i: (0, 0, 0)),
        pl.BlockSpec((1, D), lambda n, i: (0, 0)),
        pl.BlockSpec((1, tq, D), lambda n, i: (n, i, 0)),
        pl.BlockSpec((1, D), lambda n, i: (0, 0)),
        pl.BlockSpec((1, D), lambda n, i: (0, 0)),
    ]
    args += [wo3, bo.reshape(1, D), res, g.reshape(1, D), beta.reshape(1, D)]

    kern = _make_attn_ln_kernel(mask is not None, kpad is not None, eps)
    # TODO(synk): for very long key sequences add an online-softmax KV-tile loop.
    return pl.pallas_call(
        kern,
        out_shape=jax.ShapeDtypeStruct((N, Lq, D), jnp.float32),
        grid=(N, Lq // tq),
        in_specs=in_specs,
        out_specs=pl.BlockSpec((1, tq, D), lambda n, i: (n, i, 0)),
        compiler_params=_PARAMS_2D,
    )(*args)


# ----------------------------------------------------------------------------
# Mask helpers (same semantics as the PyTorch module).
# ----------------------------------------------------------------------------

def make_pos_encoding(max_len, dim_model):
    pos = jnp.arange(max_len, dtype=jnp.float32)[:, None]
    div = jnp.exp(jnp.arange(0, dim_model, 2, dtype=jnp.float32)
                  * (-math.log(10000.0) / dim_model))
    pe = jnp.zeros((max_len, dim_model), jnp.float32)
    pe = pe.at[:, 0::2].set(jnp.sin(pos * div))
    pe = pe.at[:, 1::2].set(jnp.cos(pos * div))
    return pe


def get_tgt_mask(size):
    m = jnp.tril(jnp.ones((size, size), jnp.float32))
    return jnp.where(m == 0, float("-inf"), 0.0).astype(jnp.float32)


def create_pad_mask(matrix, pad_token):
    return matrix == pad_token


# ----------------------------------------------------------------------------
# Full forward pass.
# ----------------------------------------------------------------------------

@functools.partial(jax.jit, static_argnames=("num_heads",))
def transformer_forward(params, src_tok, tgt_tok, num_heads,
                        tgt_mask=None, src_pad_mask=None, tgt_pad_mask=None):
    emb = params["embedding"]
    V, D = emb.shape
    H = num_heads
    N, S = src_tok.shape
    _, T = tgt_tok.shape

    # TODO(synk): embedding gather + sqrt(D) scale + positional add stay in
    # plain JAX so XLA fuses them with the gather (mem-bound elementwise).
    # Bug-faithful: the reference indexes pos_encoding by the BATCH dim.
    pe_batch = params["pos_encoding"][:N].reshape(N, 1, D)
    scale = math.sqrt(D)
    src = jnp.take(emb, src_tok, axis=0) * scale + pe_batch     # (N, S, D) f32
    tgt = jnp.take(emb, tgt_tok, axis=0) * scale + pe_batch     # (N, T, D) f32

    def kpad_additive(pm, L):
        if pm is None:
            return None
        # large finite negative instead of -inf: avoids NaN on fully-masked rows
        return jnp.where(pm, -1e30, 0.0).astype(jnp.float32).reshape(N, 1, L)

    src_kpad = kpad_additive(src_pad_mask, S)
    tgt_kpad = kpad_additive(tgt_pad_mask, T)
    dec_mask = None if tgt_mask is None else tgt_mask.astype(jnp.float32)
    # src_mask / memory_mask / memory_key_padding_mask are None in the
    # reference module -> skipped entirely (no zero-mask tensors or adds).

    def split_qkv(y2, L):
        y = y2.reshape(N, L, 3 * D)
        return y[:, :, :D], y[:, :, D:2 * D], y[:, :, 2 * D:]

    # ----- encoder -----
    mem = src
    for lp in params["encoder_layers"]:
        sa = lp["self_attn"]
        qkv = matmul_bias(mem.reshape(N * S, D), sa["w_qkv"], sa["b_qkv"],
                          out_dtype=jnp.bfloat16)
        q, k, v = split_qkv(qkv, S)
        mem = attention_ln(q, k, v, mem, sa["wo"], sa["bo"],
                           lp["norm1_w"], lp["norm1_b"], H,
                           mask=None, kpad=src_kpad)
        mem = ffn_layernorm(mem.reshape(N * S, D), lp["w1"], lp["b1"],
                            lp["w2"], lp["b2"],
                            lp["norm2_w"], lp["norm2_b"]).reshape(N, S, D)
    mem = layernorm(mem.reshape(N * S, D),
                    params["enc_norm_w"], params["enc_norm_b"]).reshape(N, S, D)

    # ----- decoder -----
    x = tgt
    for lp in params["decoder_layers"]:
        sa = lp["self_attn"]
        qkv = matmul_bias(x.reshape(N * T, D), sa["w_qkv"], sa["b_qkv"],
                          out_dtype=jnp.bfloat16)
        q, k, v = split_qkv(qkv, T)
        x = attention_ln(q, k, v, x, sa["wo"], sa["bo"],
                         lp["norm1_w"], lp["norm1_b"], H,
                         mask=dec_mask, kpad=tgt_kpad)
        ca = lp["cross_attn"]
        qc = matmul_bias(x.reshape(N * T, D), ca["wq"], ca["bq"],
                         out_dtype=jnp.bfloat16).reshape(N, T, D)
        kvc = matmul_bias(mem.reshape(N * S, D), ca["w_kv"], ca["b_kv"],
                          out_dtype=jnp.bfloat16).reshape(N, S, 2 * D)
        kc, vc = kvc[:, :, :D], kvc[:, :, D:]
        x = attention_ln(qc, kc, vc, x, ca["wo"], ca["bo"],
                         lp["norm2_w"], lp["norm2_b"], H)
        x = ffn_layernorm(x.reshape(N * T, D), lp["w1"], lp["b1"],
                          lp["w2"], lp["b2"],
                          lp["norm3_w"], lp["norm3_b"]).reshape(N, T, D)
    x = layernorm(x.reshape(N * T, D),
                  params["dec_norm_w"], params["dec_norm_b"])

    # ----- output projection -----
    out = matmul_bias(x, params["w_out"], params["b_out"]).reshape(N, T, V)
    return out.transpose(1, 0, 2)                      # (T, N, V) like PyTorch


# ----------------------------------------------------------------------------
# Deterministic parameter init.  Weights stored bf16; softmax scale folded
# into the Q projection columns.
# ----------------------------------------------------------------------------

def _init_linear(key, fan_in, fan_out):
    k1, k2 = jax.random.split(key)
    w = jax.random.normal(k1, (fan_in, fan_out), jnp.float32) / math.sqrt(fan_in)
    b = jax.random.normal(k2, (fan_out,), jnp.float32) * 0.01
    return w, b


def _init_attn_self(key, D, H):
    ks = jax.random.split(key, 4)
    sc = 1.0 / math.sqrt(D // H)
    wq, bq = _init_linear(ks[0], D, D)
    wk, bk = _init_linear(ks[1], D, D)
    wv, bv = _init_linear(ks[2], D, D)
    wo, bo = _init_linear(ks[3], D, D)
    return dict(
        w_qkv=jnp.concatenate([wq * sc, wk, wv], axis=1).astype(jnp.bfloat16),
        b_qkv=jnp.concatenate([bq * sc, bk, bv], axis=0),
        wo=wo.astype(jnp.bfloat16), bo=bo)


def _init_attn_cross(key, D, H):
    ks = jax.random.split(key, 4)
    sc = 1.0 / math.sqrt(D // H)
    wq, bq = _init_linear(ks[0], D, D)
    wk, bk = _init_linear(ks[1], D, D)
    wv, bv = _init_linear(ks[2], D, D)
    wo, bo = _init_linear(ks[3], D, D)
    return dict(
        wq=(wq * sc).astype(jnp.bfloat16), bq=bq * sc,
        w_kv=jnp.concatenate([wk, wv], axis=1).astype(jnp.bfloat16),
        b_kv=jnp.concatenate([bk, bv], axis=0),
        wo=wo.astype(jnp.bfloat16), bo=bo)


def init_params(key, num_tokens, dim_model, num_heads,
                num_encoder_layers, num_decoder_layers, dim_feedforward=2048,
                max_len=5000):
    keys = iter(jax.random.split(key, 64))
    D, V, H = dim_model, num_tokens, num_heads

    def enc_layer():
        w1, b1 = _init_linear(next(keys), D, dim_feedforward)
        w2, b2 = _init_linear(next(keys), dim_feedforward, D)
        return dict(
            self_attn=_init_attn_self(next(keys), D, H),
            w1=w1.astype(jnp.bfloat16), b1=b1,
            w2=w2.astype(jnp.bfloat16), b2=b2,
            norm1_w=jnp.ones((D,), jnp.float32), norm1_b=jnp.zeros((D,), jnp.float32),
            norm2_w=jnp.ones((D,), jnp.float32), norm2_b=jnp.zeros((D,), jnp.float32),
        )

    def dec_layer():
        w1, b1 = _init_linear(next(keys), D, dim_feedforward)
        w2, b2 = _init_linear(next(keys), dim_feedforward, D)
        return dict(
            self_attn=_init_attn_self(next(keys), D, H),
            cross_attn=_init_attn_cross(next(keys), D, H),
            w1=w1.astype(jnp.bfloat16), b1=b1,
            w2=w2.astype(jnp.bfloat16), b2=b2,
            norm1_w=jnp.ones((D,), jnp.float32), norm1_b=jnp.zeros((D,), jnp.float32),
            norm2_w=jnp.ones((D,), jnp.float32), norm2_b=jnp.zeros((D,), jnp.float32),
            norm3_w=jnp.ones((D,), jnp.float32), norm3_b=jnp.zeros((D,), jnp.float32),
        )

    w_out, b_out = _init_linear(next(keys), D, V)
    return dict(
        embedding=jax.random.normal(next(keys), (V, D), jnp.float32),
        pos_encoding=make_pos_encoding(max_len, D),
        encoder_layers=[enc_layer() for _ in range(num_encoder_layers)],
        decoder_layers=[dec_layer() for _ in range(num_decoder_layers)],
        enc_norm_w=jnp.ones((D,), jnp.float32), enc_norm_b=jnp.zeros((D,), jnp.float32),
        dec_norm_w=jnp.ones((D,), jnp.float32), dec_norm_b=jnp.zeros((D,), jnp.float32),
        w_out=w_out.astype(jnp.bfloat16), b_out=b_out,
    )


# ----------------------------------------------------------------------------
# Example run
# ----------------------------------------------------------------------------

if __name__ == "__main__":
    key = jax.random.PRNGKey(0)
    k_par, k_src, k_tgt = jax.random.split(key, 3)

    num_tokens = 16
    dim_model = 32
    num_heads = 4
    num_encoder_layers = 2
    num_decoder_layers = 2

    params = init_params(k_par, num_tokens, dim_model, num_heads,
                         num_encoder_layers, num_decoder_layers)

    batch, src_len, tgt_len = 2, 12, 8
    src = jax.random.randint(k_src, (batch, src_len), 0, num_tokens, jnp.int32)
    tgt = jax.random.randint(k_tgt, (batch, tgt_len), 0, num_tokens, jnp.int32)
    tgt_mask = get_tgt_mask(tgt_len)

    out = transformer_forward(params, src, tgt, num_heads=num_heads,
                              tgt_mask=tgt_mask, src_pad_mask=None,
                              tgt_pad_mask=None)
    out = jax.block_until_ready(out)

    assert out.shape == (tgt_len, batch, num_tokens), out.shape
    assert bool(jnp.all(jnp.isfinite(out)))
    print("KERNEL_OK")
</pallas_src>

<mosaic_0001>
module attributes {stable_mosaic.version = 11 : i64} {
  func.func @_matmul_kernel(%arg0: i32, %arg1: i32, %arg2: i32, %arg3: memref<24x32xf32, #tpu.memory_space<vmem>>, %arg4: memref<32x96xbf16, #tpu.memory_space<vmem>>, %arg5: memref<1x96xf32, #tpu.memory_space<vmem>>, %arg6: memref<24x96xbf16, #tpu.memory_space<vmem>>, %arg7: memref<24x96xf32, #tpu.memory_space<vmem>>) attributes {dimension_semantics = [#tpu.dimension_semantics<parallel>, #tpu.dimension_semantics<parallel>, #tpu.dimension_semantics<arbitrary>], iteration_bounds = array<i64: 1, 1, 1>, scalar_prefetch = 0 : i64, scratch_operands = 1 : i64, tpu.core_type = #tpu.core_type<tc>, window_params = [{transform_indices = @transform_0, window_bounds = array<i64: 24, 32>}, {transform_indices = @transform_1, window_bounds = array<i64: 32, 96>}, {transform_indices = @transform_2, window_bounds = array<i64: 1, 96>}, {transform_indices = @transform_3, window_bounds = array<i64: 24, 96>}]} {
    %c0_i32 = arith.constant 0 : i32
    %0 = arith.cmpi eq, %arg2, %c0_i32 : i32
    %1 = arith.extui %0 : i1 to i32
    %c0_i32_0 = arith.constant 0 : i32
    %2 = arith.cmpi ne, %1, %c0_i32_0 : i32
    scf.if %2 {
      %cst_10 = arith.constant 0.000000e+00 : f32
      %13 = vector.broadcast %cst_10 : f32 to vector<24x96xf32>
      %c0_11 = arith.constant 0 : index
      %c0_12 = arith.constant 0 : index
      %14 = vector.load %arg7[%c0_11, %c0_12] : memref<24x96xf32, #tpu.memory_space<vmem>>, vector<24x96xf32>
      tpu.vector_store %arg7[%c0_11, %c0_12], %13 {strides = array<i32>} : memref<24x96xf32, #tpu.memory_space<vmem>>, vector<24x96xf32>,
    } else {
    }
    %c0 = arith.constant 0 : index
    %c0_1 = arith.constant 0 : index
    %3 = vector.load %arg7[%c0, %c0_1] : memref<24x96xf32, #tpu.memory_space<vmem>>, vector<24x96xf32>
    %c0_2 = arith.constant 0 : index
    %c0_3 = arith.constant 0 : index
    %4 = vector.load %arg3[%c0_2, %c0_3] : memref<24x32xf32, #tpu.memory_space<vmem>>, vector<24x32xf32>
    %5 = arith.truncf %4 : vector<24x32xf32> to vector<24x32xbf16>
    %c0_4 = arith.constant 0 : index
    %c0_5 = arith.constant 0 : index
    %6 = vector.load %arg4[%c0_4, %c0_5] : memref<32x96xbf16, #tpu.memory_space<vmem>>, vector<32x96xbf16>
    %cst = arith.constant dense<0.000000e+00> : vector<24x96xf32>
    %7 = tpu.matmul %5, %6, %cst {dimension_numbers = #tpu.dot_dimension_numbers<[1], [0], [0], [1], [0, 0, 1, 1], [], []>} : vector<24x32xbf16>, vector<32x96xbf16>, vector<24x96xf32> -> vector<24x96xf32>
    %8 = arith.addf %3, %7 : vector<24x96xf32>
    %c0_6 = arith.constant 0 : index
    %c0_7 = arith.constant 0 : index
    %9 = vector.load %arg7[%c0_6, %c0_7] : memref<24x96xf32, #tpu.memory_space<vmem>>, vector<24x96xf32>
    tpu.vector_store %arg7[%c0_6, %c0_7], %8 {strides = array<i32>} : memref<24x96xf32, #tpu.memory_space<vmem>>, vector<24x96xf32>,
    %c0_i32_8 = arith.constant 0 : i32
    %10 = arith.cmpi eq, %arg2, %c0_i32_8 : i32
    %11 = arith.extui %10 : i1 to i32
    %c0_i32_9 = arith.constant 0 : i32
    %12 = arith.cmpi ne, %11, %c0_i32_9 : i32
    scf.if %12 {
      %c0_10 = arith.constant 0 : index
      %c0_11 = arith.constant 0 : index
      %13 = vector.load %arg7[%c0_10, %c0_11] : memref<24x96xf32, #tpu.memory_space<vmem>>, vector<24x96xf32>
      %c0_12 = arith.constant 0 : index
      %c0_13 = arith.constant 0 : index
      %14 = vector.load %arg5[%c0_12, %c0_13] : memref<1x96xf32, #tpu.memory_space<vmem>>, vector<1x96xf32>
      %15 = vector.broadcast %14 : vector<1x96xf32> to vector<24x96xf32>
      %16 = arith.addf %13, %15 : vector<24x96xf32>
      %17 = arith.truncf %16 : vector<24x96xf32> to vector<24x96xbf16>
      %c0_14 = arith.constant 0 : index
      %c0_15 = arith.constant 0 : index
      %18 = vector.load %arg6[%c0_14, %c0_15] : memref<24x96xbf16, #tpu.memory_space<vmem>>, vector<24x96xbf16>
      tpu.vector_store %arg6[%c0_14, %c0_15], %17 {strides = array<i32>} : memref<24x96xbf16, #tpu.memory_space<vmem>>, vector<24x96xbf16>,
    } else {
    }
    return
  }
  func.func @transform_0(%arg0: i32, %arg1: i32, %arg2: i32) -> (i32, i32) {
    %c0_i32 = arith.constant 0 : i32
    return %arg0, %arg2 : i32, i32
  }
  func.func @transform_1(%arg0: i32, %arg1: i32, %arg2: i32) -> (i32, i32) {
    %c0_i32 = arith.constant 0 : i32
    return %arg2, %arg1 : i32, i32
  }
  func.func @transform_2(%arg0: i32, %arg1: i32, %arg2: i32) -> (i32, i32) {
    %c0_i32 = arith.constant 0 : i32
    %c0_i32_0 = arith.constant 0 : i32
    return %c0_i32, %arg1 : i32, i32
  }
  func.func @transform_3(%arg0: i32, %arg1: i32, %arg2: i32) -> (i32, i32) {
    %c0_i32 = arith.constant 0 : i32
    return %arg0, %arg1 : i32, i32
  }
}

module attributes {stable_mosaic.version = 11 : i64} {
  func.func @kernel(%arg0: i32, %arg1: i32, %arg2: memref<1x4x12x8xbf16, #tpu.memory_space<vmem>>, %arg3: memref<1x4x12x8xbf16, #tpu.memory_space<vmem>>, %arg4: memref<1x4x12x8xbf16, #tpu.memory_space<vmem>>, %arg5: memref<4x8x32xbf16, #tpu.memory_space<vmem>>, %arg6: memref<1x32xf32, #tpu.memory_space<vmem>>, %arg7: memref<1x12x32xf32, #tpu.memory_space<vmem>>, %arg8: memref<1x32xf32, #tpu.memory_space<vmem>>, %arg9: memref<1x32xf32, #tpu.memory_space<vmem>>, %arg10: memref<1x12x32xf32, #tpu.memory_space<vmem>>) attributes {dimension_semantics = [#tpu.dimension_semantics<parallel>, #tpu.dimension_semantics<parallel>], iteration_bounds = array<i64: 2, 1>, scalar_prefetch = 0 : i64, scratch_operands = 0 : i64, tpu.core_type = #tpu.core_type<tc>, window_params = [{transform_indices = @transform_0, window_bounds = array<i64: 1, 4, 12, 8>}, {transform_indices = @transform_1, window_bounds = array<i64: 1, 4, 12, 8>}, {transform_indices = @transform_2, window_bounds = array<i64: 1, 4, 12, 8>}, {pipeline_mode = #tpu.pipeline_mode<synchronous>, transform_indices = @transform_3, window_bounds = array<i64: 4, 8, 32>}, {pipeline_mode = #tpu.pipeline_mode<synchronous>, transform_indices = @transform_4, window_bounds = array<i64: 1, 32>}, {transform_indices = @transform_5, window_bounds = array<i64: 1, 12, 32>}, {pipeline_mode = #tpu.pipeline_mode<synchronous>, transform_indices = @transform_6, window_bounds = array<i64: 1, 32>}, {pipeline_mode = #tpu.pipeline_mode<synchronous>, transform_indices = @transform_7, window_bounds = array<i64: 1, 32>}, {transform_indices = @transform_8, window_bounds = array<i64: 1, 12, 32>}]} {
    %c0 = arith.constant 0 : index
    %c0_0 = arith.constant 0 : index
    %c0_1 = arith.constant 0 : index
    %c0_2 = arith.constant 0 : index
    %0 = vector.load %arg2[%c0, %c0_0, %c0_1, %c0_2] : memref<1x4x12x8xbf16, #tpu.memory_space<vmem>>, vector<1x4x12x8xbf16>
    %1 = vector.shape_cast %0 : vector<1x4x12x8xbf16> to vector<4x12x8xbf16>
    %c0_3 = arith.constant 0 : index
    %c0_4 = arith.constant 0 : index
    %c0_5 = arith.constant 0 : index
    %c0_6 = arith.constant 0 : index
    %2 = vector.load %arg3[%c0_3, %c0_4, %c0_5, %c0_6] : memref<1x4x12x8xbf16, #tpu.memory_space<vmem>>, vector<1x4x12x8xbf16>
    %3 = vector.shape_cast %2 : vector<1x4x12x8xbf16> to vector<4x12x8xbf16>
    %c0_7 = arith.constant 0 : index
    %c0_8 = arith.constant 0 : index
    %c0_9 = arith.constant 0 : index
    %c0_10 = arith.constant 0 : index
    %4 = vector.load %arg4[%c0_7, %c0_8, %c0_9, %c0_10] : memref<1x4x12x8xbf16, #tpu.memory_space<vmem>>, vector<1x4x12x8xbf16>
    %5 = vector.shape_cast %4 : vector<1x4x12x8xbf16> to vector<4x12x8xbf16>
    "tpu.trace_start"() <{level = 10 : i32, message = "hqd,hkd->hqk"}> : () -> ()
    %cst = arith.constant dense<0.000000e+00> : vector<4x12x12xf32>
    %6 = tpu.matmul %1, %3, %cst {dimension_numbers = #tpu.dot_dimension_numbers<[2], [2], [1], [1], [0, 0, 0, 1, 1, 1], [0], [0]>} : vector<4x12x8xbf16>, vector<4x12x8xbf16>, vector<4x12x12xf32> -> vector<4x12x12xf32>
    "tpu.trace_stop"() : () -> ()
    %cst_11 = arith.constant dense<0xFF800000> : vector<4x12xf32>
    %7 = vector.multi_reduction <maximumf>, %6, %cst_11 [2] : vector<4x12x12xf32> to vector<4x12xf32>
    %8 = vector.shape_cast %7 : vector<4x12xf32> to vector<4x12x1xf32>
    %9 = vector.broadcast %8 : vector<4x12x1xf32> to vector<4x12x12xf32>
    %10 = arith.subf %6, %9 : vector<4x12x12xf32>
    %11 = math.exp %10 : vector<4x12x12xf32>
    %cst_12 = arith.constant dense<0.000000e+00> : vector<4x12xf32>
    %12 = vector.multi_reduction <add>, %11, %cst_12 [2] : vector<4x12x12xf32> to vector<4x12xf32>
    %13 = vector.shape_cast %12 : vector<4x12xf32> to vector<4x12x1xf32>
    %14 = arith.truncf %11 : vector<4x12x12xf32> to vector<4x12x12xbf16>
    "tpu.trace_start"() <{level = 10 : i32, message = "hqk,hkd->hqd"}> : () -> ()
    %cst_13 = arith.constant dense<0.000000e+00> : vector<4x12x8xf32>
    %15 = tpu.matmul %14, %5, %cst_13 {dimension_numbers = #tpu.dot_dimension_numbers<[2], [1], [1], [2], [0, 0, 0, 1, 1, 2], [0], [0]>} : vector<4x12x12xbf16>, vector<4x12x8xbf16>, vector<4x12x8xf32> -> vector<4x12x8xf32>
    "tpu.trace_stop"() : () -> ()
    %16 = tpu.reciprocal %13 : vector<4x12x1xf32> -> vector<4x12x1xf32>
    %17 = vector.broadcast %16 : vector<4x12x1xf32> to vector<4x12x8xf32>
    %18 = arith.mulf %15, %17 : vector<4x12x8xf32>
    %19 = arith.truncf %18 : vector<4x12x8xf32> to vector<4x12x8xbf16>
    %c0_14 = arith.constant 0 : index
    %c0_15 = arith.constant 0 : index
    %c0_16 = arith.constant 0 : index
    %20 = vector.load %arg5[%c0_14, %c0_15, %c0_16] : memref<4x8x32xbf16, #tpu.memory_space<vmem>>, vector<4x8x32xbf16>
    "tpu.trace_start"() <{level = 10 : i32, message = "hqd,hde->hqe"}> : () -> ()
    %cst_17 = arith.constant dense<0.000000e+00> : vector<4x12x32xf32>
    %21 = tpu.matmul %19, %20, %cst_17 {dimension_numbers = #tpu.dot_dimension_numbers<[2], [1], [1], [2], [0, 0, 0, 1, 1, 2], [0], [0]>} : vector<4x12x8xbf16>, vector<4x8x32xbf16>, vector<4x12x32xf32> -> vector<4x12x32xf32>
    "tpu.trace_stop"() : () -> ()
    %cst_18 = arith.constant dense<0.000000e+00> : vector<12x32xf32>
    %22 = vector.multi_reduction <add>, %21, %cst_18 [0] : vector<4x12x32xf32> to vector<12x32xf32>
    %c0_19 = arith.constant 0 : index
    %c0_20 = arith.constant 0 : index
    %23 = vector.load %arg6[%c0_19, %c0_20] : memref<1x32xf32, #tpu.memory_space<vmem>>, vector<1x32xf32>
    %24 = vector.broadcast %23 : vector<1x32xf32> to vector<12x32xf32>
    %25 = arith.addf %22, %24 : vector<12x32xf32>
    %c0_21 = arith.constant 0 : index
    %c0_22 = arith.constant 0 : index
    %c0_23 = arith.constant 0 : index
    %26 = vector.load %arg7[%c0_21, %c0_22, %c0_23] : memref<1x12x32xf32, #tpu.memory_space<vmem>>, vector<1x12x32xf32>
    %27 = vector.shape_cast %26 : vector<1x12x32xf32> to vector<12x32xf32>
    %28 = arith.addf %27, %25 : vector<12x32xf32>
    %cst_24 = arith.constant dense<0.000000e+00> : vector<12xf32>
    %29 = vector.multi_reduction <add>, %28, %cst_24 [1] : vector<12x32xf32> to vector<12xf32>
    %30 = vector.shape_cast %29 : vector<12xf32> to vector<12x1xf32>
    %cst_25 = arith.constant 3.200000e+01 : f32
    %31 = vector.broadcast %cst_25 : f32 to vector<12x1xf32>
    %32 = arith.divf %30, %31 : vector<12x1xf32>
    %33 = vector.broadcast %32 : vector<12x1xf32> to vector<12x32xf32>
    %34 = arith.subf %28, %33 : vector<12x32xf32>
    %35 = arith.mulf %34, %34 : vector<12x32xf32>
    %cst_26 = arith.constant dense<0.000000e+00> : vector<12xf32>
    %36 = vector.multi_reduction <add>, %35, %cst_26 [1] : vector<12x32xf32> to vector<12xf32>
    %37 = vector.shape_cast %36 : vector<12xf32> to vector<12x1xf32>
    %cst_27 = arith.constant 3.200000e+01 : f32
    %38 = vector.broadcast %cst_27 : f32 to vector<12x1xf32>
    %39 = arith.divf %37, %38 : vector<12x1xf32>
    %40 = vector.broadcast %32 : vector<12x1xf32> to vector<12x32xf32>
    %41 = arith.subf %28, %40 : vector<12x32xf32>
    %cst_28 = arith.constant 9.99999974E-6 : f32
    %42 = vector.broadcast %cst_28 : f32 to vector<12x1xf32>
    %43 = arith.addf %39, %42 : vector<12x1xf32>
    %44 = math.rsqrt %43 : vector<12x1xf32>
    %45 = vector.broadcast %44 : vector<12x1xf32> to vector<12x32xf32>
    %46 = arith.mulf %41, %45 : vector<12x32xf32>
    %c0_29 = arith.constant 0 : index
    %c0_30 = arith.constant 0 : index
    %47 = vector.load %arg8[%c0_29, %c0_30] : memref<1x32xf32, #tpu.memory_space<vmem>>, vector<1x32xf32>
    %48 = vector.broadcast %47 : vector<1x32xf32> to vector<12x32xf32>
    %49 = arith.mulf %46, %48 : vector<12x32xf32>
    %c0_31 = arith.constant 0 : index
    %c0_32 = arith.constant 0 : index
    %50 = vector.load %arg9[%c0_31, %c0_32] : memref<1x32xf32, #tpu.memory_space<vmem>>, vector<1x32xf32>
    %51 = vector.broadcast %50 : vector<1x32xf32> to vector<12x32xf32>
    %52 = arith.addf %49, %51 : vector<12x32xf32>
    %c0_33 = arith.constant 0 : index
    %c0_34 = arith.constant 0 : index
    %c0_35 = arith.constant 0 : index
    %53 = vector.load %arg10[%c0_33, %c0_34, %c0_35] : memref<1x12x32xf32, #tpu.memory_space<vmem>>, vector<1x12x32xf32>
    %54 = vector.shape_cast %53 : vector<1x12x32xf32> to vector<12x32xf32>
    %55 = vector.shape_cast %52 : vector<12x32xf32> to vector<1x12x32xf32>
    tpu.vector_store %arg10[%c0_33, %c0_34, %c0_35], %55 {strides = array<i32>} : memref<1x12x32xf32, #tpu.memory_space<vmem>>, vector<1x12x32xf32>,
    return
  }
  func.func @transform_0(%arg0: i32, %arg1: i32) -> (i32, i32, i32, i32) {
    %c0_i32 = arith.constant 0 : i32
    %c0_i32_0 = arith.constant 0 : i32
    %c0_i32_1 = arith.constant 0 : i32
    return %arg0, %c0_i32, %arg1, %c0_i32_0 : i32, i32, i32, i32
  }
  func.func @transform_1(%arg0: i32, %arg1: i32) -> (i32, i32, i32, i32) {
    %c0_i32 = arith.constant 0 : i32
    %c0_i32_0 = arith.constant 0 : i32
    %c0_i32_1 = arith.constant 0 : i32
    %c0_i32_2 = arith.constant 0 : i32
    return %arg0, %c0_i32, %c0_i32_0, %c0_i32_1 : i32, i32, i32, i32
  }
  func.func @transform_2(%arg0: i32, %arg1: i32) -> (i32, i32, i32, i32) {
    %c0_i32 = arith.constant 0 : i32
    %c0_i32_0 = arith.constant 0 : i32
    %c0_i32_1 = arith.constant 0 : i32
    %c0_i32_2 = arith.constant 0 : i32
    return %arg0, %c0_i32, %c0_i32_0, %c0_i32_1 : i32, i32, i32, i32
  }
  func.func @transform_3(%arg0: i32, %arg1: i32) -> (i32, i32, i32) {
    %c0_i32 = arith.constant 0 : i32
    %c0_i32_0 = arith.constant 0 : i32
    %c0_i32_1 = arith.constant 0 : i32
    %c0_i32_2 = arith.constant 0 : i32
    return %c0_i32, %c0_i32_0, %c0_i32_1 : i32, i32, i32
  }
  func.func @transform_4(%arg0: i32, %arg1: i32) -> (i32, i32) {
    %c0_i32 = arith.constant 0 : i32
    %c0_i32_0 = arith.constant 0 : i32
    %c0_i32_1 = arith.constant 0 : i32
    return %c0_i32, %c0_i32_0 : i32, i32
  }
  func.func @transform_5(%arg0: i32, %arg1: i32) -> (i32, i32, i32) {
    %c0_i32 = arith.constant 0 : i32
    %c0_i32_0 = arith.constant 0 : i32
    return %arg0, %arg1, %c0_i32 : i32, i32, i32
  }
  func.func @transform_6(%arg0: i32, %arg1: i32) -> (i32, i32) {
    %c0_i32 = arith.constant 0 : i32
    %c0_i32_0 = arith.constant 0 : i32
    %c0_i32_1 = arith.constant 0 : i32
    return %c0_i32, %c0_i32_0 : i32, i32
  }
  func.func @transform_7(%arg0: i32, %arg1: i32) -> (i32, i32) {
    %c0_i32 = arith.constant 0 : i32
    %c0_i32_0 = arith.constant 0 : i32
    %c0_i32_1 = arith.constant 0 : i32
    return %c0_i32, %c0_i32_0 : i32, i32
  }
  func.func @transform_8(%arg0: i32, %arg1: i32) -> (i32, i32, i32) {
    %c0_i32 = arith.constant 0 : i32
    %c0_i32_0 = arith.constant 0 : i32
    return %arg0, %arg1, %c0_i32 : i32, i32, i32
  }
}

module attributes {stable_mosaic.version = 11 : i64} {
  func.func @_ffn_ln_kernel(%arg0: i32, %arg1: memref<24x32xf32, #tpu.memory_space<vmem>>, %arg2: memref<32x2048xbf16, #tpu.memory_space<vmem>>, %arg3: memref<1x2048xf32, #tpu.memory_space<vmem>>, %arg4: memref<2048x32xbf16, #tpu.memory_space<vmem>>, %arg5: memref<1x32xf32, #tpu.memory_space<vmem>>, %arg6: memref<1x32xf32, #tpu.memory_space<vmem>>, %arg7: memref<1x32xf32, #tpu.memory_space<vmem>>, %arg8: memref<24x32xf32, #tpu.memory_space<vmem>>) attributes {dimension_semantics = [#tpu.dimension_semantics<parallel>], iteration_bounds = array<i64: 1>, scalar_prefetch = 0 : i64, scratch_operands = 0 : i64, tpu.core_type = #tpu.core_type<tc>, window_params = [{transform_indices = @transform_0, window_bounds = array<i64: 24, 32>}, {pipeline_mode = #tpu.pipeline_mode<synchronous>, transform_indices = @transform_1, window_bounds = array<i64: 32, 2048>}, {pipeline_mode = #tpu.pipeline_mode<synchronous>, transform_indices = @transform_2, window_bounds = array<i64: 1, 2048>}, {pipeline_mode = #tpu.pipeline_mode<synchronous>, transform_indices = @transform_3, window_bounds = array<i64: 2048, 32>}, {pipeline_mode = #tpu.pipeline_mode<synchronous>, transform_indices = @transform_4, window_bounds = array<i64: 1, 32>}, {pipeline_mode = #tpu.pipeline_mode<synchronous>, transform_indices = @transform_5, window_bounds = array<i64: 1, 32>}, {pipeline_mode = #tpu.pipeline_mode<synchronous>, transform_indices = @transform_6, window_bounds = array<i64: 1, 32>}, {transform_indices = @transform_7, window_bounds = array<i64: 24, 32>}]} {
    %c0 = arith.constant 0 : index
    %c0_0 = arith.constant 0 : index
    %0 = vector.load %arg1[%c0, %c0_0] : memref<24x32xf32, #tpu.memory_space<vmem>>, vector<24x32xf32>
    %1 = arith.truncf %0 : vector<24x32xf32> to vector<24x32xbf16>
    %c0_1 = arith.constant 0 : index
    %c0_2 = arith.constant 0 : index
    %2 = vector.load %arg2[%c0_1, %c0_2] : memref<32x2048xbf16, #tpu.memory_space<vmem>>, vector<32x2048xbf16>
    %cst = arith.constant dense<0.000000e+00> : vector<24x2048xf32>
    %3 = tpu.matmul %1, %2, %cst {dimension_numbers = #tpu.dot_dimension_numbers<[1], [0], [0], [1], [0, 0, 1, 1], [], []>} : vector<24x32xbf16>, vector<32x2048xbf16>, vector<24x2048xf32> -> vector<24x2048xf32>
    %c0_3 = arith.constant 0 : index
    %c0_4 = arith.constant 0 : index
    %4 = vector.load %arg3[%c0_3, %c0_4] : memref<1x2048xf32, #tpu.memory_space<vmem>>, vector<1x2048xf32>
    %5 = vector.broadcast %4 : vector<1x2048xf32> to vector<24x2048xf32>
    %6 = arith.addf %3, %5 : vector<24x2048xf32>
    %cst_5 = arith.constant 0.000000e+00 : f32
    %7 = vector.broadcast %cst_5 : f32 to vector<24x2048xf32>
    %8 = arith.maximumf %6, %7 : vector<24x2048xf32>
    %9 = arith.truncf %8 : vector<24x2048xf32> to vector<24x2048xbf16>
    %c0_6 = arith.constant 0 : index
    %c0_7 = arith.constant 0 : index
    %10 = vector.load %arg4[%c0_6, %c0_7] : memref<2048x32xbf16, #tpu.memory_space<vmem>>, vector<2048x32xbf16>
    %cst_8 = arith.constant dense<0.000000e+00> : vector<24x32xf32>
    %11 = tpu.matmul %9, %10, %cst_8 {dimension_numbers = #tpu.dot_dimension_numbers<[1], [0], [0], [1], [0, 0, 1, 1], [], []>} : vector<24x2048xbf16>, vector<2048x32xbf16>, vector<24x32xf32> -> vector<24x32xf32>
    %c0_9 = arith.constant 0 : index
    %c0_10 = arith.constant 0 : index
    %12 = vector.load %arg5[%c0_9, %c0_10] : memref<1x32xf32, #tpu.memory_space<vmem>>, vector<1x32xf32>
    %13 = vector.broadcast %12 : vector<1x32xf32> to vector<24x32xf32>
    %14 = arith.addf %11, %13 : vector<24x32xf32>
    %15 = arith.addf %0, %14 : vector<24x32xf32>
    %cst_11 = arith.constant dense<0.000000e+00> : vector<24xf32>
    %16 = vector.multi_reduction <add>, %15, %cst_11 [1] : vector<24x32xf32> to vector<24xf32>
    %17 = vector.shape_cast %16 : vector<24xf32> to vector<24x1xf32>
    %cst_12 = arith.constant 3.200000e+01 : f32
    %18 = vector.broadcast %cst_12 : f32 to vector<24x1xf32>
    %19 = arith.divf %17, %18 : vector<24x1xf32>
    %20 = vector.broadcast %19 : vector<24x1xf32> to vector<24x32xf32>
    %21 = arith.subf %15, %20 : vector<24x32xf32>
    %22 = arith.mulf %21, %21 : vector<24x32xf32>
    %cst_13 = arith.constant dense<0.000000e+00> : vector<24xf32>
    %23 = vector.multi_reduction <add>, %22, %cst_13 [1] : vector<24x32xf32> to vector<24xf32>
    %24 = vector.shape_cast %23 : vector<24xf32> to vector<24x1xf32>
    %cst_14 = arith.constant 3.200000e+01 : f32
    %25 = vector.broadcast %cst_14 : f32 to vector<24x1xf32>
    %26 = arith.divf %24, %25 : vector<24x1xf32>
    %27 = vector.broadcast %19 : vector<24x1xf32> to vector<24x32xf32>
    %28 = arith.subf %15, %27 : vector<24x32xf32>
    %cst_15 = arith.constant 9.99999974E-6 : f32
    %29 = vector.broadcast %cst_15 : f32 to vector<24x1xf32>
    %30 = arith.addf %26, %29 : vector<24x1xf32>
    %31 = math.rsqrt %30 : vector<24x1xf32>
    %32 = vector.broadcast %31 : vector<24x1xf32> to vector<24x32xf32>
    %33 = arith.mulf %28, %32 : vector<24x32xf32>
    %c0_16 = arith.constant 0 : index
    %c0_17 = arith.constant 0 : index
    %34 = vector.load %arg6[%c0_16, %c0_17] : memref<1x32xf32, #tpu.memory_space<vmem>>, vector<1x32xf32>
    %35 = vector.broadcast %34 : vector<1x32xf32> to vector<24x32xf32>
    %36 = arith.mulf %33, %35 : vector<24x32xf32>
    %c0_18 = arith.constant 0 : index
    %c0_19 = arith.constant 0 : index
    %37 = vector.load %arg7[%c0_18, %c0_19] : memref<1x32xf32, #tpu.memory_space<vmem>>, vector<1x32xf32>
    %38 = vector.broadcast %37 : vector<1x32xf32> to vector<24x32xf32>
    %39 = arith.addf %36, %38 : vector<24x32xf32>
    %c0_20 = arith.constant 0 : index
    %c0_21 = arith.constant 0 : index
    %40 = vector.load %arg8[%c0_20, %c0_21] : memref<24x32xf32, #tpu.memory_space<vmem>>, vector<24x32xf32>
    tpu.vector_store %arg8[%c0_20, %c0_21], %39 {strides = array<i32>} : memref<24x32xf32, #tpu.memory_space<vmem>>, vector<24x32xf32>,
    return
  }
  func.func @transform_0(%arg0: i32) -> (i32, i32) {
    %c0_i32 = arith.constant 0 : i32
    %c0_i32_0 = arith.constant 0 : i32
    return %arg0, %c0_i32 : i32, i32
  }
  func.func @transform_1(%arg0: i32) -> (i32, i32) {
    %c0_i32 = arith.constant 0 : i32
    %c0_i32_0 = arith.constant 0 : i32
    %c0_i32_1 = arith.constant 0 : i32
    return %c0_i32, %c0_i32_0 : i32, i32
  }
  func.func @transform_2(%arg0: i32) -> (i32, i32) {
    %c0_i32 = arith.constant 0 : i32
    %c0_i32_0 = arith.constant 0 : i32
    %c0_i32_1 = arith.constant 0 : i32
    return %c0_i32, %c0_i32_0 : i32, i32
  }
  func.func @transform_3(%arg0: i32) -> (i32, i32) {
    %c0_i32 = arith.constant 0 : i32
    %c0_i32_0 = arith.constant 0 : i32
    %c0_i32_1 = arith.constant 0 : i32
    return %c0_i32, %c0_i32_0 : i32, i32
  }
  func.func @transform_4(%arg0: i32) -> (i32, i32) {
    %c0_i32 = arith.constant 0 : i32
    %c0_i32_0 = arith.constant 0 : i32
    %c0_i32_1 = arith.constant 0 : i32
    return %c0_i32, %c0_i32_0 : i32, i32
  }
  func.func @transform_5(%arg0: i32) -> (i32, i32) {
    %c0_i32 = arith.constant 0 : i32
    %c0_i32_0 = arith.constant 0 : i32
    %c0_i32_1 = arith.constant 0 : i32
    return %c0_i32, %c0_i32_0 : i32, i32
  }
  func.func @transform_6(%arg0: i32) -> (i32, i32) {
    %c0_i32 = arith.constant 0 : i32
    %c0_i32_0 = arith.constant 0 : i32
    %c0_i32_1 = arith.constant 0 : i32
    return %c0_i32, %c0_i32_0 : i32, i32
  }
  func.func @transform_7(%arg0: i32) -> (i32, i32) {
    %c0_i32 = arith.constant 0 : i32
    %c0_i32_0 = arith.constant 0 : i32
    return %arg0, %c0_i32 : i32, i32
  }
}

module attributes {stable_mosaic.version = 11 : i64} {
  func.func @_ln_kernel(%arg0: i32, %arg1: memref<24x32xf32, #tpu.memory_space<vmem>>, %arg2: memref<1x32xf32, #tpu.memory_space<vmem>>, %arg3: memref<1x32xf32, #tpu.memory_space<vmem>>, %arg4: memref<24x32xf32, #tpu.memory_space<vmem>>) attributes {dimension_semantics = [#tpu.dimension_semantics<parallel>], iteration_bounds = array<i64: 1>, scalar_prefetch = 0 : i64, scratch_operands = 0 : i64, tpu.core_type = #tpu.core_type<tc>, window_params = [{transform_indices = @transform_0, window_bounds = array<i64: 24, 32>}, {pipeline_mode = #tpu.pipeline_mode<synchronous>, transform_indices = @transform_1, window_bounds = array<i64: 1, 32>}, {pipeline_mode = #tpu.pipeline_mode<synchronous>, transform_indices = @transform_2, window_bounds = array<i64: 1, 32>}, {transform_indices = @transform_3, window_bounds = array<i64: 24, 32>}]} {
    %c0 = arith.constant 0 : index
    %c0_0 = arith.constant 0 : index
    %0 = vector.load %arg1[%c0, %c0_0] : memref<24x32xf32, #tpu.memory_space<vmem>>, vector<24x32xf32>
    %cst = arith.constant dense<0.000000e+00> : vector<24xf32>
    %1 = vector.multi_reduction <add>, %0, %cst [1] : vector<24x32xf32> to vector<24xf32>
    %2 = vector.shape_cast %1 : vector<24xf32> to vector<24x1xf32>
    %cst_1 = arith.constant 3.200000e+01 : f32
    %3 = vector.broadcast %cst_1 : f32 to vector<24x1xf32>
    %4 = arith.divf %2, %3 : vector<24x1xf32>
    %5 = vector.broadcast %4 : vector<24x1xf32> to vector<24x32xf32>
    %6 = arith.subf %0, %5 : vector<24x32xf32>
    %7 = arith.mulf %6, %6 : vector<24x32xf32>
    %cst_2 = arith.constant dense<0.000000e+00> : vector<24xf32>
    %8 = vector.multi_reduction <add>, %7, %cst_2 [1] : vector<24x32xf32> to vector<24xf32>
    %9 = vector.shape_cast %8 : vector<24xf32> to vector<24x1xf32>
    %cst_3 = arith.constant 3.200000e+01 : f32
    %10 = vector.broadcast %cst_3 : f32 to vector<24x1xf32>
    %11 = arith.divf %9, %10 : vector<24x1xf32>
    %12 = vector.broadcast %4 : vector<24x1xf32> to vector<24x32xf32>
    %13 = arith.subf %0, %12 : vector<24x32xf32>
    %cst_4 = arith.constant 9.99999974E-6 : f32
    %14 = vector.broadcast %cst_4 : f32 to vector<24x1xf32>
    %15 = arith.addf %11, %14 : vector<24x1xf32>
    %16 = math.rsqrt %15 : vector<24x1xf32>
    %17 = vector.broadcast %16 : vector<24x1xf32> to vector<24x32xf32>
    %18 = arith.mulf %13, %17 : vector<24x32xf32>
    %c0_5 = arith.constant 0 : index
    %c0_6 = arith.constant 0 : index
    %19 = vector.load %arg2[%c0_5, %c0_6] : memref<1x32xf32, #tpu.memory_space<vmem>>, vector<1x32xf32>
    %20 = vector.broadcast %19 : vector<1x32xf32> to vector<24x32xf32>
    %21 = arith.mulf %18, %20 : vector<24x32xf32>
    %c0_7 = arith.constant 0 : index
    %c0_8 = arith.constant 0 : index
    %22 = vector.load %arg3[%c0_7, %c0_8] : memref<1x32xf32, #tpu.memory_space<vmem>>, vector<1x32xf32>
    %23 = vector.broadcast %22 : vector<1x32xf32> to vector<24x32xf32>
    %24 = arith.addf %21, %23 : vector<24x32xf32>
    %c0_9 = arith.constant 0 : index
    %c0_10 = arith.constant 0 : index
    %25 = vector.load %arg4[%c0_9, %c0_10] : memref<24x32xf32, #tpu.memory_space<vmem>>, vector<24x32xf32>
    tpu.vector_store %arg4[%c0_9, %c0_10], %24 {strides = array<i32>} : memref<24x32xf32, #tpu.memory_space<vmem>>, vector<24x32xf32>,
    return
  }
  func.func @transform_0(%arg0: i32) -> (i32, i32) {
    %c0_i32 = arith.constant 0 : i32
    %c0_i32_0 = arith.constant 0 : i32
    return %arg0, %c0_i32 : i32, i32
  }
  func.func @transform_1(%arg0: i32) -> (i32, i32) {
    %c0_i32 = arith.constant 0 : i32
    %c0_i32_0 = arith.constant 0 : i32
    %c0_i32_1 = arith.constant 0 : i32
    return %c0_i32, %c0_i32_0 : i32, i32
  }
  func.func @transform_2(%arg0: i32) -> (i32, i32) {
    %c0_i32 = arith.constant 0 : i32
    %c0_i32_0 = arith.constant 0 : i32
    %c0_i32_1 = arith.constant 0 : i32
    return %c0_i32, %c0_i32_0 : i32, i32
  }
  func.func @transform_3(%arg0: i32) -> (i32, i32) {
    %c0_i32 = arith.constant 0 : i32
    %c0_i32_0 = arith.constant 0 : i32
    return %arg0, %c0_i32 : i32, i32
  }
}

module attributes {stable_mosaic.version = 11 : i64} {
  func.func @_matmul_kernel(%arg0: i32, %arg1: i32, %arg2: i32, %arg3: memref<24x32xf32, #tpu.memory_space<vmem>>, %arg4: memref<32x64xbf16, #tpu.memory_space<vmem>>, %arg5: memref<1x64xf32, #tpu.memory_space<vmem>>, %arg6: memref<24x64xbf16, #tpu.memory_space<vmem>>, %arg7: memref<24x64xf32, #tpu.memory_space<vmem>>) attributes {dimension_semantics = [#tpu.dimension_semantics<parallel>, #tpu.dimension_semantics<parallel>, #tpu.dimension_semantics<arbitrary>], iteration_bounds = array<i64: 1, 1, 1>, scalar_prefetch = 0 : i64, scratch_operands = 1 : i64, tpu.core_type = #tpu.core_type<tc>, window_params = [{transform_indices = @transform_0, window_bounds = array<i64: 24, 32>}, {transform_indices = @transform_1, window_bounds = array<i64: 32, 64>}, {transform_indices = @transform_2, window_bounds = array<i64: 1, 64>}, {transform_indices = @transform_3, window_bounds = array<i64: 24, 64>}]} {
    %c0_i32 = arith.constant 0 : i32
    %0 = arith.cmpi eq, %arg2, %c0_i32 : i32
    %1 = arith.extui %0 : i1 to i32
    %c0_i32_0 = arith.constant 0 : i32
    %2 = arith.cmpi ne, %1, %c0_i32_0 : i32
    scf.if %2 {
      %cst_10 = arith.constant 0.000000e+00 : f32
      %13 = vector.broadcast %cst_10 : f32 to vector<24x64xf32>
      %c0_11 = arith.constant 0 : index
      %c0_12 = arith.constant 0 : index
      %14 = vector.load %arg7[%c0_11, %c0_12] : memref<24x64xf32, #tpu.memory_space<vmem>>, vector<24x64xf32>
      tpu.vector_store %arg7[%c0_11, %c0_12], %13 {strides = array<i32>} : memref<24x64xf32, #tpu.memory_space<vmem>>, vector<24x64xf32>,
    } else {
    }
    %c0 = arith.constant 0 : index
    %c0_1 = arith.constant 0 : index
    %3 = vector.load %arg7[%c0, %c0_1] : memref<24x64xf32, #tpu.memory_space<vmem>>, vector<24x64xf32>
    %c0_2 = arith.constant 0 : index
    %c0_3 = arith.constant 0 : index
    %4 = vector.load %arg3[%c0_2, %c0_3] : memref<24x32xf32, #tpu.memory_space<vmem>>, vector<24x32xf32>
    %5 = arith.truncf %4 : vector<24x32xf32> to vector<24x32xbf16>
    %c0_4 = arith.constant 0 : index
    %c0_5 = arith.constant 0 : index
    %6 = vector.load %arg4[%c0_4, %c0_5] : memref<32x64xbf16, #tpu.memory_space<vmem>>, vector<32x64xbf16>
    %cst = arith.constant dense<0.000000e+00> : vector<24x64xf32>
    %7 = tpu.matmul %5, %6, %cst {dimension_numbers = #tpu.dot_dimension_numbers<[1], [0], [0], [1], [0, 0, 1, 1], [], []>} : vector<24x32xbf16>, vector<32x64xbf16>, vector<24x64xf32> -> vector<24x64xf32>
    %8 = arith.addf %3, %7 : vector<24x64xf32>
    %c0_6 = arith.constant 0 : index
    %c0_7 = arith.constant 0 : index
    %9 = vector.load %arg7[%c0_6, %c0_7] : memref<24x64xf32, #tpu.memory_space<vmem>>, vector<24x64xf32>
    tpu.vector_store %arg7[%c0_6, %c0_7], %8 {strides = array<i32>} : memref<24x64xf32, #tpu.memory_space<vmem>>, vector<24x64xf32>,
    %c0_i32_8 = arith.constant 0 : i32
    %10 = arith.cmpi eq, %arg2, %c0_i32_8 : i32
    %11 = arith.extui %10 : i1 to i32
    %c0_i32_9 = arith.constant 0 : i32
    %12 = arith.cmpi ne, %11, %c0_i32_9 : i32
    scf.if %12 {
      %c0_10 = arith.constant 0 : index
      %c0_11 = arith.constant 0 : index
      %13 = vector.load %arg7[%c0_10, %c0_11] : memref<24x64xf32, #tpu.memory_space<vmem>>, vector<24x64xf32>
      %c0_12 = arith.constant 0 : index
      %c0_13 = arith.constant 0 : index
      %14 = vector.load %arg5[%c0_12, %c0_13] : memref<1x64xf32, #tpu.memory_space<vmem>>, vector<1x64xf32>
      %15 = vector.broadcast %14 : vector<1x64xf32> to vector<24x64xf32>
      %16 = arith.addf %13, %15 : vector<24x64xf32>
      %17 = arith.truncf %16 : vector<24x64xf32> to vector<24x64xbf16>
      %c0_14 = arith.constant 0 : index
      %c0_15 = arith.constant 0 : index
      %18 = vector.load %arg6[%c0_14, %c0_15] : memref<24x64xbf16, #tpu.memory_space<vmem>>, vector<24x64xbf16>
      tpu.vector_store %arg6[%c0_14, %c0_15], %17 {strides = array<i32>} : memref<24x64xbf16, #tpu.memory_space<vmem>>, vector<24x64xbf16>,
    } else {
    }
    return
  }
  func.func @transform_0(%arg0: i32, %arg1: i32, %arg2: i32) -> (i32, i32) {
    %c0_i32 = arith.constant 0 : i32
    return %arg0, %arg2 : i32, i32
  }
  func.func @transform_1(%arg0: i32, %arg1: i32, %arg2: i32) -> (i32, i32) {
    %c0_i32 = arith.constant 0 : i32
    return %arg2, %arg1 : i32, i32
  }
  func.func @transform_2(%arg0: i32, %arg1: i32, %arg2: i32) -> (i32, i32) {
    %c0_i32 = arith.constant 0 : i32
    %c0_i32_0 = arith.constant 0 : i32
    return %c0_i32, %arg1 : i32, i32
  }
  func.func @transform_3(%arg0: i32, %arg1: i32, %arg2: i32) -> (i32, i32) {
    %c0_i32 = arith.constant 0 : i32
    return %arg0, %arg1 : i32, i32
  }
}

module attributes {stable_mosaic.version = 11 : i64} {
  func.func @_matmul_kernel(%arg0: i32, %arg1: i32, %arg2: i32, %arg3: memref<16x32xf32, #tpu.memory_space<vmem>>, %arg4: memref<32x96xbf16, #tpu.memory_space<vmem>>, %arg5: memref<1x96xf32, #tpu.memory_space<vmem>>, %arg6: memref<16x96xbf16, #tpu.memory_space<vmem>>, %arg7: memref<16x96xf32, #tpu.memory_space<vmem>>) attributes {dimension_semantics = [#tpu.dimension_semantics<parallel>, #tpu.dimension_semantics<parallel>, #tpu.dimension_semantics<arbitrary>], iteration_bounds = array<i64: 1, 1, 1>, scalar_prefetch = 0 : i64, scratch_operands = 1 : i64, tpu.core_type = #tpu.core_type<tc>, window_params = [{transform_indices = @transform_0, window_bounds = array<i64: 16, 32>}, {transform_indices = @transform_1, window_bounds = array<i64: 32, 96>}, {transform_indices = @transform_2, window_bounds = array<i64: 1, 96>}, {transform_indices = @transform_3, window_bounds = array<i64: 16, 96>}]} {
    %c0_i32 = arith.constant 0 : i32
    %0 = arith.cmpi eq, %arg2, %c0_i32 : i32
    %1 = arith.extui %0 : i1 to i32
    %c0_i32_0 = arith.constant 0 : i32
    %2 = arith.cmpi ne, %1, %c0_i32_0 : i32
    scf.if %2 {
      %cst_10 = arith.constant 0.000000e+00 : f32
      %13 = vector.broadcast %cst_10 : f32 to vector<16x96xf32>
      %c0_11 = arith.constant 0 : index
      %c0_12 = arith.constant 0 : index
      %14 = vector.load %arg7[%c0_11, %c0_12] : memref<16x96xf32, #tpu.memory_space<vmem>>, vector<16x96xf32>
      tpu.vector_store %arg7[%c0_11, %c0_12], %13 {strides = array<i32>} : memref<16x96xf32, #tpu.memory_space<vmem>>, vector<16x96xf32>,
    } else {
    }
    %c0 = arith.constant 0 : index
    %c0_1 = arith.constant 0 : index
    %3 = vector.load %arg7[%c0, %c0_1] : memref<16x96xf32, #tpu.memory_space<vmem>>, vector<16x96xf32>
    %c0_2 = arith.constant 0 : index
    %c0_3 = arith.constant 0 : index
    %4 = vector.load %arg3[%c0_2, %c0_3] : memref<16x32xf32, #tpu.memory_space<vmem>>, vector<16x32xf32>
    %5 = arith.truncf %4 : vector<16x32xf32> to vector<16x32xbf16>
    %c0_4 = arith.constant 0 : index
    %c0_5 = arith.constant 0 : index
    %6 = vector.load %arg4[%c0_4, %c0_5] : memref<32x96xbf16, #tpu.memory_space<vmem>>, vector<32x96xbf16>
    %cst = arith.constant dense<0.000000e+00> : vector<16x96xf32>
    %7 = tpu.matmul %5, %6, %cst {dimension_numbers = #tpu.dot_dimension_numbers<[1], [0], [0], [1], [0, 0, 1, 1], [], []>} : vector<16x32xbf16>, vector<32x96xbf16>, vector<16x96xf32> -> vector<16x96xf32>
    %8 = arith.addf %3, %7 : vector<16x96xf32>
    %c0_6 = arith.constant 0 : index
    %c0_7 = arith.constant 0 : index
    %9 = vector.load %arg7[%c0_6, %c0_7] : memref<16x96xf32, #tpu.memory_space<vmem>>, vector<16x96xf32>
    tpu.vector_store %arg7[%c0_6, %c0_7], %8 {strides = array<i32>} : memref<16x96xf32, #tpu.memory_space<vmem>>, vector<16x96xf32>,
    %c0_i32_8 = arith.constant 0 : i32
    %10 = arith.cmpi eq, %arg2, %c0_i32_8 : i32
    %11 = arith.extui %10 : i1 to i32
    %c0_i32_9 = arith.constant 0 : i32
    %12 = arith.cmpi ne, %11, %c0_i32_9 : i32
    scf.if %12 {
      %c0_10 = arith.constant 0 : index
      %c0_11 = arith.constant 0 : index
      %13 = vector.load %arg7[%c0_10, %c0_11] : memref<16x96xf32, #tpu.memory_space<vmem>>, vector<16x96xf32>
      %c0_12 = arith.constant 0 : index
      %c0_13 = arith.constant 0 : index
      %14 = vector.load %arg5[%c0_12, %c0_13] : memref<1x96xf32, #tpu.memory_space<vmem>>, vector<1x96xf32>
      %15 = vector.broadcast %14 : vector<1x96xf32> to vector<16x96xf32>
      %16 = arith.addf %13, %15 : vector<16x96xf32>
      %17 = arith.truncf %16 : vector<16x96xf32> to vector<16x96xbf16>
      %c0_14 = arith.constant 0 : index
      %c0_15 = arith.constant 0 : index
      %18 = vector.load %arg6[%c0_14, %c0_15] : memref<16x96xbf16, #tpu.memory_space<vmem>>, vector<16x96xbf16>
      tpu.vector_store %arg6[%c0_14, %c0_15], %17 {strides = array<i32>} : memref<16x96xbf16, #tpu.memory_space<vmem>>, vector<16x96xbf16>,
    } else {
    }
    return
  }
  func.func @transform_0(%arg0: i32, %arg1: i32, %arg2: i32) -> (i32, i32) {
    %c0_i32 = arith.constant 0 : i32
    return %arg0, %arg2 : i32, i32
  }
  func.func @transform_1(%arg0: i32, %arg1: i32, %arg2: i32) -> (i32, i32) {
    %c0_i32 = arith.constant 0 : i32
    return %arg2, %arg1 : i32, i32
  }
  func.func @transform_2(%arg0: i32, %arg1: i32, %arg2: i32) -> (i32, i32) {
    %c0_i32 = arith.constant 0 : i32
    %c0_i32_0 = arith.constant 0 : i32
    return %c0_i32, %arg1 : i32, i32
  }
  func.func @transform_3(%arg0: i32, %arg1: i32, %arg2: i32) -> (i32, i32) {
    %c0_i32 = arith.constant 0 : i32
    return %arg0, %arg1 : i32, i32
  }
}

module attributes {stable_mosaic.version = 11 : i64} {
  func.func @kernel(%arg0: i32, %arg1: i32, %arg2: memref<1x4x8x8xbf16, #tpu.memory_space<vmem>>, %arg3: memref<1x4x8x8xbf16, #tpu.memory_space<vmem>>, %arg4: memref<1x4x8x8xbf16, #tpu.memory_space<vmem>>, %arg5: memref<8x8xf32, #tpu.memory_space<vmem>>, %arg6: memref<4x8x32xbf16, #tpu.memory_space<vmem>>, %arg7: memref<1x32xf32, #tpu.memory_space<vmem>>, %arg8: memref<1x8x32xf32, #tpu.memory_space<vmem>>, %arg9: memref<1x32xf32, #tpu.memory_space<vmem>>, %arg10: memref<1x32xf32, #tpu.memory_space<vmem>>, %arg11: memref<1x8x32xf32, #tpu.memory_space<vmem>>) attributes {dimension_semantics = [#tpu.dimension_semantics<parallel>, #tpu.dimension_semantics<parallel>], iteration_bounds = array<i64: 2, 1>, scalar_prefetch = 0 : i64, scratch_operands = 0 : i64, tpu.core_type = #tpu.core_type<tc>, window_params = [{transform_indices = @transform_0, window_bounds = array<i64: 1, 4, 8, 8>}, {transform_indices = @transform_1, window_bounds = array<i64: 1, 4, 8, 8>}, {transform_indices = @transform_2, window_bounds = array<i64: 1, 4, 8, 8>}, {transform_indices = @transform_3, window_bounds = array<i64: 8, 8>}, {pipeline_mode = #tpu.pipeline_mode<synchronous>, transform_indices = @transform_4, window_bounds = array<i64: 4, 8, 32>}, {pipeline_mode = #tpu.pipeline_mode<synchronous>, transform_indices = @transform_5, window_bounds = array<i64: 1, 32>}, {transform_indices = @transform_6, window_bounds = array<i64: 1, 8, 32>}, {pipeline_mode = #tpu.pipeline_mode<synchronous>, transform_indices = @transform_7, window_bounds = array<i64: 1, 32>}, {pipeline_mode = #tpu.pipeline_mode<synchronous>, transform_indices = @transform_8, window_bounds = array<i64: 1, 32>}, {transform_indices = @transform_9, window_bounds = array<i64: 1, 8, 32>}]} {
    %c0 = arith.constant 0 : index
    %c0_0 = arith.constant 0 : index
    %c0_1 = arith.constant 0 : index
    %c0_2 = arith.constant 0 : index
    %0 = vector.load %arg2[%c0, %c0_0, %c0_1, %c0_2] : memref<1x4x8x8xbf16, #tpu.memory_space<vmem>>, vector<1x4x8x8xbf16>
    %1 = vector.shape_cast %0 : vector<1x4x8x8xbf16> to vector<4x8x8xbf16>
    %c0_3 = arith.constant 0 : index
    %c0_4 = arith.constant 0 : index
    %c0_5 = arith.constant 0 : index
    %c0_6 = arith.constant 0 : index
    %2 = vector.load %arg3[%c0_3, %c0_4, %c0_5, %c0_6] : memref<1x4x8x8xbf16, #tpu.memory_space<vmem>>, vector<1x4x8x8xbf16>
    %3 = vector.shape_cast %2 : vector<1x4x8x8xbf16> to vector<4x8x8xbf16>
    %c0_7 = arith.constant 0 : index
    %c0_8 = arith.constant 0 : index
    %c0_9 = arith.constant 0 : index
    %c0_10 = arith.constant 0 : index
    %4 = vector.load %arg4[%c0_7, %c0_8, %c0_9, %c0_10] : memref<1x4x8x8xbf16, #tpu.memory_space<vmem>>, vector<1x4x8x8xbf16>
    %5 = vector.shape_cast %4 : vector<1x4x8x8xbf16> to vector<4x8x8xbf16>
    "tpu.trace_start"() <{level = 10 : i32, message = "hqd,hkd->hqk"}> : () -> ()
    %cst = arith.constant dense<0.000000e+00> : vector<4x8x8xf32>
    %6 = tpu.matmul %1, %3, %cst {dimension_numbers = #tpu.dot_dimension_numbers<[2], [2], [1], [1], [0, 0, 0, 1, 1, 1], [0], [0]>} : vector<4x8x8xbf16>, vector<4x8x8xbf16>, vector<4x8x8xf32> -> vector<4x8x8xf32>
    "tpu.trace_stop"() : () -> ()
    %c0_11 = arith.constant 0 : index
    %c0_12 = arith.constant 0 : index
    %7 = vector.load %arg5[%c0_11, %c0_12] : memref<8x8xf32, #tpu.memory_space<vmem>>, vector<8x8xf32>
    %8 = vector.shape_cast %7 : vector<8x8xf32> to vector<1x8x8xf32>
    %9 = vector.broadcast %8 : vector<1x8x8xf32> to vector<4x8x8xf32>
    %10 = arith.addf %6, %9 : vector<4x8x8xf32>
    %cst_13 = arith.constant dense<0xFF800000> : vector<4x8xf32>
    %11 = vector.multi_reduction <maximumf>, %10, %cst_13 [2] : vector<4x8x8xf32> to vector<4x8xf32>
    %12 = vector.shape_cast %11 : vector<4x8xf32> to vector<4x8x1xf32>
    %13 = vector.broadcast %12 : vector<4x8x1xf32> to vector<4x8x8xf32>
    %14 = arith.subf %10, %13 : vector<4x8x8xf32>
    %15 = math.exp %14 : vector<4x8x8xf32>
    %cst_14 = arith.constant dense<0.000000e+00> : vector<4x8xf32>
    %16 = vector.multi_reduction <add>, %15, %cst_14 [2] : vector<4x8x8xf32> to vector<4x8xf32>
    %17 = vector.shape_cast %16 : vector<4x8xf32> to vector<4x8x1xf32>
    %18 = arith.truncf %15 : vector<4x8x8xf32> to vector<4x8x8xbf16>
    "tpu.trace_start"() <{level = 10 : i32, message = "hqk,hkd->hqd"}> : () -> ()
    %cst_15 = arith.constant dense<0.000000e+00> : vector<4x8x8xf32>
    %19 = tpu.matmul %18, %5, %cst_15 {dimension_numbers = #tpu.dot_dimension_numbers<[2], [1], [1], [2], [0, 0, 0, 1, 1, 2], [0], [0]>} : vector<4x8x8xbf16>, vector<4x8x8xbf16>, vector<4x8x8xf32> -> vector<4x8x8xf32>
    "tpu.trace_stop"() : () -> ()
    %20 = tpu.reciprocal %17 : vector<4x8x1xf32> -> vector<4x8x1xf32>
    %21 = vector.broadcast %20 : vector<4x8x1xf32> to vector<4x8x8xf32>
    %22 = arith.mulf %19, %21 : vector<4x8x8xf32>
    %23 = arith.truncf %22 : vector<4x8x8xf32> to vector<4x8x8xbf16>
    %c0_16 = arith.constant 0 : index
    %c0_17 = arith.constant 0 : index
    %c0_18 = arith.constant 0 : index
    %24 = vector.load %arg6[%c0_16, %c0_17, %c0_18] : memref<4x8x32xbf16, #tpu.memory_space<vmem>>, vector<4x8x32xbf16>
    "tpu.trace_start"() <{level = 10 : i32, message = "hqd,hde->hqe"}> : () -> ()
    %cst_19 = arith.constant dense<0.000000e+00> : vector<4x8x32xf32>
    %25 = tpu.matmul %23, %24, %cst_19 {dimension_numbers = #tpu.dot_dimension_numbers<[2], [1], [1], [2], [0, 0, 0, 1, 1, 2], [0], [0]>} : vector<4x8x8xbf16>, vector<4x8x32xbf16>, vector<4x8x32xf32> -> vector<4x8x32xf32>
    "tpu.trace_stop"() : () -> ()
    %cst_20 = arith.constant dense<0.000000e+00> : vector<8x32xf32>
    %26 = vector.multi_reduction <add>, %25, %cst_20 [0] : vector<4x8x32xf32> to vector<8x32xf32>
    %c0_21 = arith.constant 0 : index
    %c0_22 = arith.constant 0 : index
    %27 = vector.load %arg7[%c0_21, %c0_22] : memref<1x32xf32, #tpu.memory_space<vmem>>, vector<1x32xf32>
    %28 = vector.broadcast %27 : vector<1x32xf32> to vector<8x32xf32>
    %29 = arith.addf %26, %28 : vector<8x32xf32>
    %c0_23 = arith.constant 0 : index
    %c0_24 = arith.constant 0 : index
    %c0_25 = arith.constant 0 : index
    %30 = vector.load %arg8[%c0_23, %c0_24, %c0_25] : memref<1x8x32xf32, #tpu.memory_space<vmem>>, vector<1x8x32xf32>
    %31 = vector.shape_cast %30 : vector<1x8x32xf32> to vector<8x32xf32>
    %32 = arith.addf %31, %29 : vector<8x32xf32>
    %cst_26 = arith.constant dense<0.000000e+00> : vector<8xf32>
    %33 = vector.multi_reduction <add>, %32, %cst_26 [1] : vector<8x32xf32> to vector<8xf32>
    %34 = vector.shape_cast %33 : vector<8xf32> to vector<8x1xf32>
    %cst_27 = arith.constant 3.200000e+01 : f32
    %35 = vector.broadcast %cst_27 : f32 to vector<8x1xf32>
    %36 = arith.divf %34, %35 : vector<8x1xf32>
    %37 = vector.broadcast %36 : vector<8x1xf32> to vector<8x32xf32>
    %38 = arith.subf %32, %37 : vector<8x32xf32>
    %39 = arith.mulf %38, %38 : vector<8x32xf32>
    %cst_28 = arith.constant dense<0.000000e+00> : vector<8xf32>
    %40 = vector.multi_reduction <add>, %39, %cst_28 [1] : vector<8x32xf32> to vector<8xf32>
    %41 = vector.shape_cast %40 : vector<8xf32> to vector<8x1xf32>
    %cst_29 = arith.constant 3.200000e+01 : f32
    %42 = vector.broadcast %cst_29 : f32 to vector<8x1xf32>
    %43 = arith.divf %41, %42 : vector<8x1xf32>
    %44 = vector.broadcast %36 : vector<8x1xf32> to vector<8x32xf32>
    %45 = arith.subf %32, %44 : vector<8x32xf32>
    %cst_30 = arith.constant 9.99999974E-6 : f32
    %46 = vector.broadcast %cst_30 : f32 to vector<8x1xf32>
    %47 = arith.addf %43, %46 : vector<8x1xf32>
    %48 = math.rsqrt %47 : vector<8x1xf32>
    %49 = vector.broadcast %48 : vector<8x1xf32> to vector<8x32xf32>
    %50 = arith.mulf %45, %49 : vector<8x32xf32>
    %c0_31 = arith.constant 0 : index
    %c0_32 = arith.constant 0 : index
    %51 = vector.load %arg9[%c0_31, %c0_32] : memref<1x32xf32, #tpu.memory_space<vmem>>, vector<1x32xf32>
    %52 = vector.broadcast %51 : vector<1x32xf32> to vector<8x32xf32>
    %53 = arith.mulf %50, %52 : vector<8x32xf32>
    %c0_33 = arith.constant 0 : index
    %c0_34 = arith.constant 0 : index
    %54 = vector.load %arg10[%c0_33, %c0_34] : memref<1x32xf32, #tpu.memory_space<vmem>>, vector<1x32xf32>
    %55 = vector.broadcast %54 : vector<1x32xf32> to vector<8x32xf32>
    %56 = arith.addf %53, %55 : vector<8x32xf32>
    %c0_35 = arith.constant 0 : index
    %c0_36 = arith.constant 0 : index
    %c0_37 = arith.constant 0 : index
    %57 = vector.load %arg11[%c0_35, %c0_36, %c0_37] : memref<1x8x32xf32, #tpu.memory_space<vmem>>, vector<1x8x32xf32>
    %58 = vector.shape_cast %57 : vector<1x8x32xf32> to vector<8x32xf32>
    %59 = vector.shape_cast %56 : vector<8x32xf32> to vector<1x8x32xf32>
    tpu.vector_store %arg11[%c0_35, %c0_36, %c0_37], %59 {strides = array<i32>} : memref<1x8x32xf32, #tpu.memory_space<vmem>>, vector<1x8x32xf32>,
    return
  }
  func.func @transform_0(%arg0: i32, %arg1: i32) -> (i32, i32, i32, i32) {
    %c0_i32 = arith.constant 0 : i32
    %c0_i32_0 = arith.constant 0 : i32
    %c0_i32_1 = arith.constant 0 : i32
    return %arg0, %c0_i32, %arg1, %c0_i32_0 : i32, i32, i32, i32
  }
  func.func @transform_1(%arg0: i32, %arg1: i32) -> (i32, i32, i32, i32) {
    %c0_i32 = arith.constant 0 : i32
    %c0_i32_0 = arith.constant 0 : i32
    %c0_i32_1 = arith.constant 0 : i32
    %c0_i32_2 = arith.constant 0 : i32
    return %arg0, %c0_i32, %c0_i32_0, %c0_i32_1 : i32, i32, i32, i32
  }
  func.func @transform_2(%arg0: i32, %arg1: i32) -> (i32, i32, i32, i32) {
    %c0_i32 = arith.constant 0 : i32
    %c0_i32_0 = arith.constant 0 : i32
    %c0_i32_1 = arith.constant 0 : i32
    %c0_i32_2 = arith.constant 0 : i32
    return %arg0, %c0_i32, %c0_i32_0, %c0_i32_1 : i32, i32, i32, i32
  }
  func.func @transform_3(%arg0: i32, %arg1: i32) -> (i32, i32) {
    %c0_i32 = arith.constant 0 : i32
    %c0_i32_0 = arith.constant 0 : i32
    return %arg1, %c0_i32 : i32, i32
  }
  func.func @transform_4(%arg0: i32, %arg1: i32) -> (i32, i32, i32) {
    %c0_i32 = arith.constant 0 : i32
    %c0_i32_0 = arith.constant 0 : i32
    %c0_i32_1 = arith.constant 0 : i32
    %c0_i32_2 = arith.constant 0 : i32
    return %c0_i32, %c0_i32_0, %c0_i32_1 : i32, i32, i32
  }
  func.func @transform_5(%arg0: i32, %arg1: i32) -> (i32, i32) {
    %c0_i32 = arith.constant 0 : i32
    %c0_i32_0 = arith.constant 0 : i32
    %c0_i32_1 = arith.constant 0 : i32
    return %c0_i32, %c0_i32_0 : i32, i32
  }
  func.func @transform_6(%arg0: i32, %arg1: i32) -> (i32, i32, i32) {
    %c0_i32 = arith.constant 0 : i32
    %c0_i32_0 = arith.constant 0 : i32
    return %arg0, %arg1, %c0_i32 : i32, i32, i32
  }
  func.func @transform_7(%arg0: i32, %arg1: i32) -> (i32, i32) {
    %c0_i32 = arith.constant 0 : i32
    %c0_i32_0 = arith.constant 0 : i32
    %c0_i32_1 = arith.constant 0 : i32
    return %c0_i32, %c0_i32_0 : i32, i32
  }
  func.func @transform_8(%arg0: i32, %arg1: i32) -> (i32, i32) {
    %c0_i32 = arith.constant 0 : i32
    %c0_i32_0 = arith.constant 0 : i32
    %c0_i32_1 = arith.constant 0 : i32
    return %c0_i32, %c0_i32_0 : i32, i32
  }
  func.func @transform_9(%arg0: i32, %arg1: i32) -> (i32, i32, i32) {
    %c0_i32 = arith.constant 0 : i32
    %c0_i32_0 = arith.constant 0 : i32
    return %arg0, %arg1, %c0_i32 : i32, i32, i32
  }
}

module attributes {stable_mosaic.version = 11 : i64} {
  func.func @_matmul_kernel(%arg0: i32, %arg1: i32, %arg2: i32, %arg3: memref<16x32xf32, #tpu.memory_space<vmem>>, %arg4: memref<32x32xbf16, #tpu.memory_space<vmem>>, %arg5: memref<1x32xf32, #tpu.memory_space<vmem>>, %arg6: memref<16x32xbf16, #tpu.memory_space<vmem>>, %arg7: memref<16x32xf32, #tpu.memory_space<vmem>>) attributes {dimension_semantics = [#tpu.dimension_semantics<parallel>, #tpu.dimension_semantics<parallel>, #tpu.dimension_semantics<arbitrary>], iteration_bounds = array<i64: 1, 1, 1>, scalar_prefetch = 0 : i64, scratch_operands = 1 : i64, tpu.core_type = #tpu.core_type<tc>, window_params = [{transform_indices = @transform_0, window_bounds = array<i64: 16, 32>}, {transform_indices = @transform_1, window_bounds = array<i64: 32, 32>}, {transform_indices = @transform_2, window_bounds = array<i64: 1, 32>}, {transform_indices = @transform_3, window_bounds = array<i64: 16, 32>}]} {
    %c0_i32 = arith.constant 0 : i32
    %0 = arith.cmpi eq, %arg2, %c0_i32 : i32
    %1 = arith.extui %0 : i1 to i32
    %c0_i32_0 = arith.constant 0 : i32
    %2 = arith.cmpi ne, %1, %c0_i32_0 : i32
    scf.if %2 {
      %cst_10 = arith.constant 0.000000e+00 : f32
      %13 = vector.broadcast %cst_10 : f32 to vector<16x32xf32>
      %c0_11 = arith.constant 0 : index
      %c0_12 = arith.constant 0 : index
      %14 = vector.load %arg7[%c0_11, %c0_12] : memref<16x32xf32, #tpu.memory_space<vmem>>, vector<16x32xf32>
      tpu.vector_store %arg7[%c0_11, %c0_12], %13 {strides = array<i32>} : memref<16x32xf32, #tpu.memory_space<vmem>>, vector<16x32xf32>,
    } else {
    }
    %c0 = arith.constant 0 : index
    %c0_1 = arith.constant 0 : index
    %3 = vector.load %arg7[%c0, %c0_1] : memref<16x32xf32, #tpu.memory_space<vmem>>, vector<16x32xf32>
    %c0_2 = arith.constant 0 : index
    %c0_3 = arith.constant 0 : index
    %4 = vector.load %arg3[%c0_2, %c0_3] : memref<16x32xf32, #tpu.memory_space<vmem>>, vector<16x32xf32>
    %5 = arith.truncf %4 : vector<16x32xf32> to vector<16x32xbf16>
    %c0_4 = arith.constant 0 : index
    %c0_5 = arith.constant 0 : index
    %6 = vector.load %arg4[%c0_4, %c0_5] : memref<32x32xbf16, #tpu.memory_space<vmem>>, vector<32x32xbf16>
    %cst = arith.constant dense<0.000000e+00> : vector<16x32xf32>
    %7 = tpu.matmul %5, %6, %cst {dimension_numbers = #tpu.dot_dimension_numbers<[1], [0], [0], [1], [0, 0, 1, 1], [], []>} : vector<16x32xbf16>, vector<32x32xbf16>, vector<16x32xf32> -> vector<16x32xf32>
    %8 = arith.addf %3, %7 : vector<16x32xf32>
    %c0_6 = arith.constant 0 : index
    %c0_7 = arith.constant 0 : index
    %9 = vector.load %arg7[%c0_6, %c0_7] : memref<16x32xf32, #tpu.memory_space<vmem>>, vector<16x32xf32>
    tpu.vector_store %arg7[%c0_6, %c0_7], %8 {strides = array<i32>} : memref<16x32xf32, #tpu.memory_space<vmem>>, vector<16x32xf32>,
    %c0_i32_8 = arith.constant 0 : i32
    %10 = arith.cmpi eq, %arg2, %c0_i32_8 : i32
    %11 = arith.extui %10 : i1 to i32
    %c0_i32_9 = arith.constant 0 : i32
    %12 = arith.cmpi ne, %11, %c0_i32_9 : i32
    scf.if %12 {
      %c0_10 = arith.constant 0 : index
      %c0_11 = arith.constant 0 : index
      %13 = vector.load %arg7[%c0_10, %c0_11] : memref<16x32xf32, #tpu.memory_space<vmem>>, vector<16x32xf32>
      %c0_12 = arith.constant 0 : index
      %c0_13 = arith.constant 0 : index
      %14 = vector.load %arg5[%c0_12, %c0_13] : memref<1x32xf32, #tpu.memory_space<vmem>>, vector<1x32xf32>
      %15 = vector.broadcast %14 : vector<1x32xf32> to vector<16x32xf32>
      %16 = arith.addf %13, %15 : vector<16x32xf32>
      %17 = arith.truncf %16 : vector<16x32xf32> to vector<16x32xbf16>
      %c0_14 = arith.constant 0 : index
      %c0_15 = arith.constant 0 : index
      %18 = vector.load %arg6[%c0_14, %c0_15] : memref<16x32xbf16, #tpu.memory_space<vmem>>, vector<16x32xbf16>
      tpu.vector_store %arg6[%c0_14, %c0_15], %17 {strides = array<i32>} : memref<16x32xbf16, #tpu.memory_space<vmem>>, vector<16x32xbf16>,
    } else {
    }
    return
  }
  func.func @transform_0(%arg0: i32, %arg1: i32, %arg2: i32) -> (i32, i32) {
    %c0_i32 = arith.constant 0 : i32
    return %arg0, %arg2 : i32, i32
  }
  func.func @transform_1(%arg0: i32, %arg1: i32, %arg2: i32) -> (i32, i32) {
    %c0_i32 = arith.constant 0 : i32
    return %arg2, %arg1 : i32, i32
  }
  func.func @transform_2(%arg0: i32, %arg1: i32, %arg2: i32) -> (i32, i32) {
    %c0_i32 = arith.constant 0 : i32
    %c0_i32_0 = arith.constant 0 : i32
    return %c0_i32, %arg1 : i32, i32
  }
  func.func @transform_3(%arg0: i32, %arg1: i32, %arg2: i32) -> (i32, i32) {
    %c0_i32 = arith.constant 0 : i32
    return %arg0, %arg1 : i32, i32
  }
}

module attributes {stable_mosaic.version = 11 : i64} {
  func.func @kernel(%arg0: i32, %arg1: i32, %arg2: memref<1x4x8x8xbf16, #tpu.memory_space<vmem>>, %arg3: memref<1x4x12x8xbf16, #tpu.memory_space<vmem>>, %arg4: memref<1x4x12x8xbf16, #tpu.memory_space<vmem>>, %arg5: memref<4x8x32xbf16, #tpu.memory_space<vmem>>, %arg6: memref<1x32xf32, #tpu.memory_space<vmem>>, %arg7: memref<1x8x32xf32, #tpu.memory_space<vmem>>, %arg8: memref<1x32xf32, #tpu.memory_space<vmem>>, %arg9: memref<1x32xf32, #tpu.memory_space<vmem>>, %arg10: memref<1x8x32xf32, #tpu.memory_space<vmem>>) attributes {dimension_semantics = [#tpu.dimension_semantics<parallel>, #tpu.dimension_semantics<parallel>], iteration_bounds = array<i64: 2, 1>, scalar_prefetch = 0 : i64, scratch_operands = 0 : i64, tpu.core_type = #tpu.core_type<tc>, window_params = [{transform_indices = @transform_0, window_bounds = array<i64: 1, 4, 8, 8>}, {transform_indices = @transform_1, window_bounds = array<i64: 1, 4, 12, 8>}, {transform_indices = @transform_2, window_bounds = array<i64: 1, 4, 12, 8>}, {pipeline_mode = #tpu.pipeline_mode<synchronous>, transform_indices = @transform_3, window_bounds = array<i64: 4, 8, 32>}, {pipeline_mode = #tpu.pipeline_mode<synchronous>, transform_indices = @transform_4, window_bounds = array<i64: 1, 32>}, {transform_indices = @transform_5, window_bounds = array<i64: 1, 8, 32>}, {pipeline_mode = #tpu.pipeline_mode<synchronous>, transform_indices = @transform_6, window_bounds = array<i64: 1, 32>}, {pipeline_mode = #tpu.pipeline_mode<synchronous>, transform_indices = @transform_7, window_bounds = array<i64: 1, 32>}, {transform_indices = @transform_8, window_bounds = array<i64: 1, 8, 32>}]} {
    %c0 = arith.constant 0 : index
    %c0_0 = arith.constant 0 : index
    %c0_1 = arith.constant 0 : index
    %c0_2 = arith.constant 0 : index
    %0 = vector.load %arg2[%c0, %c0_0, %c0_1, %c0_2] : memref<1x4x8x8xbf16, #tpu.memory_space<vmem>>, vector<1x4x8x8xbf16>
    %1 = vector.shape_cast %0 : vector<1x4x8x8xbf16> to vector<4x8x8xbf16>
    %c0_3 = arith.constant 0 : index
    %c0_4 = arith.constant 0 : index
    %c0_5 = arith.constant 0 : index
    %c0_6 = arith.constant 0 : index
    %2 = vector.load %arg3[%c0_3, %c0_4, %c0_5, %c0_6] : memref<1x4x12x8xbf16, #tpu.memory_space<vmem>>, vector<1x4x12x8xbf16>
    %3 = vector.shape_cast %2 : vector<1x4x12x8xbf16> to vector<4x12x8xbf16>
    %c0_7 = arith.constant 0 : index
    %c0_8 = arith.constant 0 : index
    %c0_9 = arith.constant 0 : index
    %c0_10 = arith.constant 0 : index
    %4 = vector.load %arg4[%c0_7, %c0_8, %c0_9, %c0_10] : memref<1x4x12x8xbf16, #tpu.memory_space<vmem>>, vector<1x4x12x8xbf16>
    %5 = vector.shape_cast %4 : vector<1x4x12x8xbf16> to vector<4x12x8xbf16>
    "tpu.trace_start"() <{level = 10 : i32, message = "hqd,hkd->hqk"}> : () -> ()
    %cst = arith.constant dense<0.000000e+00> : vector<4x8x12xf32>
    %6 = tpu.matmul %1, %3, %cst {dimension_numbers = #tpu.dot_dimension_numbers<[2], [2], [1], [1], [0, 0, 0, 1, 1, 1], [0], [0]>} : vector<4x8x8xbf16>, vector<4x12x8xbf16>, vector<4x8x12xf32> -> vector<4x8x12xf32>
    "tpu.trace_stop"() : () -> ()
    %cst_11 = arith.constant dense<0xFF800000> : vector<4x8xf32>
    %7 = vector.multi_reduction <maximumf>, %6, %cst_11 [2] : vector<4x8x12xf32> to vector<4x8xf32>
    %8 = vector.shape_cast %7 : vector<4x8xf32> to vector<4x8x1xf32>
    %9 = vector.broadcast %8 : vector<4x8x1xf32> to vector<4x8x12xf32>
    %10 = arith.subf %6, %9 : vector<4x8x12xf32>
    %11 = math.exp %10 : vector<4x8x12xf32>
    %cst_12 = arith.constant dense<0.000000e+00> : vector<4x8xf32>
    %12 = vector.multi_reduction <add>, %11, %cst_12 [2] : vector<4x8x12xf32> to vector<4x8xf32>
    %13 = vector.shape_cast %12 : vector<4x8xf32> to vector<4x8x1xf32>
    %14 = arith.truncf %11 : vector<4x8x12xf32> to vector<4x8x12xbf16>
    "tpu.trace_start"() <{level = 10 : i32, message = "hqk,hkd->hqd"}> : () -> ()
    %cst_13 = arith.constant dense<0.000000e+00> : vector<4x8x8xf32>
    %15 = tpu.matmul %14, %5, %cst_13 {dimension_numbers = #tpu.dot_dimension_numbers<[2], [1], [1], [2], [0, 0, 0, 1, 1, 2], [0], [0]>} : vector<4x8x12xbf16>, vector<4x12x8xbf16>, vector<4x8x8xf32> -> vector<4x8x8xf32>
    "tpu.trace_stop"() : () -> ()
    %16 = tpu.reciprocal %13 : vector<4x8x1xf32> -> vector<4x8x1xf32>
    %17 = vector.broadcast %16 : vector<4x8x1xf32> to vector<4x8x8xf32>
    %18 = arith.mulf %15, %17 : vector<4x8x8xf32>
    %19 = arith.truncf %18 : vector<4x8x8xf32> to vector<4x8x8xbf16>
    %c0_14 = arith.constant 0 : index
    %c0_15 = arith.constant 0 : index
    %c0_16 = arith.constant 0 : index
    %20 = vector.load %arg5[%c0_14, %c0_15, %c0_16] : memref<4x8x32xbf16, #tpu.memory_space<vmem>>, vector<4x8x32xbf16>
    "tpu.trace_start"() <{level = 10 : i32, message = "hqd,hde->hqe"}> : () -> ()
    %cst_17 = arith.constant dense<0.000000e+00> : vector<4x8x32xf32>
    %21 = tpu.matmul %19, %20, %cst_17 {dimension_numbers = #tpu.dot_dimension_numbers<[2], [1], [1], [2], [0, 0, 0, 1, 1, 2], [0], [0]>} : vector<4x8x8xbf16>, vector<4x8x32xbf16>, vector<4x8x32xf32> -> vector<4x8x32xf32>
    "tpu.trace_stop"() : () -> ()
    %cst_18 = arith.constant dense<0.000000e+00> : vector<8x32xf32>
    %22 = vector.multi_reduction <add>, %21, %cst_18 [0] : vector<4x8x32xf32> to vector<8x32xf32>
    %c0_19 = arith.constant 0 : index
    %c0_20 = arith.constant 0 : index
    %23 = vector.load %arg6[%c0_19, %c0_20] : memref<1x32xf32, #tpu.memory_space<vmem>>, vector<1x32xf32>
    %24 = vector.broadcast %23 : vector<1x32xf32> to vector<8x32xf32>
    %25 = arith.addf %22, %24 : vector<8x32xf32>
    %c0_21 = arith.constant 0 : index
    %c0_22 = arith.constant 0 : index
    %c0_23 = arith.constant 0 : index
    %26 = vector.load %arg7[%c0_21, %c0_22, %c0_23] : memref<1x8x32xf32, #tpu.memory_space<vmem>>, vector<1x8x32xf32>
    %27 = vector.shape_cast %26 : vector<1x8x32xf32> to vector<8x32xf32>
    %28 = arith.addf %27, %25 : vector<8x32xf32>
    %cst_24 = arith.constant dense<0.000000e+00> : vector<8xf32>
    %29 = vector.multi_reduction <add>, %28, %cst_24 [1] : vector<8x32xf32> to vector<8xf32>
    %30 = vector.shape_cast %29 : vector<8xf32> to vector<8x1xf32>
    %cst_25 = arith.constant 3.200000e+01 : f32
    %31 = vector.broadcast %cst_25 : f32 to vector<8x1xf32>
    %32 = arith.divf %30, %31 : vector<8x1xf32>
    %33 = vector.broadcast %32 : vector<8x1xf32> to vector<8x32xf32>
    %34 = arith.subf %28, %33 : vector<8x32xf32>
    %35 = arith.mulf %34, %34 : vector<8x32xf32>
    %cst_26 = arith.constant dense<0.000000e+00> : vector<8xf32>
    %36 = vector.multi_reduction <add>, %35, %cst_26 [1] : vector<8x32xf32> to vector<8xf32>
    %37 = vector.shape_cast %36 : vector<8xf32> to vector<8x1xf32>
    %cst_27 = arith.constant 3.200000e+01 : f32
    %38 = vector.broadcast %cst_27 : f32 to vector<8x1xf32>
    %39 = arith.divf %37, %38 : vector<8x1xf32>
    %40 = vector.broadcast %32 : vector<8x1xf32> to vector<8x32xf32>
    %41 = arith.subf %28, %40 : vector<8x32xf32>
    %cst_28 = arith.constant 9.99999974E-6 : f32
    %42 = vector.broadcast %cst_28 : f32 to vector<8x1xf32>
    %43 = arith.addf %39, %42 : vector<8x1xf32>
    %44 = math.rsqrt %43 : vector<8x1xf32>
    %45 = vector.broadcast %44 : vector<8x1xf32> to vector<8x32xf32>
    %46 = arith.mulf %41, %45 : vector<8x32xf32>
    %c0_29 = arith.constant 0 : index
    %c0_30 = arith.constant 0 : index
    %47 = vector.load %arg8[%c0_29, %c0_30] : memref<1x32xf32, #tpu.memory_space<vmem>>, vector<1x32xf32>
    %48 = vector.broadcast %47 : vector<1x32xf32> to vector<8x32xf32>
    %49 = arith.mulf %46, %48 : vector<8x32xf32>
    %c0_31 = arith.constant 0 : index
    %c0_32 = arith.constant 0 : index
    %50 = vector.load %arg9[%c0_31, %c0_32] : memref<1x32xf32, #tpu.memory_space<vmem>>, vector<1x32xf32>
    %51 = vector.broadcast %50 : vector<1x32xf32> to vector<8x32xf32>
    %52 = arith.addf %49, %51 : vector<8x32xf32>
    %c0_33 = arith.constant 0 : index
    %c0_34 = arith.constant 0 : index
    %c0_35 = arith.constant 0 : index
    %53 = vector.load %arg10[%c0_33, %c0_34, %c0_35] : memref<1x8x32xf32, #tpu.memory_space<vmem>>, vector<1x8x32xf32>
    %54 = vector.shape_cast %53 : vector<1x8x32xf32> to vector<8x32xf32>
    %55 = vector.shape_cast %52 : vector<8x32xf32> to vector<1x8x32xf32>
    tpu.vector_store %arg10[%c0_33, %c0_34, %c0_35], %55 {strides = array<i32>} : memref<1x8x32xf32, #tpu.memory_space<vmem>>, vector<1x8x32xf32>,
    return
  }
  func.func @transform_0(%arg0: i32, %arg1: i32) -> (i32, i32, i32, i32) {
    %c0_i32 = arith.constant 0 : i32
    %c0_i32_0 = arith.constant 0 : i32
    %c0_i32_1 = arith.constant 0 : i32
    return %arg0, %c0_i32, %arg1, %c0_i32_0 : i32, i32, i32, i32
  }
  func.func @transform_1(%arg0: i32, %arg1: i32) -> (i32, i32, i32, i32) {
    %c0_i32 = arith.constant 0 : i32
    %c0_i32_0 = arith.constant 0 : i32
    %c0_i32_1 = arith.constant 0 : i32
    %c0_i32_2 = arith.constant 0 : i32
    return %arg0, %c0_i32, %c0_i32_0, %c0_i32_1 : i32, i32, i32, i32
  }
  func.func @transform_2(%arg0: i32, %arg1: i32) -> (i32, i32, i32, i32) {
    %c0_i32 = arith.constant 0 : i32
    %c0_i32_0 = arith.constant 0 : i32
    %c0_i32_1 = arith.constant 0 : i32
    %c0_i32_2 = arith.constant 0 : i32
    return %arg0, %c0_i32, %c0_i32_0, %c0_i32_1 : i32, i32, i32, i32
  }
  func.func @transform_3(%arg0: i32, %arg1: i32) -> (i32, i32, i32) {
    %c0_i32 = arith.constant 0 : i32
    %c0_i32_0 = arith.constant 0 : i32
    %c0_i32_1 = arith.constant 0 : i32
    %c0_i32_2 = arith.constant 0 : i32
    return %c0_i32, %c0_i32_0, %c0_i32_1 : i32, i32, i32
  }
  func.func @transform_4(%arg0: i32, %arg1: i32) -> (i32, i32) {
    %c0_i32 = arith.constant 0 : i32
    %c0_i32_0 = arith.constant 0 : i32
    %c0_i32_1 = arith.constant 0 : i32
    return %c0_i32, %c0_i32_0 : i32, i32
  }
  func.func @transform_5(%arg0: i32, %arg1: i32) -> (i32, i32, i32) {
    %c0_i32 = arith.constant 0 : i32
    %c0_i32_0 = arith.constant 0 : i32
    return %arg0, %arg1, %c0_i32 : i32, i32, i32
  }
  func.func @transform_6(%arg0: i32, %arg1: i32) -> (i32, i32) {
    %c0_i32 = arith.constant 0 : i32
    %c0_i32_0 = arith.constant 0 : i32
    %c0_i32_1 = arith.constant 0 : i32
    return %c0_i32, %c0_i32_0 : i32, i32
  }
  func.func @transform_7(%arg0: i32, %arg1: i32) -> (i32, i32) {
    %c0_i32 = arith.constant 0 : i32
    %c0_i32_0 = arith.constant 0 : i32
    %c0_i32_1 = arith.constant 0 : i32
    return %c0_i32, %c0_i32_0 : i32, i32
  }
  func.func @transform_8(%arg0: i32, %arg1: i32) -> (i32, i32, i32) {
    %c0_i32 = arith.constant 0 : i32
    %c0_i32_0 = arith.constant 0 : i32
    return %arg0, %arg1, %c0_i32 : i32, i32, i32
  }
}

module attributes {stable_mosaic.version = 11 : i64} {
  func.func @_ffn_ln_kernel(%arg0: i32, %arg1: memref<16x32xf32, #tpu.memory_space<vmem>>, %arg2: memref<32x2048xbf16, #tpu.memory_space<vmem>>, %arg3: memref<1x2048xf32, #tpu.memory_space<vmem>>, %arg4: memref<2048x32xbf16, #tpu.memory_space<vmem>>, %arg5: memref<1x32xf32, #tpu.memory_space<vmem>>, %arg6: memref<1x32xf32, #tpu.memory_space<vmem>>, %arg7: memref<1x32xf32, #tpu.memory_space<vmem>>, %arg8: memref<16x32xf32, #tpu.memory_space<vmem>>) attributes {dimension_semantics = [#tpu.dimension_semantics<parallel>], iteration_bounds = array<i64: 1>, scalar_prefetch = 0 : i64, scratch_operands = 0 : i64, tpu.core_type = #tpu.core_type<tc>, window_params = [{transform_indices = @transform_0, window_bounds = array<i64: 16, 32>}, {pipeline_mode = #tpu.pipeline_mode<synchronous>, transform_indices = @transform_1, window_bounds = array<i64: 32, 2048>}, {pipeline_mode = #tpu.pipeline_mode<synchronous>, transform_indices = @transform_2, window_bounds = array<i64: 1, 2048>}, {pipeline_mode = #tpu.pipeline_mode<synchronous>, transform_indices = @transform_3, window_bounds = array<i64: 2048, 32>}, {pipeline_mode = #tpu.pipeline_mode<synchronous>, transform_indices = @transform_4, window_bounds = array<i64: 1, 32>}, {pipeline_mode = #tpu.pipeline_mode<synchronous>, transform_indices = @transform_5, window_bounds = array<i64: 1, 32>}, {pipeline_mode = #tpu.pipeline_mode<synchronous>, transform_indices = @transform_6, window_bounds = array<i64: 1, 32>}, {transform_indices = @transform_7, window_bounds = array<i64: 16, 32>}]} {
    %c0 = arith.constant 0 : index
    %c0_0 = arith.constant 0 : index
    %0 = vector.load %arg1[%c0, %c0_0] : memref<16x32xf32, #tpu.memory_space<vmem>>, vector<16x32xf32>
    %1 = arith.truncf %0 : vector<16x32xf32> to vector<16x32xbf16>
    %c0_1 = arith.constant 0 : index
    %c0_2 = arith.constant 0 : index
    %2 = vector.load %arg2[%c0_1, %c0_2] : memref<32x2048xbf16, #tpu.memory_space<vmem>>, vector<32x2048xbf16>
    %cst = arith.constant dense<0.000000e+00> : vector<16x2048xf32>
    %3 = tpu.matmul %1, %2, %cst {dimension_numbers = #tpu.dot_dimension_numbers<[1], [0], [0], [1], [0, 0, 1, 1], [], []>} : vector<16x32xbf16>, vector<32x2048xbf16>, vector<16x2048xf32> -> vector<16x2048xf32>
    %c0_3 = arith.constant 0 : index
    %c0_4 = arith.constant 0 : index
    %4 = vector.load %arg3[%c0_3, %c0_4] : memref<1x2048xf32, #tpu.memory_space<vmem>>, vector<1x2048xf32>
    %5 = vector.broadcast %4 : vector<1x2048xf32> to vector<16x2048xf32>
    %6 = arith.addf %3, %5 : vector<16x2048xf32>
    %cst_5 = arith.constant 0.000000e+00 : f32
    %7 = vector.broadcast %cst_5 : f32 to vector<16x2048xf32>
    %8 = arith.maximumf %6, %7 : vector<16x2048xf32>
    %9 = arith.truncf %8 : vector<16x2048xf32> to vector<16x2048xbf16>
    %c0_6 = arith.constant 0 : index
    %c0_7 = arith.constant 0 : index
    %10 = vector.load %arg4[%c0_6, %c0_7] : memref<2048x32xbf16, #tpu.memory_space<vmem>>, vector<2048x32xbf16>
    %cst_8 = arith.constant dense<0.000000e+00> : vector<16x32xf32>
    %11 = tpu.matmul %9, %10, %cst_8 {dimension_numbers = #tpu.dot_dimension_numbers<[1], [0], [0], [1], [0, 0, 1, 1], [], []>} : vector<16x2048xbf16>, vector<2048x32xbf16>, vector<16x32xf32> -> vector<16x32xf32>
    %c0_9 = arith.constant 0 : index
    %c0_10 = arith.constant 0 : index
    %12 = vector.load %arg5[%c0_9, %c0_10] : memref<1x32xf32, #tpu.memory_space<vmem>>, vector<1x32xf32>
    %13 = vector.broadcast %12 : vector<1x32xf32> to vector<16x32xf32>
    %14 = arith.addf %11, %13 : vector<16x32xf32>
    %15 = arith.addf %0, %14 : vector<16x32xf32>
    %cst_11 = arith.constant dense<0.000000e+00> : vector<16xf32>
    %16 = vector.multi_reduction <add>, %15, %cst_11 [1] : vector<16x32xf32> to vector<16xf32>
    %17 = vector.shape_cast %16 : vector<16xf32> to vector<16x1xf32>
    %cst_12 = arith.constant 3.200000e+01 : f32
    %18 = vector.broadcast %cst_12 : f32 to vector<16x1xf32>
    %19 = arith.divf %17, %18 : vector<16x1xf32>
    %20 = vector.broadcast %19 : vector<16x1xf32> to vector<16x32xf32>
    %21 = arith.subf %15, %20 : vector<16x32xf32>
    %22 = arith.mulf %21, %21 : vector<16x32xf32>
    %cst_13 = arith.constant dense<0.000000e+00> : vector<16xf32>
    %23 = vector.multi_reduction <add>, %22, %cst_13 [1] : vector<16x32xf32> to vector<16xf32>
    %24 = vector.shape_cast %23 : vector<16xf32> to vector<16x1xf32>
    %cst_14 = arith.constant 3.200000e+01 : f32
    %25 = vector.broadcast %cst_14 : f32 to vector<16x1xf32>
    %26 = arith.divf %24, %25 : vector<16x1xf32>
    %27 = vector.broadcast %19 : vector<16x1xf32> to vector<16x32xf32>
    %28 = arith.subf %15, %27 : vector<16x32xf32>
    %cst_15 = arith.constant 9.99999974E-6 : f32
    %29 = vector.broadcast %cst_15 : f32 to vector<16x1xf32>
    %30 = arith.addf %26, %29 : vector<16x1xf32>
    %31 = math.rsqrt %30 : vector<16x1xf32>
    %32 = vector.broadcast %31 : vector<16x1xf32> to vector<16x32xf32>
    %33 = arith.mulf %28, %32 : vector<16x32xf32>
    %c0_16 = arith.constant 0 : index
    %c0_17 = arith.constant 0 : index
    %34 = vector.load %arg6[%c0_16, %c0_17] : memref<1x32xf32, #tpu.memory_space<vmem>>, vector<1x32xf32>
    %35 = vector.broadcast %34 : vector<1x32xf32> to vector<16x32xf32>
    %36 = arith.mulf %33, %35 : vector<16x32xf32>
    %c0_18 = arith.constant 0 : index
    %c0_19 = arith.constant 0 : index
    %37 = vector.load %arg7[%c0_18, %c0_19] : memref<1x32xf32, #tpu.memory_space<vmem>>, vector<1x32xf32>
    %38 = vector.broadcast %37 : vector<1x32xf32> to vector<16x32xf32>
    %39 = arith.addf %36, %38 : vector<16x32xf32>
    %c0_20 = arith.constant 0 : index
    %c0_21 = arith.constant 0 : index
    %40 = vector.load %arg8[%c0_20, %c0_21] : memref<16x32xf32, #tpu.memory_space<vmem>>, vector<16x32xf32>
    tpu.vector_store %arg8[%c0_20, %c0_21], %39 {strides = array<i32>} : memref<16x32xf32, #tpu.memory_space<vmem>>, vector<16x32xf32>,
    return
  }
  func.func @transform_0(%arg0: i32) -> (i32, i32) {
    %c0_i32 = arith.constant 0 : i32
    %c0_i32_0 = arith.constant 0 : i32
    return %arg0, %c0_i32 : i32, i32
  }
  func.func @transform_1(%arg0: i32) -> (i32, i32) {
    %c0_i32 = arith.constant 0 : i32
    %c0_i32_0 = arith.constant 0 : i32
    %c0_i32_1 = arith.constant 0 : i32
    return %c0_i32, %c0_i32_0 : i32, i32
  }
  func.func @transform_2(%arg0: i32) -> (i32, i32) {
    %c0_i32 = arith.constant 0 : i32
    %c0_i32_0 = arith.constant 0 : i32
    %c0_i32_1 = arith.constant 0 : i32
    return %c0_i32, %c0_i32_0 : i32, i32
  }
  func.func @transform_3(%arg0: i32) -> (i32, i32) {
    %c0_i32 = arith.constant 0 : i32
    %c0_i32_0 = arith.constant 0 : i32
    %c0_i32_1 = arith.constant 0 : i32
    return %c0_i32, %c0_i32_0 : i32, i32
  }
  func.func @transform_4(%arg0: i32) -> (i32, i32) {
    %c0_i32 = arith.constant 0 : i32
    %c0_i32_0 = arith.constant 0 : i32
    %c0_i32_1 = arith.constant 0 : i32
    return %c0_i32, %c0_i32_0 : i32, i32
  }
  func.func @transform_5(%arg0: i32) -> (i32, i32) {
    %c0_i32 = arith.constant 0 : i32
    %c0_i32_0 = arith.constant 0 : i32
    %c0_i32_1 = arith.constant 0 : i32
    return %c0_i32, %c0_i32_0 : i32, i32
  }
  func.func @transform_6(%arg0: i32) -> (i32, i32) {
    %c0_i32 = arith.constant 0 : i32
    %c0_i32_0 = arith.constant 0 : i32
    %c0_i32_1 = arith.constant 0 : i32
    return %c0_i32, %c0_i32_0 : i32, i32
  }
  func.func @transform_7(%arg0: i32) -> (i32, i32) {
    %c0_i32 = arith.constant 0 : i32
    %c0_i32_0 = arith.constant 0 : i32
    return %arg0, %c0_i32 : i32, i32
  }
}

module attributes {stable_mosaic.version = 11 : i64} {
  func.func @_ln_kernel(%arg0: i32, %arg1: memref<16x32xf32, #tpu.memory_space<vmem>>, %arg2: memref<1x32xf32, #tpu.memory_space<vmem>>, %arg3: memref<1x32xf32, #tpu.memory_space<vmem>>, %arg4: memref<16x32xf32, #tpu.memory_space<vmem>>) attributes {dimension_semantics = [#tpu.dimension_semantics<parallel>], iteration_bounds = array<i64: 1>, scalar_prefetch = 0 : i64, scratch_operands = 0 : i64, tpu.core_type = #tpu.core_type<tc>, window_params = [{transform_indices = @transform_0, window_bounds = array<i64: 16, 32>}, {pipeline_mode = #tpu.pipeline_mode<synchronous>, transform_indices = @transform_1, window_bounds = array<i64: 1, 32>}, {pipeline_mode = #tpu.pipeline_mode<synchronous>, transform_indices = @transform_2, window_bounds = array<i64: 1, 32>}, {transform_indices = @transform_3, window_bounds = array<i64: 16, 32>}]} {
    %c0 = arith.constant 0 : index
    %c0_0 = arith.constant 0 : index
    %0 = vector.load %arg1[%c0, %c0_0] : memref<16x32xf32, #tpu.memory_space<vmem>>, vector<16x32xf32>
    %cst = arith.constant dense<0.000000e+00> : vector<16xf32>
    %1 = vector.multi_reduction <add>, %0, %cst [1] : vector<16x32xf32> to vector<16xf32>
    %2 = vector.shape_cast %1 : vector<16xf32> to vector<16x1xf32>
    %cst_1 = arith.constant 3.200000e+01 : f32
    %3 = vector.broadcast %cst_1 : f32 to vector<16x1xf32>
    %4 = arith.divf %2, %3 : vector<16x1xf32>
    %5 = vector.broadcast %4 : vector<16x1xf32> to vector<16x32xf32>
    %6 = arith.subf %0, %5 : vector<16x32xf32>
    %7 = arith.mulf %6, %6 : vector<16x32xf32>
    %cst_2 = arith.constant dense<0.000000e+00> : vector<16xf32>
    %8 = vector.multi_reduction <add>, %7, %cst_2 [1] : vector<16x32xf32> to vector<16xf32>
    %9 = vector.shape_cast %8 : vector<16xf32> to vector<16x1xf32>
    %cst_3 = arith.constant 3.200000e+01 : f32
    %10 = vector.broadcast %cst_3 : f32 to vector<16x1xf32>
    %11 = arith.divf %9, %10 : vector<16x1xf32>
    %12 = vector.broadcast %4 : vector<16x1xf32> to vector<16x32xf32>
    %13 = arith.subf %0, %12 : vector<16x32xf32>
    %cst_4 = arith.constant 9.99999974E-6 : f32
    %14 = vector.broadcast %cst_4 : f32 to vector<16x1xf32>
    %15 = arith.addf %11, %14 : vector<16x1xf32>
    %16 = math.rsqrt %15 : vector<16x1xf32>
    %17 = vector.broadcast %16 : vector<16x1xf32> to vector<16x32xf32>
    %18 = arith.mulf %13, %17 : vector<16x32xf32>
    %c0_5 = arith.constant 0 : index
    %c0_6 = arith.constant 0 : index
    %19 = vector.load %arg2[%c0_5, %c0_6] : memref<1x32xf32, #tpu.memory_space<vmem>>, vector<1x32xf32>
    %20 = vector.broadcast %19 : vector<1x32xf32> to vector<16x32xf32>
    %21 = arith.mulf %18, %20 : vector<16x32xf32>
    %c0_7 = arith.constant 0 : index
    %c0_8 = arith.constant 0 : index
    %22 = vector.load %arg3[%c0_7, %c0_8] : memref<1x32xf32, #tpu.memory_space<vmem>>, vector<1x32xf32>
    %23 = vector.broadcast %22 : vector<1x32xf32> to vector<16x32xf32>
    %24 = arith.addf %21, %23 : vector<16x32xf32>
    %c0_9 = arith.constant 0 : index
    %c0_10 = arith.constant 0 : index
    %25 = vector.load %arg4[%c0_9, %c0_10] : memref<16x32xf32, #tpu.memory_space<vmem>>, vector<16x32xf32>
    tpu.vector_store %arg4[%c0_9, %c0_10], %24 {strides = array<i32>} : memref<16x32xf32, #tpu.memory_space<vmem>>, vector<16x32xf32>,
    return
  }
  func.func @transform_0(%arg0: i32) -> (i32, i32) {
    %c0_i32 = arith.constant 0 : i32
    %c0_i32_0 = arith.constant 0 : i32
    return %arg0, %c0_i32 : i32, i32
  }
  func.func @transform_1(%arg0: i32) -> (i32, i32) {
    %c0_i32 = arith.constant 0 : i32
    %c0_i32_0 = arith.constant 0 : i32
    %c0_i32_1 = arith.constant 0 : i32
    return %c0_i32, %c0_i32_0 : i32, i32
  }
  func.func @transform_2(%arg0: i32) -> (i32, i32) {
    %c0_i32 = arith.constant 0 : i32
    %c0_i32_0 = arith.constant 0 : i32
    %c0_i32_1 = arith.constant 0 : i32
    return %c0_i32, %c0_i32_0 : i32, i32
  }
  func.func @transform_3(%arg0: i32) -> (i32, i32) {
    %c0_i32 = arith.constant 0 : i32
    %c0_i32_0 = arith.constant 0 : i32
    return %arg0, %c0_i32 : i32, i32
  }
}

module attributes {stable_mosaic.version = 11 : i64} {
  func.func @_matmul_kernel(%arg0: i32, %arg1: i32, %arg2: i32, %arg3: memref<16x32xf32, #tpu.memory_space<vmem>>, %arg4: memref<32x16xbf16, #tpu.memory_space<vmem>>, %arg5: memref<1x16xf32, #tpu.memory_space<vmem>>, %arg6: memref<16x16xf32, #tpu.memory_space<vmem>>, %arg7: memref<16x16xf32, #tpu.memory_space<vmem>>) attributes {dimension_semantics = [#tpu.dimension_semantics<parallel>, #tpu.dimension_semantics<parallel>, #tpu.dimension_semantics<arbitrary>], iteration_bounds = array<i64: 1, 1, 1>, scalar_prefetch = 0 : i64, scratch_operands = 1 : i64, tpu.core_type = #tpu.core_type<tc>, window_params = [{transform_indices = @transform_0, window_bounds = array<i64: 16, 32>}, {transform_indices = @transform_1, window_bounds = array<i64: 32, 16>}, {transform_indices = @transform_2, window_bounds = array<i64: 1, 16>}, {transform_indices = @transform_3, window_bounds = array<i64: 16, 16>}]} {
    %c0_i32 = arith.constant 0 : i32
    %0 = arith.cmpi eq, %arg2, %c0_i32 : i32
    %1 = arith.extui %0 : i1 to i32
    %c0_i32_0 = arith.constant 0 : i32
    %2 = arith.cmpi ne, %1, %c0_i32_0 : i32
    scf.if %2 {
      %cst_10 = arith.constant 0.000000e+00 : f32
      %13 = vector.broadcast %cst_10 : f32 to vector<16x16xf32>
      %c0_11 = arith.constant 0 : index
      %c0_12 = arith.constant 0 : index
      %14 = vector.load %arg7[%c0_11, %c0_12] : memref<16x16xf32, #tpu.memory_space<vmem>>, vector<16x16xf32>
      tpu.vector_store %arg7[%c0_11, %c0_12], %13 {strides = array<i32>} : memref<16x16xf32, #tpu.memory_space<vmem>>, vector<16x16xf32>,
    } else {
    }
    %c0 = arith.constant 0 : index
    %c0_1 = arith.constant 0 : index
    %3 = vector.load %arg7[%c0, %c0_1] : memref<16x16xf32, #tpu.memory_space<vmem>>, vector<16x16xf32>
    %c0_2 = arith.constant 0 : index
    %c0_3 = arith.constant 0 : index
    %4 = vector.load %arg3[%c0_2, %c0_3] : memref<16x32xf32, #tpu.memory_space<vmem>>, vector<16x32xf32>
    %5 = arith.truncf %4 : vector<16x32xf32> to vector<16x32xbf16>
    %c0_4 = arith.constant 0 : index
    %c0_5 = arith.constant 0 : index
    %6 = vector.load %arg4[%c0_4, %c0_5] : memref<32x16xbf16, #tpu.memory_space<vmem>>, vector<32x16xbf16>
    %cst = arith.constant dense<0.000000e+00> : vector<16x16xf32>
    %7 = tpu.matmul %5, %6, %cst {dimension_numbers = #tpu.dot_dimension_numbers<[1], [0], [0], [1], [0, 0, 1, 1], [], []>} : vector<16x32xbf16>, vector<32x16xbf16>, vector<16x16xf32> -> vector<16x16xf32>
    %8 = arith.addf %3, %7 : vector<16x16xf32>
    %c0_6 = arith.constant 0 : index
    %c0_7 = arith.constant 0 : index
    %9 = vector.load %arg7[%c0_6, %c0_7] : memref<16x16xf32, #tpu.memory_space<vmem>>, vector<16x16xf32>
    tpu.vector_store %arg7[%c0_6, %c0_7], %8 {strides = array<i32>} : memref<16x16xf32, #tpu.memory_space<vmem>>, vector<16x16xf32>,
    %c0_i32_8 = arith.constant 0 : i32
    %10 = arith.cmpi eq, %arg2, %c0_i32_8 : i32
    %11 = arith.extui %10 : i1 to i32
    %c0_i32_9 = arith.constant 0 : i32
    %12 = arith.cmpi ne, %11, %c0_i32_9 : i32
    scf.if %12 {
      %c0_10 = arith.constant 0 : index
      %c0_11 = arith.constant 0 : index
      %13 = vector.load %arg7[%c0_10, %c0_11] : memref<16x16xf32, #tpu.memory_space<vmem>>, vector<16x16xf32>
      %c0_12 = arith.constant 0 : index
      %c0_13 = arith.constant 0 : index
      %14 = vector.load %arg5[%c0_12, %c0_13] : memref<1x16xf32, #tpu.memory_space<vmem>>, vector<1x16xf32>
      %15 = vector.broadcast %14 : vector<1x16xf32> to vector<16x16xf32>
      %16 = arith.addf %13, %15 : vector<16x16xf32>
      %c0_14 = arith.constant 0 : index
      %c0_15 = arith.constant 0 : index
      %17 = vector.load %arg6[%c0_14, %c0_15] : memref<16x16xf32, #tpu.memory_space<vmem>>, vector<16x16xf32>
      tpu.vector_store %arg6[%c0_14, %c0_15], %16 {strides = array<i32>} : memref<16x16xf32, #tpu.memory_space<vmem>>, vector<16x16xf32>,
    } else {
    }
    return
  }
  func.func @transform_0(%arg0: i32, %arg1: i32, %arg2: i32) -> (i32, i32) {
    %c0_i32 = arith.constant 0 : i32
    return %arg0, %arg2 : i32, i32
  }
  func.func @transform_1(%arg0: i32, %arg1: i32, %arg2: i32) -> (i32, i32) {
    %c0_i32 = arith.constant 0 : i32
    return %arg2, %arg1 : i32, i32
  }
  func.func @transform_2(%arg0: i32, %arg1: i32, %arg2: i32) -> (i32, i32) {
    %c0_i32 = arith.constant 0 : i32
    %c0_i32_0 = arith.constant 0 : i32
    return %c0_i32, %arg1 : i32, i32
  }
  func.func @transform_3(%arg0: i32, %arg1: i32, %arg2: i32) -> (i32, i32) {
    %c0_i32 = arith.constant 0 : i32
    return %arg0, %arg1 : i32, i32
  }
}

</mosaic_0001>

<bundles_post_ra>
// kernel: transformer_forward.21
= control target key start
LH: loop header
LB: loop body
LE: loop exit
PB: predicated region body
PF: predicated region fallthrough
CT: control target
= control target key end

     0   :  { %vm19_vm0 = vcmask 785408   ;;  %v172_v1 = vmov 0.0   ;;  %vm47_vm1 = vcmask 261120   ;;  %vm138_vm2 = vcmask 781312   ;;  %s226_s1 = inlined_call_operand.vmem [shape: bf16[32,96], index: 1, kind: input, shape index: {}]   ;;  %s227_s0 = inlined_call_operand.vmem [shape: f32[24,32], index: 0, kind: input, shape index: {}]   ;;  %s228_s2 = inlined_call_operand.vmem [shape: f32[1,96], index: 2, kind: input, shape index: {}]   ;;  %s229_s3 = inlined_call_operand.vmem [shape: bf16[24,96], index: 3, kind: output, shape index: {}]  }
   0x1   :  { %v170_v0 = vld [vmem:[%s226_s1 + $0x8] sm:$0xff]   ;;  %22 = vst.msk [vmem:[#allocation2 + $0x10] sm:$0xff] %vm19_vm0, %v172_v1  ;;  %20 = vst.msk [vmem:[#allocation2] sm:$0xff] %vm19_vm0, %v172_v1  ;;  %v171_v2 = vld [vmem:[%s226_s1] sm:$0xff]  }
   0x2   :  { %21 = vst.msk [vmem:[#allocation2 + $0x8] sm:$0xff] %vm19_vm0, %v172_v1  ;;  %161 = vmatprep.subr.bf16.mxu0 %v170_v0  ;;  %v26_v3 = vld [vmem:[%s227_s0] sm:$0xff]  ;;  %v27_v4 = vld [vmem:[%s227_s0 + $0x8] sm:$0xff]  ;;  %v28_v5 = vld [vmem:[%s227_s0 + $0x10] sm:$0xff] }
   0x3   :  { %162 = vmatpush3.bf16.msra.mxu0 %v170_v0  ;;  %v29_v6 = vpack.c.bf16 %v27_v4, %v26_v3  ;;  %v30_v7 = vpack.c.bf16 %v28_v5, %v28_v5  ;;  %v150_v18 = vld [vmem:[%s228_s2] ss:$0 sm:$0xff] }
   0x4   :  { %163 = vmatprep.subr.bf16.mxu0 %v171_v2 }
   0x5   :  { %165 = vmatprep.mubr.msk.bf16.mxu0 %vm47_vm1, %v29_v6 }
   0x7   :  { %164 = vmatpush3.bf16.msra.mxu0 %v171_v2 }
   0x8   :  { %v25_v8 = vld [vmem:[#allocation2 + $0x10] sm:$0xff]  ;;  %v23_v10 = vld [vmem:[#allocation2] sm:$0xff] }
   0x9   :  { %v24_v15 = vld [vmem:[#allocation2 + $0x8] sm:$0xff] }
   0xa   :  { %166 = vmatmul.mubr.msk.bf16.vlgmr.msra.gmra.mxu0 %vm47_vm1, %v30_v7 }
  0xca   :  { %v167_v9 = vpop.f32.mrf.mxu0 }
  0xcb   :  { %v104_v11 = vadd.f32 %v167_v9, %v25_v8 }
  0xcc   :  { %v88_v12 = vpop.f32.mrf.mxu0 }
  0xcd   :  { %108 = vst.msk [vmem:[#allocation2 + $0x10] sm:$0xff] %vm19_vm0, %v104_v11  ;;  %v102_v13 = vadd.f32 %v88_v12, %v23_v10 }
  0xce   :  { %v168_v14 = vpop.f32.mrf.mxu0 }
  0xcf   :  { %106 = vst.msk [vmem:[#allocation2] sm:$0xff] %vm19_vm0, %v102_v13 }
  0xd0   :  { %v91_v16 = vpop.f32.mrf.mxu0 }
  0xd1   :  { %v103_v17 = vadd.f32 %v91_v16, %v24_v15 }
  0xd3   :  { %107 = vst.msk [vmem:[#allocation2 + $0x8] sm:$0xff] %vm19_vm0, %v103_v17 }
  0xd4   :  { %v114_v19 = vld [vmem:[#allocation2 + $0x10] sm:$0xff] }
  0xd5   :  { %v124_v20 = vadd.f32 %v150_v18, %v114_v19 }
  0xd6   :  { %v112_v21 = vld [vmem:[#allocation2] sm:$0xff] }
  0xd7   :  { %v156_v22 = vpack.c.bf16 %v124_v20, %v124_v20  ;;  %v122_v23 = vadd.f32 %v150_v18, %v112_v21 }
  0xd9   :  { %141 = vst.msk [vmem:[%s229_s3 + $0x8] sm:$0xf] %vm138_vm2, %v156_v22  ;;  %v154_v24 = vpack.c.bf16 %v122_v23, %v122_v23 }
  0xda   :  { %v113_v25 = vld [vmem:[#allocation2 + $0x8] sm:$0xff] }
  0xdb   :  { %139 = vst.msk [vmem:[%s229_s3] sm:$0xf] %vm138_vm2, %v154_v24  ;;  %v123_v26 = vadd.f32 %v150_v18, %v113_v25 }
  0xdd   :  { %v155_v27 = vpack.c.bf16 %v123_v26, %v123_v26 }
  0xdf   :  { %140 = vst.msk [vmem:[%s229_s3 + $0x4] sm:$0xf] %vm138_vm2, %v155_v27 }

// kernel: transformer_forward.22
= control target key start
LH: loop header
LB: loop body
LE: loop exit
PB: predicated region body
PF: predicated region fallthrough
CT: control target
= control target key end

     0   :  { %s1670_s27 = smov 0   ;;  %s1672_s28 = smov 0   ;;  %s1832_s0 = inlined_call_operand.vmem [shape: bf16[2,4,12,8], index: 0, kind: input, shape index: {}]   ;;  %s1833_s1 = inlined_call_operand.vmem [shape: bf16[2,4,12,8], index: 1, kind: input, shape index: {}]   ;;  %s1834_s2 = inlined_call_operand.vmem [shape: bf16[2,4,12,8], index: 2, kind: input, shape index: {}]   ;;  %s1835_s3 = inlined_call_operand.vmem [shape: bf16[4,8,32], index: 3, kind: input, shape index: {}]   ;;  %s1836_s4 = inlined_call_operand.vmem [shape: f32[1,32], index: 4, kind: input, shape index: {}]   ;;  %s1837_s5 = inlined_call_operand.vmem [shape: f32[2,12,32], index: 5, kind: input, shape index: {}]   ;;  %s1838_s6 = inlined_call_operand.vmem [shape: f32[1,32], index: 6, kind: input, shape index: {}]   ;;  %s1839_s7 = inlined_call_operand.vmem [shape: f32[1,32], index: 7, kind: input, shape index: {}]   ;;  %s1840_s8 = inlined_call_operand.vmem [shape: f32[2,12,32], index: 8, kind: output, shape index: {}]  }
   0x1   :  { %s1674_s29 = smov 0  }
   0x2 LB: > { %s30_s30 = sadd.s32 1, %s1617_s28  ;;  %p1384_p0 = scmp.ge.s32.totalorder %s1621_s29, 1  ;;  %s1621_s29 = sphi %s1674_s29, %s18_s29   ;;  %s1617_s28 = sphi %s1672_s28, %s1842_s28   ;;  %s1613_s27 = sphi %s1670_s27, %s1841_s27  }
   0x3   : > { %p32_p1 = scmp.ge.s32.totalorder %s30_s30, 2  ;;  %p320_p2 = scmp.lt.s32.totalorder %s1621_s29, 3 }
   0x5   : > { %s1844_s30 = smov (%p32_p1, %s30_s30), 0  ;;  %p321_p3 = pnand %p1384_p0, %p320_p2 }
   0x6   : > { %p382_p4 = scmp.lt.s32.totalorder (!%p321_p3), %s1613_s27, 1 }
   0x7   : > { %324 = sbr.rel (%p321_p3) target bundleno = 1106 (0x452), region = 52 }
   0xc   : > { %v1623_v0 = vmov 0.0   ;;  %s1846_s27 = smov (!%p382_p4, %s1613_s27), 1  ;;  %vm1624_vm0 = vmmov 0   ;;  %vm456_vm1 = vcmask 64512   ;;  %vm675_vm2 = vcmask 97280  }
   0xd   : > { %1453 = vmatprep.subr.bf16.mxu0 %v1623_v0  ;;  %1459 = vmatprep.subr.bf16.mxu1 %v1623_v0  ;;  %s1697_s9 = sshll.u32 %s1846_s27, 5  ;;  %vm679_vm3 = vcmask 93184   ;;  %vm761_vm4 = vcmask 1045504   ;;  %vm989_vm5 = vcmask 1043456   ;;  %vm1175_vm6 = vcmask 261120  }
   0xe   : > { %1455 = vmatprep.mubr.msk.bf16.mxu0 %vm1624_vm0, %v1623_v0  ;;  %1461 = vmatprep.mubr.msk.bf16.mxu1 %vm1624_vm0, %v1623_v0  ;;  %s395_s12 = scalar_lea.vmem %s1833_s1, %s1697_s9  ;;  %s389_s15 = scalar_lea.vmem %s1832_s0, %s1697_s9  ;;  %vm1183_vm7 = vcmask 257024  }
   0xf   : > { %v1551_v1 = vld [vmem:[%s395_s12] sm:$0x3f]   ;;  %v1552_v2 = vld [vmem:[%s395_s12 + $0x8] sm:$0x3f]   ;;  %v1555_v6 = vld [vmem:[%s395_s12 + $0x10] sm:$0x3f]   ;;  %s400_s18 = scalar_lea.vmem %s1834_s2, %s1697_s9 }
  0x10   : > { %v461_v3 = vsel %vm456_vm1, %v1551_v1, 0  ;;  %v518_v4 = vsel %vm456_vm1, %v1552_v2, 0  ;;  %v1553_v5 = vld [vmem:[%s389_s15] sm:$0x3f]   ;;  %v1556_v7 = vld [vmem:[%s395_s12 + $0x18] sm:$0x3f]  }
  0x11   : > { %1454 = vmatpush3.bf16.xpose.msra.mxu0 %v461_v3  ;;  %1460 = vmatpush3.bf16.xpose.msra.mxu1 %v518_v4  ;;  %v1554_v8 = vld [vmem:[%s389_s15 + $0x8] sm:$0x3f]   ;;  %v575_v9 = vsel %vm456_vm1, %v1555_v6, 0  ;;  %v632_v10 = vsel %vm456_vm1, %v1556_v7, 0  ;;  %v1557_v11 = vld [vmem:[%s389_s15 + $0x10] sm:$0x3f]  }
  0x12   : > { %1465 = vmatprep.subr.bf16.mxu0 %v1623_v0  ;;  %1471 = vmatprep.subr.bf16.mxu1 %v1623_v0  ;;  %v1558_v12 = vld [vmem:[%s389_s15 + $0x18] sm:$0x3f]   ;;  %v1559_v37 = vld [vmem:[%s400_s18] sm:$0x3f]   ;;  %v1560_v39 = vld [vmem:[%s400_s18 + $0x8] sm:$0x3f]  }
  0x13   : > { %v763_v38 = vsel %vm761_vm4, %v1559_v37, 0  ;;  %v815_v40 = vsel %vm761_vm4, %v1560_v39, 0  ;;  %v1561_v41 = vld [vmem:[%s400_s18 + $0x10] sm:$0x3f]   ;;  %v1562_v43 = vld [vmem:[%s400_s18 + $0x18] sm:$0x3f]  }
  0x14   : > { %v867_v42 = vsel %vm761_vm4, %v1561_v41, 0  ;;  %v919_v44 = vsel %vm761_vm4, %v1562_v43, 0  ;;  %s1427_s9 = sshll.u32 %s1846_s27, 4 }
  0x15   : > { %s409_s12 = scalar_lea.vmem %s1837_s5, %s1427_s9  ;;  %s419_s21 = scalar_lea.vmem %s1840_s8, %s1427_s9 }
  0x18   : > { %1456 = vmatmul.mubr.msk.bf16.vlgmr.msra.gmra.mxu0 %vm456_vm1, %v1553_v5  ;;  %1462 = vmatmul.mubr.msk.bf16.vlgmr.msra.gmra.mxu1 %vm456_vm1, %v1554_v8 }
  0x19   : > { %1466 = vmatpush3.bf16.xpose.msra.mxu0 %v575_v9  ;;  %1472 = vmatpush3.bf16.xpose.msra.mxu1 %v632_v10 }
  0x1a   : > { %1467 = vmatprep.mubr.msk.bf16.mxu0 %vm1624_vm0, %v1623_v0  ;;  %1473 = vmatprep.mubr.msk.bf16.mxu1 %vm1624_vm0, %v1623_v0 }
  0x1b   : > { %1477 = vmatprep.subr.bf16.mxu0 %v1623_v0  ;;  %1483 = vmatprep.subr.bf16.mxu1 %v1623_v0 }
  0x20   : > { %1468 = vmatmul.mubr.msk.bf16.vlgmr.msra.gmra.mxu0 %vm456_vm1, %v1557_v11  ;;  %1474 = vmatmul.mubr.msk.bf16.vlgmr.msra.gmra.mxu1 %vm456_vm1, %v1558_v12 }
  0x21   : > { %1479 = vmatprep.mubr.msk.bf16.mxu0 %vm1624_vm0, %v1623_v0  ;;  %1485 = vmatprep.mubr.msk.bf16.mxu1 %vm1624_vm0, %v1623_v0 }
  0x22   : > { %1478 = vmatpush3.bf16.msra.mxu0 %v763_v38  ;;  %1484 = vmatpush3.bf16.msra.mxu1 %v815_v40 }
  0x23   : > { %1489 = vmatprep.subr.bf16.mxu0 %v1623_v0  ;;  %1495 = vmatprep.subr.bf16.mxu1 %v1623_v0 }
  0xd8   : > { %v497_v13 = vpop.f32.mrf.mxu0  ;;  %v554_v14 = vpop.f32.mrf.mxu1 }
  0xd9   : > { %v676_v15 = vsel %vm675_vm2, %v497_v13, -inf  ;;  %v683_v16 = vsel %vm675_vm2, %v554_v14, -inf }
  0xda   : > { %677 = vmax.xlane.f32.xlu0 %v676_v15  ;;  %v1457_v17 = vpop.f32.mrf.mxu0  ;;  %684 = vmax.xlane.f32.xlu1 %v683_v16  ;;  %v1463_v18 = vpop.f32.mrf.mxu1 }
  0xdc   : > { %v500_v19 = vpop.f32.mrf.mxu0  ;;  %v557_v20 = vpop.f32.mrf.mxu1 }
  0xdd   : > { %v680_v21 = vsel %vm679_vm3, %v500_v19, -inf  ;;  %v686_v22 = vsel %vm679_vm3, %v557_v20, -inf }
  0xde   : > { %681 = vmax.xlane.f32.xlu0 %v680_v21  ;;  %v1458_v23 = vpop.f32.mrf.mxu0  ;;  %687 = vmax.xlane.f32.xlu1 %v686_v22  ;;  %v1464_v24 = vpop.f32.mrf.mxu1 }
  0xe0   : > { %v611_v25 = vpop.f32.mrf.mxu0  ;;  %v668_v26 = vpop.f32.mrf.mxu1 }
  0xe1   : > { %v689_v27 = vsel %vm675_vm2, %v611_v25, -inf  ;;  %v695_v30 = vsel %vm675_vm2, %v668_v26, -inf }
  0xe2   : > { %690 = vmax.xlane.f32.xlu0 %v689_v27  ;;  %v1469_v28 = vpop.f32.mrf.mxu0  ;;  %v1475_v29 = vpop.f32.mrf.mxu1  ;;  %v983_v27 = vld [vmem:[%s1835_s3 + $0x4] sm:$0xf] }
  0xe3   : > { %v1038_v29 = vsel %vm989_vm5, %v983_v27, 0 }
  0xe4   : > { %v614_v31 = vpop.f32.mrf.mxu0  ;;  %v671_v32 = vpop.f32.mrf.mxu1 }
  0xe5   : > { %v692_v33 = vsel %vm679_vm3, %v614_v31, -inf  ;;  %v698_v36 = vsel %vm679_vm3, %v671_v32, -inf }
  0xe6   : > { %696 = vmax.xlane.f32.xlu0 %v695_v30  ;;  %693 = vmax.xlane.f32.xlu1 %v692_v33  ;;  %v1470_v34 = vpop.f32.mrf.mxu0  ;;  %v1476_v35 = vpop.f32.mrf.mxu1 }
  0xea   : > { %699 = vmax.xlane.f32.xlu1 %v698_v36 }
 0x163   : > { %v678_v45 = vpop.xlane.xlu0 %677  ;;  %v685_v46 = vpop.xlane.xlu1 %684 }
 0x164   : > { %v701_v47 = vsub.f32 %v497_v13, %v678_v45  ;;  %v703_v48 = vsub.f32 %v554_v14, %v685_v46  ;;  %v984_v46 = vld [vmem:[%s1835_s3 + $0x8] sm:$0xf] }
 0x166   : > { %v709_v49 = vmul.f32 1.442695, %v701_v47  ;;  %v713_v50 = vmul.f32 1.442695, %v703_v48 }
 0x167   : > { %v682_v51 = vpop.xlane.xlu0 %681  ;;  %v688_v52 = vpop.xlane.xlu1 %687 }
 0x168   : > { %1563 = vpow2.f32 %v709_v49  ;;  %v702_v53 = vsub.f32 %v500_v19, %v682_v51  ;;  %v704_v54 = vsub.f32 %v557_v20, %v688_v52  ;;  %v985_v51 = vld [vmem:[%s1835_s3 + $0xc] sm:$0xf] }
 0x169   : > { %1565 = vpow2.f32 %v713_v50 }
 0x16a   : > { %v711_v55 = vmul.f32 1.442695, %v702_v53  ;;  %v715_v56 = vmul.f32 1.442695, %v704_v54 }
 0x16b   : > { %v691_v57 = vpop.xlane.xlu0 %690 }
 0x16c   : > { %1567 = vpow2.f32 %v711_v55  ;;  %v705_v58 = vsub.f32 %v611_v25, %v691_v57  ;;  %v1085_v57 = vsel %vm989_vm5, %v984_v46, 0 }
 0x16d   : > { %1569 = vpow2.f32 %v715_v56 }
 0x16e   : > { %v717_v59 = vmul.f32 1.442695, %v705_v58 }
 0x16f   : > { %v697_v60 = vpop.xlane.xlu0 %696  ;;  %v694_v61 = vpop.xlane.xlu1 %693 }
 0x170   : > { %1571 = vpow2.f32 %v717_v59  ;;  %v707_v62 = vsub.f32 %v668_v26, %v697_v60  ;;  %v706_v63 = vsub.f32 %v614_v31, %v694_v61  ;;  %v982_v26 = vld [vmem:[%s1835_s3] sm:$0xf]  ;;  %v1132_v59 = vsel %vm989_vm5, %v985_v51, 0 }
 0x171   : > { %v991_v28 = vsel %vm989_vm5, %v982_v26, 0 }
 0x172   : > { %v721_v1 = vmul.f32 1.442695, %v707_v62  ;;  %v719_v2 = vmul.f32 1.442695, %v706_v63 }
 0x173   : > { %v700_v3 = vpop.xlane.xlu1 %699 }
 0x174   : > { %1573 = vpow2.f32 %v721_v1  ;;  %v708_v4 = vsub.f32 %v671_v32, %v700_v3 }
 0x175   : > { %v1564_v5 = vpop.eup %1563  ;;  %1575 = vpow2.f32 %v719_v2 }
 0x176   : > { %v723_v6 = vmul.f32 1.442695, %v708_v4  ;;  %v725_v7 = vsel %vm675_vm2, %v1564_v5, 0.0  ;;  %v1566_v8 = vpop.eup %1565 }
 0x177   : > { %726 = vadd.xlane.f32.xlu0 %v725_v7  ;;  %v731_v11 = vsel %vm675_vm2, %v1566_v8, 0.0 }
 0x178   : > { %1577 = vpow2.f32 %v723_v6 }
 0x179   : > { %v1568_v9 = vpop.eup %1567 }
 0x17a   : > { %v1570_v10 = vpop.eup %1569  ;;  %v728_v12 = vsel %vm679_vm3, %v1568_v9, 0.0  ;;  %v749_v13 = vpack.c.bf16 %v1568_v9, %v1564_v5 }
 0x17b   : > { %732 = vadd.xlane.f32.xlu0 %v731_v11  ;;  %729 = vadd.xlane.f32.xlu1 %v728_v12  ;;  %v750_v14 = vpack.c.bf16 %v1570_v10, %v1566_v8  ;;  %v734_v17 = vsel %vm679_vm3, %v1570_v10, 0.0 }
 0x17c   : > { %1480 = vmatmul.mubr.msk.bf16.vlgmr.msra.gmra.mxu0 %vm675_vm2, %v749_v13 }
 0x17d   : > { %v1572_v15 = vpop.eup %1571  ;;  %1486 = vmatmul.mubr.msk.bf16.vlgmr.msra.gmra.mxu1 %vm675_vm2, %v750_v14  ;;  %1490 = vmatpush3.bf16.msra.mxu0 %v867_v42 }
 0x17e   : > { %v737_v16 = vsel %vm675_vm2, %v1572_v15, 0.0  ;;  %1496 = vmatpush3.bf16.msra.mxu1 %v919_v44  ;;  %1491 = vmatprep.mubr.msk.bf16.mxu0 %vm1624_vm0, %v1623_v0 }
 0x17f   : > { %738 = vadd.xlane.f32.xlu0 %v737_v16  ;;  %735 = vadd.xlane.f32.xlu1 %v734_v17 }
 0x180   : > { %1497 = vmatprep.mubr.msk.bf16.mxu1 %vm1624_vm0, %v1623_v0  ;;  %1501 = vmatprep.subr.bf16.mxu0 %v1623_v0 }
 0x181   : > { %v1574_v18 = vpop.eup %1573  ;;  %1507 = vmatprep.subr.bf16.mxu1 %v1623_v0 }
 0x182   : > { %v1576_v19 = vpop.eup %1575  ;;  %v743_v20 = vsel %vm675_vm2, %v1574_v18, 0.0 }
 0x183   : > { %744 = vadd.xlane.f32.xlu0 %v743_v20  ;;  %v740_v21 = vsel %vm679_vm3, %v1576_v19, 0.0  ;;  %v751_v22 = vpack.c.bf16 %v1576_v19, %v1572_v15 }
 0x184   : > { %741 = vadd.xlane.f32.xlu1 %v740_v21 }
 0x185   : > { %v1578_v23 = vpop.eup %1577  ;;  %1492 = vmatmul.mubr.msk.bf16.vlgmr.msra.gmra.mxu0 %vm675_vm2, %v751_v22 }
 0x186   : > { %v746_v24 = vsel %vm679_vm3, %v1578_v23, 0.0  ;;  %v752_v25 = vpack.c.bf16 %v1578_v23, %v1574_v18  ;;  %1503 = vmatprep.mubr.msk.bf16.mxu0 %vm1624_vm0, %v1623_v0  ;;  %1502 = vmatpush3.bf16.msra.mxu0 %v991_v28 }
 0x187   : > { %1513 = vmatprep.subr.bf16.mxu0 %v1623_v0 }
 0x188   : > { %747 = vadd.xlane.f32.xlu1 %v746_v24  ;;  %1498 = vmatmul.mubr.msk.bf16.vlgmr.msra.gmra.mxu1 %vm675_vm2, %v752_v25 }
 0x189   : > { %1509 = vmatprep.mubr.msk.bf16.mxu1 %vm1624_vm0, %v1623_v0  ;;  %1508 = vmatpush3.bf16.msra.mxu1 %v1038_v29 }
 0x18a   : > { %1519 = vmatprep.subr.bf16.mxu1 %v1623_v0 }
 0x200   : > { %v727_v30 = vpop.xlane.xlu0 %726 }
 0x201   : > { %1579 = vrcp.f32 %v727_v30 }
 0x204   : > { %v730_v31 = vpop.xlane.xlu1 %729  ;;  %v733_v32 = vpop.xlane.xlu0 %732 }
 0x205   : > { %1581 = vrcp.f32 %v733_v32 }
 0x206   : > { %1583 = vrcp.f32 %v730_v31 }
 0x208   : > { %v736_v33 = vpop.xlane.xlu1 %735  ;;  %v739_v34 = vpop.xlane.xlu0 %738 }
 0x209   : > { %1585 = vrcp.f32 %v736_v33 }
 0x20a   : > { %1587 = vrcp.f32 %v739_v34  ;;  %v1419_v34 = vld [vmem:[%s1836_s4] ss:$0 sm:$0xff] }
 0x20c   : > { %v745_v36 = vpop.xlane.xlu0 %744 }
 0x20d   : > { %v742_v35 = vpop.xlane.xlu1 %741 }
 0x20e   : > { %1589 = vrcp.f32 %v742_v35  ;;  %v1580_v40 = vpop.eup %1579 }
 0x20f   : > { %1591 = vrcp.f32 %v745_v36 }
 0x211   : > { %v748_v37 = vpop.xlane.xlu1 %747 }
 0x212   : > { %v1582_v42 = vpop.eup %1581  ;;  %1593 = vrcp.f32 %v748_v37 }
 0x213   : > { %v1584_v44 = vpop.eup %1583 }
 0x216   : > { %v1586_v47 = vpop.eup %1585 }
 0x217   : > { %v1588_v62 = vpop.eup %1587 }
 0x21b   : > { %v1590_v1 = vpop.eup %1589 }
 0x21c   : > { %v1592_v6 = vpop.eup %1591 }
 0x21f   : > { %v1594_v8 = vpop.eup %1593 }
 0x23c   : > { %v799_v38 = vpop.f32.mrf.mxu0 }
 0x23d   : > { %v851_v39 = vpop.f32.mrf.mxu1  ;;  %v970_v48 = vmul.f32 %v1580_v40, %v799_v38  ;;  %v1200_v40 = vld [vmem:[%s409_s12] sm:$0xff] }
 0x23e   : > { %v1481_v41 = vpop.f32.mrf.mxu0  ;;  %v972_v52 = vmul.f32 %v1582_v42, %v851_v39 }
 0x23f   : > { %v1487_v43 = vpop.f32.mrf.mxu1 }
 0x240   : > { %v802_v45 = vpop.f32.mrf.mxu0 }
 0x241   : > { %v971_v49 = vmul.f32 %v1584_v44, %v802_v45  ;;  %v854_v50 = vpop.f32.mrf.mxu1 }
 0x242   : > { %v973_v53 = vmul.f32 %v1586_v47, %v854_v50  ;;  %v1482_v54 = vpop.f32.mrf.mxu0 }
 0x243   : > { %v978_v55 = vpack.c.bf16 %v971_v49, %v970_v48  ;;  %v1488_v56 = vpop.f32.mrf.mxu1  ;;  %v1201_v48 = vld [vmem:[%s409_s12 + $0x8] sm:$0xf] }
 0x244   : > { %v979_v58 = vpack.c.bf16 %v973_v53, %v972_v52 }
 0x245   : > { %v903_v60 = vpop.f32.mrf.mxu0  ;;  %1504 = vmatmul.mubr.msk.bf16.vlgmr.msra.gmra.mxu0 %vm456_vm1, %v978_v55 }
 0x246   : > { %1510 = vmatmul.mubr.msk.bf16.vlgmr.msra.gmra.mxu1 %vm456_vm1, %v979_v58  ;;  %1514 = vmatpush3.bf16.msra.mxu0 %v1085_v57  ;;  %v974_v3 = vmul.f32 %v1588_v62, %v903_v60 }
 0x247   : > { %v1493_v61 = vpop.f32.mrf.mxu0  ;;  %1520 = vmatpush3.bf16.msra.mxu1 %v1132_v59  ;;  %1515 = vmatprep.mubr.msk.bf16.mxu0 %vm1624_vm0, %v1623_v0 }
 0x248   : > { %v955_v63 = vpop.f32.mrf.mxu1  ;;  %1521 = vmatprep.mubr.msk.bf16.mxu1 %vm1624_vm0, %v1623_v0 }
 0x249   : > { %v906_v2 = vpop.f32.mrf.mxu0  ;;  %v976_v11 = vmul.f32 %v1592_v6, %v955_v63 }
 0x24a   : > { %v975_v4 = vmul.f32 %v1590_v1, %v906_v2  ;;  %v1499_v5 = vpop.f32.mrf.mxu1 }
 0x24b   : > { %v1494_v7 = vpop.f32.mrf.mxu0 }
 0x24c   : > { %v980_v9 = vpack.c.bf16 %v975_v4, %v974_v3  ;;  %v958_v10 = vpop.f32.mrf.mxu1  ;;  %v1420_v7 = vld [vmem:[%s1838_s6] ss:$0 sm:$0xff] }
 0x24d   : > { %v977_v12 = vmul.f32 %v1594_v8, %v958_v10 }
 0x24e   : > { %1516 = vmatmul.mubr.msk.bf16.vlgmr.msra.gmra.mxu0 %vm456_vm1, %v980_v9  ;;  %v1500_v13 = vpop.f32.mrf.mxu1  ;;  %v1421_v9 = vld [vmem:[%s1839_s7] ss:$0 sm:$0xff] }
 0x24f   : > { %v981_v14 = vpack.c.bf16 %v977_v12, %v976_v11 }
 0x251   : > { %1522 = vmatmul.mubr.msk.bf16.vlgmr.msra.gmra.mxu1 %vm456_vm1, %v981_v14 }
 0x305   : > { %v1027_v0 = vpop.f32.mrf.mxu0 }
 0x306   : > { %v1074_v15 = vpop.f32.mrf.mxu1  ;;  %v1176_v21 = vsel %vm1175_vm6, %v1027_v0, 0.0 }
 0x307   : > { %v1505_v16 = vpop.f32.mrf.mxu0  ;;  %v1177_v22 = vsel %vm1175_vm6, %v1074_v15, 0.0 }
 0x308   : > { %v1511_v17 = vpop.f32.mrf.mxu1  ;;  %v1178_v25 = vadd.f32 %v1177_v22, %v1176_v21 }
 0x309   : > { %v1030_v18 = vpop.f32.mrf.mxu0 }
 0x30a   : > { %v1077_v19 = vpop.f32.mrf.mxu1  ;;  %v1184_v27 = vsel %vm1183_vm7, %v1030_v18, 0.0 }
 0x30b   : > { %v1506_v20 = vpop.f32.mrf.mxu0  ;;  %v1185_v28 = vsel %vm1183_vm7, %v1077_v19, 0.0 }
 0x30c   : > { %v1512_v23 = vpop.f32.mrf.mxu1  ;;  %v1186_v35 = vadd.f32 %v1185_v28, %v1184_v27 }
 0x30e   : > { %v1121_v24 = vpop.f32.mrf.mxu0 }
 0x30f   : > { %v1179_v26 = vsel %vm1175_vm6, %v1121_v24, 0.0 }
 0x310   : > { %v1517_v29 = vpop.f32.mrf.mxu0  ;;  %v1180_v30 = vadd.f32 %v1179_v26, %v1178_v25 }
 0x311   : > { %v1168_v31 = vpop.f32.mrf.mxu1 }
 0x312   : > { %v1124_v32 = vpop.f32.mrf.mxu0  ;;  %v1181_v33 = vsel %vm1175_vm6, %v1168_v31, 0.0 }
 0x313   : > { %v1187_v36 = vsel %vm1183_vm7, %v1124_v32, 0.0  ;;  %v1182_v37 = vadd.f32 %v1181_v33, %v1180_v30  ;;  %v1523_v38 = vpop.f32.mrf.mxu1 }
 0x314   : > { %v1518_v39 = vpop.f32.mrf.mxu0  ;;  %v1188_v41 = vadd.f32 %v1187_v36, %v1186_v35 }
 0x315   : > { %v1198_v42 = vadd.f32 %v1419_v34, %v1182_v37  ;;  %v1171_v43 = vpop.f32.mrf.mxu1 }
 0x316   : > { %v1189_v44 = vsel %vm1183_vm7, %v1171_v43, 0.0 }
 0x317   : > { %v1190_v45 = vadd.f32 %v1189_v44, %v1188_v41  ;;  %v1524_v46 = vpop.f32.mrf.mxu1  ;;  %v1202_v47 = vadd.f32 %v1200_v40, %v1198_v42 }
 0x319   : > { %v1199_v49 = vadd.f32 %v1419_v34, %v1190_v45  ;;  %v1204_v50 = vsel %vm1175_vm6, %v1202_v47, 0.0 }
 0x31a   : > { %1205 = vadd.xlane.f32.xlu0 %v1204_v50 }
 0x31b   : > { %v1203_v51 = vadd.f32 %v1201_v48, %v1199_v49 }
 0x31d   : > { %v1207_v52 = vsel %vm1183_vm7, %v1203_v51, 0.0 }
 0x31e   : > { %1208 = vadd.xlane.f32.xlu1 %v1207_v52 }
 0x3a3   : > { %v1206_v53 = vpop.xlane.xlu0 %1205 }
 0x3a4   : > { %v1211_v54 = vmul.f32 0.03125, %v1206_v53 }
 0x3a6   : > { %v1213_v55 = vsub.f32 %v1202_v47, %v1211_v54 }
 0x3a7   : > { %v1209_v56 = vpop.xlane.xlu1 %1208 }
 0x3a8   : > { %v1212_v57 = vmul.f32 0.03125, %v1209_v56  ;;  %v1215_v58 = vmul.f32 %v1213_v55, %v1213_v55 }
 0x3aa   : > { %v1214_v59 = vsub.f32 %v1203_v51, %v1212_v57  ;;  %v1217_v60 = vsel %vm1175_vm6, %v1215_v58, 0.0 }
 0x3ab   : > { %1218 = vadd.xlane.f32.xlu0 %v1217_v60 }
 0x3ac   : > { %v1216_v61 = vmul.f32 %v1214_v59, %v1214_v59 }
 0x3ae   : > { %v1220_v62 = vsel %vm1183_vm7, %v1216_v61, 0.0 }
 0x3af   : > { %1221 = vadd.xlane.f32.xlu1 %v1220_v62 }
 0x434   : > { %v1219_v63 = vpop.xlane.xlu0 %1218 }
 0x435   : > { %v1223_v1 = vmul.f32 0.03125, %v1219_v63 }
 0x437   : > { %v1225_v2 = vadd.f32 1e-05, %v1223_v1 }
 0x438   : > { %v1222_v3 = vpop.xlane.xlu1 %1221 }
 0x439   : > { %1595 = vrsqrt.f32 %v1225_v2  ;;  %v1224_v4 = vmul.f32 0.03125, %v1222_v3 }
 0x43b   : > { %v1226_v5 = vadd.f32 1e-05, %v1224_v4 }
 0x43d   : > { %1597 = vrsqrt.f32 %v1226_v5 }
 0x446   : > { %v1596_v6 = vpop.eup %1595 }
 0x447   : > { %v1229_v8 = vmul.f32 %v1596_v6, %v1213_v55 }
 0x449   : > { %v1238_v10 = vmul.f32 %v1420_v7, %v1229_v8 }
 0x44a   : > { %v1598_v11 = vpop.eup %1597 }
 0x44b   : > { %v1247_v12 = vadd.f32 %v1421_v9, %v1238_v10  ;;  %v1230_v13 = vmul.f32 %v1598_v11, %v1214_v59 }
 0x44d   : > { %1249 = vst.msk [vmem:[%s419_s21] sm:$0xff] %vm1175_vm6, %v1247_v12  ;;  %v1239_v14 = vmul.f32 %v1420_v7, %v1230_v13 }
 0x44f   : > { %v1248_v0 = vadd.f32 %v1421_v9, %v1239_v14 }
 0x451   : > { %1250 = vst.msk [vmem:[%s419_s21 + $0x8] sm:$0xf] %vm1183_vm7, %v1248_v0 }
 0x452 PF: > { %s18_s29 = sadd.s32 1, %s1621_s29   ;;  %s1841_s27 = smov %s1617_s28 }
 0x453   : > { %p15_p5 = scmp.ge.s32.totalorder %s18_s29, 4   ;;  %s1842_s28 = smov %s1844_s30 }
 0x455   :  { %17 = sbr.rel (!%p15_p5) target bundleno = 2 (0x2), region = 91 }

// kernel: transformer_forward.27
= control target key start
LH: loop header
LB: loop body
LE: loop exit
PB: predicated region body
PF: predicated region fallthrough
CT: control target
= control target key end

     0   :  { %vm17_vm0 = vcmask 261120   ;;  %s146_s0 = inlined_call_operand.vmem [shape: f32[24,32], index: 0, kind: input, shape index: {}]   ;;  %s147_s1 = inlined_call_operand.vmem [shape: f32[1,32], index: 1, kind: input, shape index: {}]   ;;  %s148_s2 = inlined_call_operand.vmem [shape: f32[1,32], index: 2, kind: input, shape index: {}]   ;;  %s149_s3 = inlined_call_operand.vmem [shape: f32[24,32], index: 3, kind: output, shape index: {}]  }
   0x1   :  { %v14_v0 = vld [vmem:[%s146_s0] sm:$0xff]  ;;  %v16_v1 = vld [vmem:[%s146_s0 + $0x10] sm:$0xff]  ;;  %v15_v2 = vld [vmem:[%s146_s0 + $0x8] sm:$0xff] }
   0x2   :  { %v18_v3 = vsel %vm17_vm0, %v14_v0, 0.0  ;;  %v24_v4 = vsel %vm17_vm0, %v16_v1, 0.0  ;;  %v21_v5 = vsel %vm17_vm0, %v15_v2, 0.0  ;;  %v85_v31 = vld [vmem:[%s147_s1] ss:$0 sm:$0xff] }
   0x3   :  { %19 = vadd.xlane.f32.xlu0 %v18_v3  ;;  %25 = vadd.xlane.f32.xlu1 %v24_v4  ;;  %v86_v33 = vld [vmem:[%s148_s2] ss:$0 sm:$0xff] }
   0x7   :  { %22 = vadd.xlane.f32.xlu0 %v21_v5 }
  0x8c   :  { %v20_v6 = vpop.xlane.xlu0 %19  ;;  %v26_v7 = vpop.xlane.xlu1 %25 }
  0x8d   :  { %v28_v8 = vmul.f32 0.03125, %v20_v6  ;;  %v30_v9 = vmul.f32 0.03125, %v26_v7 }
  0x8f   :  { %v31_v10 = vsub.f32 %v14_v0, %v28_v8  ;;  %v33_v11 = vsub.f32 %v16_v1, %v30_v9 }
  0x90   :  { %v23_v12 = vpop.xlane.xlu0 %22 }
  0x91   :  { %v29_v13 = vmul.f32 0.03125, %v23_v12  ;;  %v34_v14 = vmul.f32 %v31_v10, %v31_v10  ;;  %v36_v15 = vmul.f32 %v33_v11, %v33_v11 }
  0x93   :  { %v32_v16 = vsub.f32 %v15_v2, %v29_v13  ;;  %v37_v17 = vsel %vm17_vm0, %v34_v14, 0.0  ;;  %v43_v18 = vsel %vm17_vm0, %v36_v15, 0.0 }
  0x94   :  { %38 = vadd.xlane.f32.xlu1 %v37_v17 }
  0x95   :  { %v35_v19 = vmul.f32 %v32_v16, %v32_v16 }
  0x97   :  { %v40_v20 = vsel %vm17_vm0, %v35_v19, 0.0 }
  0x98   :  { %44 = vadd.xlane.f32.xlu1 %v43_v18  ;;  %41 = vadd.xlane.f32.xlu0 %v40_v20 }
 0x11d   :  { %v39_v21 = vpop.xlane.xlu1 %38 }
 0x11e   :  { %v46_v22 = vmul.f32 0.03125, %v39_v21 }
 0x120   :  { %v49_v23 = vadd.f32 1e-05, %v46_v22 }
 0x121   :  { %v45_v24 = vpop.xlane.xlu1 %44  ;;  %v42_v25 = vpop.xlane.xlu0 %41 }
 0x122   :  { %87 = vrsqrt.f32 %v49_v23  ;;  %v48_v26 = vmul.f32 0.03125, %v45_v24  ;;  %v47_v27 = vmul.f32 0.03125, %v42_v25 }
 0x124   :  { %v51_v28 = vadd.f32 1e-05, %v48_v26  ;;  %v50_v29 = vadd.f32 1e-05, %v47_v27 }
 0x126   :  { %89 = vrsqrt.f32 %v51_v28 }
 0x127   :  { %91 = vrsqrt.f32 %v50_v29 }
 0x12f   :  { %v88_v30 = vpop.eup %87 }
 0x130   :  { %v55_v32 = vmul.f32 %v88_v30, %v31_v10 }
 0x132   :  { %v65_v34 = vmul.f32 %v85_v31, %v55_v32 }
 0x133   :  { %v90_v35 = vpop.eup %89 }
 0x134   :  { %v92_v36 = vpop.eup %91  ;;  %v75_v37 = vadd.f32 %v86_v33, %v65_v34  ;;  %v57_v38 = vmul.f32 %v90_v35, %v33_v11 }
 0x135   :  { %v56_v39 = vmul.f32 %v92_v36, %v32_v16 }
 0x136   :  { %78 = vst.msk [vmem:[%s149_s3] sm:$0xff] %vm17_vm0, %v75_v37  ;;  %v67_v40 = vmul.f32 %v85_v31, %v57_v38 }
 0x137   :  { %v66_v41 = vmul.f32 %v85_v31, %v56_v39 }
 0x138   :  { %v77_v42 = vadd.f32 %v86_v33, %v67_v40 }
 0x139   :  { %v76_v43 = vadd.f32 %v86_v33, %v66_v41 }
 0x13a   :  { %80 = vst.msk [vmem:[%s149_s3 + $0x10] sm:$0xff] %vm17_vm0, %v77_v42 }
 0x13b   :  { %79 = vst.msk [vmem:[%s149_s3 + $0x8] sm:$0xff] %vm17_vm0, %v76_v43 }

// kernel: transformer_forward.31
= control target key start
LH: loop header
LB: loop body
LE: loop exit
PB: predicated region body
PF: predicated region fallthrough
CT: control target
= control target key end

     0   :  { %vm19_vm0 = vcmask 523264   ;;  %v172_v1 = vmov 0.0   ;;  %vm47_vm1 = vcmask 261120   ;;  %vm138_vm2 = vcmask 519168   ;;  %s226_s1 = inlined_call_operand.vmem [shape: bf16[32,64], index: 1, kind: input, shape index: {}]   ;;  %s227_s0 = inlined_call_operand.vmem [shape: f32[24,32], index: 0, kind: input, shape index: {}]   ;;  %s228_s2 = inlined_call_operand.vmem [shape: f32[1,64], index: 2, kind: input, shape index: {}]   ;;  %s229_s3 = inlined_call_operand.vmem [shape: bf16[24,64], index: 3, kind: output, shape index: {}]  }
   0x1   :  { %v170_v0 = vld [vmem:[%s226_s1 + $0x8] sm:$0xff]   ;;  %22 = vst.msk [vmem:[#allocation2 + $0x10] sm:$0xff] %vm19_vm0, %v172_v1  ;;  %20 = vst.msk [vmem:[#allocation2] sm:$0xff] %vm19_vm0, %v172_v1  ;;  %v171_v2 = vld [vmem:[%s226_s1] sm:$0xff]  }
   0x2   :  { %21 = vst.msk [vmem:[#allocation2 + $0x8] sm:$0xff] %vm19_vm0, %v172_v1  ;;  %161 = vmatprep.subr.bf16.mxu0 %v170_v0  ;;  %v26_v3 = vld [vmem:[%s227_s0] sm:$0xff]  ;;  %v27_v4 = vld [vmem:[%s227_s0 + $0x8] sm:$0xff]  ;;  %v28_v5 = vld [vmem:[%s227_s0 + $0x10] sm:$0xff] }
   0x3   :  { %162 = vmatpush3.bf16.msra.mxu0 %v170_v0  ;;  %v29_v6 = vpack.c.bf16 %v27_v4, %v26_v3  ;;  %v30_v7 = vpack.c.bf16 %v28_v5, %v28_v5  ;;  %v150_v18 = vld [vmem:[%s228_s2] ss:$0 sm:$0xff] }
   0x4   :  { %163 = vmatprep.subr.bf16.mxu0 %v171_v2 }
   0x5   :  { %165 = vmatprep.mubr.msk.bf16.mxu0 %vm47_vm1, %v29_v6 }
   0x7   :  { %164 = vmatpush3.bf16.msra.mxu0 %v171_v2 }
   0x8   :  { %v25_v8 = vld [vmem:[#allocation2 + $0x10] sm:$0xff]  ;;  %v23_v10 = vld [vmem:[#allocation2] sm:$0xff] }
   0x9   :  { %v24_v15 = vld [vmem:[#allocation2 + $0x8] sm:$0xff] }
   0xa   :  { %166 = vmatmul.mubr.msk.bf16.vlgmr.msra.gmra.mxu0 %vm47_vm1, %v30_v7 }
  0xca   :  { %v167_v9 = vpop.f32.mrf.mxu0 }
  0xcb   :  { %v104_v11 = vadd.f32 %v167_v9, %v25_v8 }
  0xcc   :  { %v88_v12 = vpop.f32.mrf.mxu0 }
  0xcd   :  { %108 = vst.msk [vmem:[#allocation2 + $0x10] sm:$0xff] %vm19_vm0, %v104_v11  ;;  %v102_v13 = vadd.f32 %v88_v12, %v23_v10 }
  0xce   :  { %v168_v14 = vpop.f32.mrf.mxu0 }
  0xcf   :  { %106 = vst.msk [vmem:[#allocation2] sm:$0xff] %vm19_vm0, %v102_v13 }
  0xd0   :  { %v91_v16 = vpop.f32.mrf.mxu0 }
  0xd1   :  { %v103_v17 = vadd.f32 %v91_v16, %v24_v15 }
  0xd3   :  { %107 = vst.msk [vmem:[#allocation2 + $0x8] sm:$0xff] %vm19_vm0, %v103_v17 }
  0xd4   :  { %v114_v19 = vld [vmem:[#allocation2 + $0x10] sm:$0xff] }
  0xd5   :  { %v124_v20 = vadd.f32 %v150_v18, %v114_v19 }
  0xd6   :  { %v112_v21 = vld [vmem:[#allocation2] sm:$0xff] }
  0xd7   :  { %v156_v22 = vpack.c.bf16 %v124_v20, %v124_v20  ;;  %v122_v23 = vadd.f32 %v150_v18, %v112_v21 }
  0xd9   :  { %141 = vst.msk [vmem:[%s229_s3 + $0x8] sm:$0xf] %vm138_vm2, %v156_v22  ;;  %v154_v24 = vpack.c.bf16 %v122_v23, %v122_v23 }
  0xda   :  { %v113_v25 = vld [vmem:[#allocation2 + $0x8] sm:$0xff] }
  0xdb   :  { %139 = vst.msk [vmem:[%s229_s3] sm:$0xf] %vm138_vm2, %v154_v24  ;;  %v123_v26 = vadd.f32 %v150_v18, %v113_v25 }
  0xdd   :  { %v155_v27 = vpack.c.bf16 %v123_v26, %v123_v26 }
  0xdf   :  { %140 = vst.msk [vmem:[%s229_s3 + $0x4] sm:$0xf] %vm138_vm2, %v155_v27 }

// kernel: transformer_forward.23
= control target key start
LH: loop header
LB: loop body
LE: loop exit
PB: predicated region body
PF: predicated region fallthrough
CT: control target
= control target key end

     0   :  { %v2829_v3 = vmov 0   ;;  %vm308_vm0 = vcmask 261120   ;;  %s3620_s1 = inlined_call_operand.vmem [shape: bf16[32,2048], index: 1, kind: input, shape index: {}]   ;;  %s3621_s0 = inlined_call_operand.vmem [shape: f32[24,32], index: 0, kind: input, shape index: {}]   ;;  %s3622_s3 = inlined_call_operand.vmem [shape: bf16[2048,32], index: 3, kind: input, shape index: {}]   ;;  %s3623_s2 = inlined_call_operand.vmem [shape: f32[1,2048], index: 2, kind: input, shape index: {}]   ;;  %s3624_s4 = inlined_call_operand.vmem [shape: f32[1,32], index: 4, kind: input, shape index: {}]   ;;  %s3625_s5 = inlined_call_operand.vmem [shape: f32[1,32], index: 5, kind: input, shape index: {}]   ;;  %s3626_s6 = inlined_call_operand.vmem [shape: f32[1,32], index: 6, kind: input, shape index: {}]   ;;  %s3627_s7 = inlined_call_operand.vmem [shape: f32[24,32], index: 7, kind: output, shape index: {}]  }
   0x1   :  { %v48_v0 = vld [vmem:[%s3620_s1 + $0x80] sm:$0xff]  ;;  %v49_v2 = vld [vmem:[%s3620_s1 + $0x88] sm:$0xff]  ;;  %347 = vmatprep.mubr.bf16.mxu0 %v2829_v3  ;;  %398 = vmatprep.mubr.bf16.mxu1 %v2829_v3  ;;  %v50_v17 = vld [vmem:[%s3620_s1 + $0x90] sm:$0xff] }
   0x2   :  { %v56_v1 = vld [vmem:[%s3620_s1 + $0xc0] sm:$0xff]  ;;  %v57_v5 = vld [vmem:[%s3620_s1 + $0xc8] sm:$0xff]  ;;  %v58_v19 = vld [vmem:[%s3620_s1 + $0xd0] sm:$0xff] }
   0x3   :  { %v2305_v4 = vcombine.high %v48_v0, %v56_v1  ;;  %v2304_v6 = vcombine.low %v48_v0, %v56_v1  ;;  %v32_v7 = vld [vmem:[%s3620_s1] sm:$0xff]  ;;  %v2307_v9 = vcombine.high %v49_v2, %v57_v5  ;;  %v2306_v10 = vcombine.low %v49_v2, %v57_v5  ;;  %v33_v12 = vld [vmem:[%s3620_s1 + $0x8] sm:$0xff]  ;;  %v51_v20 = vld [vmem:[%s3620_s1 + $0x98] sm:$0xff] }
   0x4   :  { %v40_v8 = vld [vmem:[%s3620_s1 + $0x40] sm:$0xff]  ;;  %v41_v13 = vld [vmem:[%s3620_s1 + $0x48] sm:$0xff]  ;;  %v59_v21 = vld [vmem:[%s3620_s1 + $0xd8] sm:$0xff]  ;;  %v2309_v23 = vcombine.high %v50_v17, %v58_v19  ;;  %v2308_v30 = vcombine.low %v50_v17, %v58_v19 }
   0x5   :  { %v2289_v11 = vcombine.high %v32_v7, %v40_v8  ;;  %327 = vmatprep.subr.bf16.mxu0 %v2305_v4  ;;  %v2291_v14 = vcombine.high %v33_v12, %v41_v13  ;;  %v27_v15 = vld [vmem:[%s3621_s0] sm:$0xff]  ;;  %v28_v16 = vld [vmem:[%s3621_s0 + $0x8] sm:$0xff]  ;;  %378 = vmatprep.subr.bf16.mxu1 %v2307_v9  ;;  %v2288_v18 = vcombine.low %v32_v7, %v40_v8  ;;  %v34_v26 = vld [vmem:[%s3620_s1 + $0x10] sm:$0xff] }
   0x6   :  { %328 = vmatpush1.bf16.msra.mxu0 %v2304_v6  ;;  %379 = vmatpush1.bf16.msra.mxu1 %v2306_v10  ;;  %v2290_v22 = vcombine.low %v33_v12, %v41_v13  ;;  %v2311_v24 = vcombine.high %v51_v20, %v59_v21  ;;  %v2914_v25 = vpack.c.bf16 %v28_v16, %v27_v15  ;;  %v42_v27 = vld [vmem:[%s3620_s1 + $0x50] sm:$0xff]  ;;  %v35_v28 = vld [vmem:[%s3620_s1 + $0x18] sm:$0xff]  ;;  %v52_v34 = vld [vmem:[%s3620_s1 + $0xa0] sm:$0xff] }
   0x7   :  { %329 = vmatprep.subr.bf16.mxu0 %v2289_v11  ;;  %380 = vmatprep.subr.bf16.mxu1 %v2291_v14  ;;  %v43_v29 = vld [vmem:[%s3620_s1 + $0x58] sm:$0xff]  ;;  %v29_v31 = vld [vmem:[%s3621_s0 + $0x10] sm:$0xff]  ;;  %v2310_v32 = vcombine.low %v51_v20, %v59_v21  ;;  %v2293_v33 = vcombine.high %v34_v26, %v42_v27  ;;  %v60_v36 = vld [vmem:[%s3620_s1 + $0xe0] sm:$0xff]  ;;  %v2292_v39 = vcombine.low %v34_v26, %v42_v27 }
   0x8   :  { %v2295_v35 = vcombine.high %v35_v28, %v43_v29  ;;  %v53_v37 = vld [vmem:[%s3620_s1 + $0xa8] sm:$0xff]  ;;  %v2294_v40 = vcombine.low %v35_v28, %v43_v29  ;;  %v2313_v41 = vcombine.high %v52_v34, %v60_v36  ;;  %v2949_v42 = vpack.c.bf16 %v29_v31, %v29_v31  ;;  %v36_v44 = vld [vmem:[%s3620_s1 + $0x20] sm:$0xff]  ;;  %v54_v49 = vld [vmem:[%s3620_s1 + $0xb0] sm:$0xff] }
   0x9   :  { %v61_v38 = vld [vmem:[%s3620_s1 + $0xe8] sm:$0xff]  ;;  %v44_v45 = vld [vmem:[%s3620_s1 + $0x60] sm:$0xff]  ;;  %v2312_v48 = vcombine.low %v52_v34, %v60_v36  ;;  %v62_v52 = vld [vmem:[%s3620_s1 + $0xf0] sm:$0xff] }
   0xa   :  { %330 = vmatpush1.bf16.msra.mxu0 %v2288_v18  ;;  %381 = vmatpush1.bf16.msra.mxu1 %v2290_v22  ;;  %v2315_v43 = vcombine.high %v53_v37, %v61_v38  ;;  %v37_v46 = vld [vmem:[%s3620_s1 + $0x28] sm:$0xff]  ;;  %v2314_v50 = vcombine.low %v53_v37, %v61_v38  ;;  %v2297_v51 = vcombine.high %v36_v44, %v44_v45  ;;  %v55_v54 = vld [vmem:[%s3620_s1 + $0xb8] sm:$0xff]  ;;  %v38_v60 = vld [vmem:[%s3620_s1 + $0x30] sm:$0xff] }
   0xb   :  { %429 = vmatprep.subr.bf16.mxu0 %v2309_v23  ;;  %480 = vmatprep.subr.bf16.mxu1 %v2311_v24  ;;  %v45_v47 = vld [vmem:[%s3620_s1 + $0x68] sm:$0xff]  ;;  %v63_v55 = vld [vmem:[%s3620_s1 + $0xf8] sm:$0xff]  ;;  %v2296_v56 = vcombine.low %v36_v44, %v44_v45  ;;  %v2317_v58 = vcombine.high %v54_v49, %v62_v52  ;;  %v46_v61 = vld [vmem:[%s3620_s1 + $0x70] sm:$0xff]  ;;  %v2316_v0 = vcombine.low %v54_v49, %v62_v52 }
   0xc   :  { %v2299_v53 = vcombine.high %v37_v46, %v45_v47  ;;  %v2298_v57 = vcombine.low %v37_v46, %v45_v47  ;;  %v2319_v59 = vcombine.high %v55_v54, %v63_v55  ;;  %v39_v62 = vld [vmem:[%s3620_s1 + $0x38] sm:$0xff]  ;;  %v2318_v1 = vcombine.low %v55_v54, %v63_v55  ;;  %v2696_v11 = vld [vmem:[%s3622_s3 + $0x70] sm:$0xff]   ;;  %v2700_v15 = vld [vmem:[%s3622_s3 + $0x68] sm:$0xff]  }
   0xd   :  { %2320 = vmatmul.mubr.msk.bf16.vlgmr.msra.gmra.mxu0 %vm308_vm0, %v2914_v25  ;;  %2322 = vmatmul.mubr.msk.bf16.vlgmr.msra.gmra.mxu1 %vm308_vm0, %v2914_v25  ;;  %v47_v63 = vld [vmem:[%s3620_s1 + $0x78] sm:$0xff]  ;;  %v2301_v2 = vcombine.high %v38_v60, %v46_v61  ;;  %v2300_v6 = vcombine.low %v38_v60, %v46_v61  ;;  %v2697_v12 = vld [vmem:[%s3622_s3 + $0xf0] sm:$0xff]   ;;  %v2701_v16 = vld [vmem:[%s3622_s3 + $0xe8] sm:$0xff]  }
   0xe   :  { %357 = vmatprep.mubr.bf16.mxu0 %v2829_v3  ;;  %408 = vmatprep.mubr.bf16.mxu1 %v2829_v3  ;;  %v2303_v4 = vcombine.high %v39_v62, %v47_v63  ;;  %v2692_v5 = vld [vmem:[%s3622_s3 + $0x78] sm:$0xff]   ;;  %v2302_v8 = vcombine.low %v39_v62, %v47_v63  ;;  %v2698_v13 = vld [vmem:[%s3622_s3 + $0x30] sm:$0xff]   ;;  %v2702_v17 = vld [vmem:[%s3622_s3 + $0x28] sm:$0xff]  }
   0xf   :  { %430 = vmatpush1.bf16.msra.mxu0 %v2308_v30  ;;  %481 = vmatpush1.bf16.msra.mxu1 %v2310_v32  ;;  %v2693_v7 = vld [vmem:[%s3622_s3 + $0xf8] sm:$0xff]   ;;  %v2699_v14 = vld [vmem:[%s3622_s3 + $0xb0] sm:$0xff]   ;;  %v2703_v18 = vld [vmem:[%s3622_s3 + $0xa8] sm:$0xff]  }
  0x10   :  { %431 = vmatprep.subr.bf16.mxu0 %v2293_v33  ;;  %482 = vmatprep.subr.bf16.mxu1 %v2295_v35  ;;  %v2694_v9 = vld [vmem:[%s3622_s3 + $0x38] sm:$0xff]   ;;  %v2705_v19 = vld [vmem:[%s3622_s3 + $0xe0] sm:$0xff]   ;;  %v2712_v26 = vld [vmem:[%s3622_s3 + $0x50] sm:$0xff]  }
  0x11   :  { %v2695_v10 = vld [vmem:[%s3622_s3 + $0xb8] sm:$0xff]   ;;  %v2706_v20 = vld [vmem:[%s3622_s3 + $0x20] sm:$0xff]   ;;  %v2713_v27 = vld [vmem:[%s3622_s3 + $0xd0] sm:$0xff]  }
  0x12   :  { %v2707_v21 = vld [vmem:[%s3622_s3 + $0xa0] sm:$0xff]   ;;  %v2708_v22 = vld [vmem:[%s3622_s3 + $0x58] sm:$0xff]   ;;  %v2714_v28 = vld [vmem:[%s3622_s3 + $0x10] sm:$0xff]  }
  0x13   :  { %432 = vmatpush1.bf16.msra.mxu0 %v2292_v39  ;;  %483 = vmatpush1.bf16.msra.mxu1 %v2294_v40  ;;  %v2709_v23 = vld [vmem:[%s3622_s3 + $0xd8] sm:$0xff]   ;;  %v2715_v29 = vld [vmem:[%s3622_s3 + $0x90] sm:$0xff]   ;;  %v2716_v30 = vld [vmem:[%s3622_s3 + $0x48] sm:$0xff]   ;;  %v68_v40 = vlaneseq }
  0x14   :  { %531 = vmatprep.subr.bf16.mxu0 %v2313_v41  ;;  %582 = vmatprep.subr.bf16.mxu1 %v2315_v43  ;;  %v2710_v24 = vld [vmem:[%s3622_s3 + $0x18] sm:$0xff]   ;;  %v2717_v31 = vld [vmem:[%s3622_s3 + $0xc8] sm:$0xff]   ;;  %v2720_v34 = vld [vmem:[%s3622_s3 + $0x40] sm:$0xff]  }
  0x15   :  { %2321 = vmatmul.mubr.msk.bf16.gmra.mxu0 %vm308_vm0, %v2949_v42  ;;  %2323 = vmatmul.mubr.msk.bf16.gmra.mxu1 %vm308_vm0, %v2949_v42  ;;  %v2718_v32 = vld [vmem:[%s3622_s3 + $0x8] sm:$0xff]   ;;  %v2721_v35 = vld [vmem:[%s3622_s3 + $0xc0] sm:$0xff]   ;;  %v2724_v38 = vld [vmem:[%s3622_s3 + $0x178] sm:$0xff]   ;;  %v3129_v41 = vshrl.u32 %v68_v40, 7 }
  0x16   :  { %449 = vmatprep.mubr.bf16.mxu0 %v2829_v3  ;;  %500 = vmatprep.mubr.bf16.mxu1 %v2829_v3  ;;  %v2719_v33 = vld [vmem:[%s3622_s3 + $0x88] sm:$0xff]   ;;  %v2722_v36 = vld [vmem:[%s3622_s3] sm:$0xff]   ;;  %v2725_v39 = vld [vmem:[%s3622_s3 + $0x1f8] sm:$0xff]  }
  0x17   :  { %v2723_v37 = vld [vmem:[%s3622_s3 + $0x80] sm:$0xff]   ;;  %v70_v43 = vsub.s32 0, %v3129_v41  ;;  %v82_v44 = vsub.s32 3, %v3129_v41  ;;  %v78_v46 = vsub.s32 2, %v3129_v41  ;;  %v2731_v40 = vld [vmem:[%s3622_s3 + $0x1b0] sm:$0xff]  }
  0x18   :  { %v3137_v45 = vld [vmem:[%s3623_s2] sm:$0xff] }
  0x19   :  { %v83_v52 = vrot.slane %v3137_v45, %v82_v44 }
  0x1d   :  { %2324 = vmatmul.mubr.msk.bf16.vlgmr.msra.gmra.mxu0 %vm308_vm0, %v2914_v25  ;;  %2326 = vmatmul.mubr.msk.bf16.vlgmr.msra.gmra.mxu1 %vm308_vm0, %v2914_v25 }
  0x1e   :  { %459 = vmatprep.mubr.bf16.mxu0 %v2829_v3  ;;  %510 = vmatprep.mubr.bf16.mxu1 %v2829_v3 }
  0x1f   :  { %532 = vmatpush1.bf16.msra.mxu0 %v2312_v48  ;;  %583 = vmatpush1.bf16.msra.mxu1 %v2314_v50  ;;  %v71_v50 = vrot.slane %v3137_v45, %v70_v43 }
  0x20   :  { %533 = vmatprep.subr.bf16.mxu0 %v2297_v51  ;;  %584 = vmatprep.subr.bf16.mxu1 %v2299_v53  ;;  %v79_v53 = vrot.slane %v3137_v45, %v78_v46 }
  0x23   :  { %534 = vmatpush1.bf16.msra.mxu0 %v2296_v56  ;;  %585 = vmatpush1.bf16.msra.mxu1 %v2298_v57 }
  0x24   :  { %633 = vmatprep.subr.bf16.mxu0 %v2317_v58  ;;  %684 = vmatprep.subr.bf16.mxu1 %v2319_v59 }
  0x25   :  { %2325 = vmatmul.mubr.msk.bf16.gmra.mxu0 %vm308_vm0, %v2949_v42  ;;  %2327 = vmatmul.mubr.msk.bf16.gmra.mxu1 %vm308_vm0, %v2949_v42 }
  0x26   :  { %551 = vmatprep.mubr.bf16.mxu0 %v2829_v3  ;;  %602 = vmatprep.mubr.bf16.mxu1 %v2829_v3 }
  0x2d   :  { %2328 = vmatmul.mubr.msk.bf16.vlgmr.msra.gmra.mxu0 %vm308_vm0, %v2914_v25  ;;  %2330 = vmatmul.mubr.msk.bf16.vlgmr.msra.gmra.mxu1 %vm308_vm0, %v2914_v25 }
  0x2e   :  { %561 = vmatprep.mubr.bf16.mxu0 %v2829_v3  ;;  %612 = vmatprep.mubr.bf16.mxu1 %v2829_v3 }
  0x2f   :  { %634 = vmatpush1.bf16.msra.mxu0 %v2316_v0  ;;  %685 = vmatpush1.bf16.msra.mxu1 %v2318_v1 }
  0x30   :  { %635 = vmatprep.subr.bf16.mxu0 %v2301_v2  ;;  %686 = vmatprep.subr.bf16.mxu1 %v2303_v4 }
  0x33   :  { %636 = vmatpush1.bf16.msra.mxu0 %v2300_v6  ;;  %687 = vmatpush1.bf16.msra.mxu1 %v2302_v8 }
  0x34   :  { %2467 = vmatprep.subr.bf16.mxu0 %v2692_v5  ;;  %2495 = vmatprep.subr.bf16.mxu1 %v2693_v7 }
  0x35   :  { %2329 = vmatmul.mubr.msk.bf16.gmra.mxu0 %vm308_vm0, %v2949_v42  ;;  %2331 = vmatmul.mubr.msk.bf16.gmra.mxu1 %vm308_vm0, %v2949_v42 }
  0x36   :  { %653 = vmatprep.mubr.bf16.mxu0 %v2829_v3  ;;  %704 = vmatprep.mubr.bf16.mxu1 %v2829_v3 }
  0x3d   :  { %2332 = vmatmul.mubr.msk.bf16.vlgmr.msra.gmra.mxu0 %vm308_vm0, %v2914_v25  ;;  %2334 = vmatmul.mubr.msk.bf16.vlgmr.msra.gmra.mxu1 %vm308_vm0, %v2914_v25  ;;  %v2711_v25 = vld [vmem:[%s3622_s3 + $0x98] sm:$0xff]  }
  0x3e   :  { %663 = vmatprep.mubr.bf16.mxu0 %v2829_v3  ;;  %714 = vmatprep.mubr.bf16.mxu1 %v2829_v3  ;;  %v2704_v3 = vld [vmem:[%s3622_s3 + $0x60] sm:$0xff]  }
  0x3f   :  { %2468 = vmatpush3.bf16.msra.mxu0 %v2694_v9  ;;  %2496 = vmatpush3.bf16.msra.mxu1 %v2695_v10  ;;  %v90_v10 = vsub.s32 5, %v3129_v41 }
  0x40   :  { %2469 = vmatprep.subr.bf16.mxu0 %v2696_v11  ;;  %2497 = vmatprep.subr.bf16.mxu1 %v2697_v12 }
  0x43   :  { %2470 = vmatpush3.bf16.msra.mxu0 %v2698_v13  ;;  %2498 = vmatpush3.bf16.msra.mxu1 %v2699_v14 }
  0x44   :  { %2471 = vmatprep.subr.bf16.mxu0 %v2700_v15  ;;  %2499 = vmatprep.subr.bf16.mxu1 %v2701_v16 }
  0x45   :  { %2333 = vmatmul.mubr.msk.bf16.gmra.mxu0 %vm308_vm0, %v2949_v42  ;;  %2335 = vmatmul.mubr.msk.bf16.gmra.mxu1 %vm308_vm0, %v2949_v42  ;;  %v74_v42 = vsub.s32 1, %v3129_v41 }
  0x47   :  { %2472 = vmatpush3.bf16.msra.mxu0 %v2702_v17  ;;  %2500 = vmatpush3.bf16.msra.mxu1 %v2703_v18  ;;  %v75_v49 = vrot.slane %v3137_v45, %v74_v42  ;;  %v2726_v18 = vld [vmem:[%s3622_s3 + $0x138] sm:$0xff]  }
  0x48   :  { %2473 = vmatprep.subr.bf16.mxu0 %v2704_v3  ;;  %2501 = vmatprep.subr.bf16.mxu1 %v2705_v19 }
  0x4b   :  { %2474 = vmatpush3.bf16.msra.mxu0 %v2706_v20  ;;  %2502 = vmatpush3.bf16.msra.mxu1 %v2707_v21 }
  0x4c   :  { %2475 = vmatprep.subr.bf16.mxu0 %v2708_v22  ;;  %2503 = vmatprep.subr.bf16.mxu1 %v2709_v23  ;;  %v2727_v23 = vld [vmem:[%s3622_s3 + $0x1b8] sm:$0xff]  }
  0x4f   :  { %2476 = vmatpush3.bf16.msra.mxu0 %v2710_v24  ;;  %2504 = vmatpush3.bf16.msra.mxu1 %v2711_v25  ;;  %v2728_v24 = vld [vmem:[%s3622_s3 + $0x170] sm:$0xff]  }
  0x50   :  { %2477 = vmatprep.subr.bf16.mxu0 %v2712_v26  ;;  %2505 = vmatprep.subr.bf16.mxu1 %v2713_v27  ;;  %v98_v27 = vsub.s32 7, %v3129_v41 }
  0x53   :  { %2478 = vmatpush3.bf16.msra.mxu0 %v2714_v28  ;;  %2506 = vmatpush3.bf16.msra.mxu1 %v2715_v29 }
  0x54   :  { %2479 = vmatprep.subr.bf16.mxu0 %v2716_v30  ;;  %2507 = vmatprep.subr.bf16.mxu1 %v2717_v31  ;;  %v2729_v30 = vld [vmem:[%s3622_s3 + $0x1f0] sm:$0xff]  }
  0x57   :  { %2480 = vmatpush3.bf16.msra.mxu0 %v2718_v32  ;;  %2508 = vmatpush3.bf16.msra.mxu1 %v2719_v33 }
  0x58   :  { %2481 = vmatprep.subr.bf16.mxu0 %v2720_v34  ;;  %2509 = vmatprep.subr.bf16.mxu1 %v2721_v35 }
  0x5b   :  { %2482 = vmatpush3.bf16.msra.mxu0 %v2722_v36  ;;  %2510 = vmatpush3.bf16.msra.mxu1 %v2723_v37  ;;  %v2730_v37 = vld [vmem:[%s3622_s3 + $0x130] sm:$0xff]  }
  0x5c   :  { %2523 = vmatprep.subr.bf16.mxu0 %v2724_v38  ;;  %2551 = vmatprep.subr.bf16.mxu1 %v2725_v39  ;;  %v3172_v39 = vrot.slane %v3137_v45, %v90_v10 }
  0xcd   :  { %v349_v47 = vpop.f32.mrf.mxu0  ;;  %v400_v48 = vpop.f32.mrf.mxu1 }
  0xce   :  { %v350_v59 = vadd.f32 %v349_v47, %v71_v50  ;;  %v401_v63 = vadd.f32 %v400_v48, %v79_v53  ;;  %v2732_v48 = vld [vmem:[%s3622_s3 + $0x168] sm:$0xff]  }
  0xcf   :  { %v351_v51 = vpop.f32.mrf.mxu0  ;;  %v402_v54 = vpop.f32.mrf.mxu1 }
  0xd0   :  { %v352_v56 = vadd.f32 %v351_v51, %v75_v49  ;;  %v403_v60 = vadd.f32 %v402_v54, %v83_v52  ;;  %v723_v11 = vmax.f32 %v350_v59, 0.0  ;;  %v725_v16 = vmax.f32 %v401_v63, 0.0  ;;  %v2733_v51 = vld [vmem:[%s3622_s3 + $0x1e8] sm:$0xff]   ;;  %v2737_v63 = vld [vmem:[%s3622_s3 + $0x1e0] sm:$0xff]  }
  0xd1   :  { %v353_v55 = vpop.f32.mrf.mxu0  ;;  %v404_v58 = vpop.f32.mrf.mxu1  ;;  %v2735_v59 = vld [vmem:[%s3622_s3 + $0x1a8] sm:$0xff]  }
  0xd2   :  { %v354_v57 = vadd.f32 %v353_v55, %v71_v50  ;;  %v405_v61 = vadd.f32 %v404_v58, %v79_v53  ;;  %v724_v6 = vmax.f32 %v352_v56, 0.0  ;;  %v726_v12 = vmax.f32 %v403_v60, 0.0  ;;  %v2734_v56 = vld [vmem:[%s3622_s3 + $0x128] sm:$0xff]   ;;  %v2736_v60 = vld [vmem:[%s3622_s3 + $0x160] sm:$0xff]  }
  0xd3   :  { %v355_v62 = vpop.f32.mrf.mxu0  ;;  %v406_v1 = vpop.f32.mrf.mxu1 }
  0xd4   :  { %v356_v0 = vadd.f32 %v355_v62, %v75_v49  ;;  %v739_v2 = vmax.f32 %v354_v57, 0.0  ;;  %v407_v4 = vadd.f32 %v406_v1, %v83_v52  ;;  %v741_v7 = vmax.f32 %v405_v61, 0.0 }
  0xd5   :  { %v359_v5 = vpop.f32.mrf.mxu0  ;;  %v410_v9 = vpop.f32.mrf.mxu1 }
  0xd6   :  { %v740_v8 = vmax.f32 %v356_v0, 0.0  ;;  %v742_v13 = vmax.f32 %v407_v4, 0.0  ;;  %v360_v14 = vadd.f32 %v359_v5, %v71_v50  ;;  %v411_v19 = vadd.f32 %v410_v9, %v79_v53 }
  0xd7   :  { %v361_v15 = vpop.f32.mrf.mxu0  ;;  %v412_v20 = vpop.f32.mrf.mxu1  ;;  %v771_v21 = vpack.c.bf16 %v739_v2, %v723_v11  ;;  %v773_v28 = vpack.c.bf16 %v741_v7, %v725_v16  ;;  %v3185_v50 = vrot.slane %v3137_v45, %v98_v27  ;;  %v2738_v2 = vld [vmem:[%s3622_s3 + $0x120] sm:$0xff]  }
  0xd8   :  { %v772_v17 = vpack.c.bf16 %v740_v8, %v724_v6  ;;  %v362_v3 = vadd.f32 %v361_v15, %v75_v49  ;;  %v774_v22 = vpack.c.bf16 %v742_v13, %v726_v12  ;;  %v413_v25 = vadd.f32 %v412_v20, %v83_v52  ;;  %v2739_v7 = vld [vmem:[%s3622_s3 + $0x1a0] sm:$0xff]   ;;  %v2740_v8 = vld [vmem:[%s3622_s3 + $0x158] sm:$0xff]  }
  0xd9   :  { %v363_v26 = vpop.f32.mrf.mxu0  ;;  %v414_v31 = vpop.f32.mrf.mxu1  ;;  %v755_v32 = vmax.f32 %v360_v14, 0.0  ;;  %v757_v36 = vmax.f32 %v411_v19, 0.0  ;;  %v2741_v13 = vld [vmem:[%s3622_s3 + $0x1d8] sm:$0xff]   ;;  %v86_v20 = vsub.s32 4, %v3129_v41 }
  0xda   :  { %1866 = vmatprep.mubr.bf16.mxu0 %v772_v17  ;;  %v756_v29 = vmax.f32 %v362_v3, 0.0  ;;  %1914 = vmatprep.mubr.bf16.mxu1 %v774_v22  ;;  %v758_v33 = vmax.f32 %v413_v25, 0.0  ;;  %v2744_v22 = vld [vmem:[%s3622_s3 + $0x150] sm:$0xff]   ;;  %v94_v25 = vsub.s32 6, %v3129_v41  ;;  %v2815_v41 = vld [vmem:[%s3622_s3 + $0x388] sm:$0xff]  }
  0xdb   :  { %1867 = vmatmul.mubr.bf16.vlgmr.msra.gmra.mxu0 %v771_v21  ;;  %v364_v34 = vpop.f32.mrf.mxu0  ;;  %1915 = vmatmul.mubr.bf16.vlgmr.msra.gmra.mxu1 %v773_v28  ;;  %v415_v38 = vpop.f32.mrf.mxu1  ;;  %v787_v53 = vpack.c.bf16 %v755_v32, %v755_v32  ;;  %v789_v55 = vpack.c.bf16 %v757_v36, %v757_v36  ;;  %v2743_v21 = vld [vmem:[%s3622_s3 + $0x198] sm:$0xff]   ;;  %v2745_v26 = vld [vmem:[%s3622_s3 + $0x1d0] sm:$0xff]   ;;  %v87_v32 = vrot.slane %v3137_v45, %v86_v20 }
  0xdc   :  { %2524 = vmatpush3.bf16.msra.mxu0 %v2726_v18  ;;  %v788_v35 = vpack.c.bf16 %v756_v29, %v756_v29  ;;  %2552 = vmatpush3.bf16.msra.mxu1 %v2727_v23  ;;  %v790_v47 = vpack.c.bf16 %v758_v33, %v758_v33  ;;  %v2742_v18 = vld [vmem:[%s3622_s3 + $0x118] sm:$0xff]   ;;  %v2747_v33 = vld [vmem:[%s3622_s3 + $0x190] sm:$0xff]   ;;  %v2748_v34 = vld [vmem:[%s3622_s3 + $0x148] sm:$0xff]   ;;  %v95_v36 = vrot.slane %v3137_v45, %v94_v25 }
  0xdd   :  { %2525 = vmatprep.subr.bf16.mxu0 %v2728_v24  ;;  %v3180_v49 = vpop.f32.mrf.mxu0  ;;  %2553 = vmatprep.subr.bf16.mxu1 %v2729_v30  ;;  %v3190_v52 = vpop.f32.mrf.mxu1  ;;  %v2746_v30 = vld [vmem:[%s3622_s3 + $0x110] sm:$0xff]   ;;  %v2751_v45 = vld [vmem:[%s3622_s3 + $0x188] sm:$0xff]  }
  0xde   :  { %1874 = vmatprep.mubr.bf16.mxu0 %v788_v35  ;;  %1922 = vmatprep.mubr.bf16.mxu1 %v790_v47  ;;  %v2750_v47 = vld [vmem:[%s3622_s3 + $0x108] sm:$0xff]  }
  0xdf   :  { %v453_v54 = vpop.f32.mrf.mxu0  ;;  %v504_v58 = vpop.f32.mrf.mxu1 }
  0xe0   :  { %2526 = vmatpush3.bf16.msra.mxu0 %v2730_v37  ;;  %v454_v57 = vadd.f32 %v453_v54, %v3172_v39  ;;  %2554 = vmatpush3.bf16.msra.mxu1 %v2731_v40  ;;  %v505_v62 = vadd.f32 %v504_v58, %v3185_v50  ;;  %v2749_v37 = vld [vmem:[%s3622_s3 + $0x1c8] sm:$0xff]   ;;  %v2752_v54 = vld [vmem:[%s3622_s3 + $0x140] sm:$0xff]  }
  0xe1   :  { %2527 = vmatprep.subr.bf16.mxu0 %v2732_v48  ;;  %v455_v61 = vpop.f32.mrf.mxu0  ;;  %2555 = vmatprep.subr.bf16.mxu1 %v2733_v51  ;;  %v3206_v0 = vpop.f32.mrf.mxu1  ;;  %v452_v51 = vadd.f32 %v3180_v49, %v87_v32  ;;  %v2753_v49 = vld [vmem:[%s3622_s3 + $0x1c0] sm:$0xff]  }
  0xe2   :  { %v728_v4 = vmax.f32 %v454_v57, 0.0  ;;  %v730_v9 = vmax.f32 %v505_v62, 0.0  ;;  %v507_v57 = vadd.f32 %v3206_v0, %v95_v36 }
  0xe3   :  { %1875 = vmatmul.mubr.bf16.gmra.mxu0 %v787_v53  ;;  %v457_v1 = vpop.f32.mrf.mxu0  ;;  %1923 = vmatmul.mubr.bf16.gmra.mxu1 %v789_v55  ;;  %v508_v6 = vpop.f32.mrf.mxu1  ;;  %v456_v53 = vadd.f32 %v455_v61, %v87_v32  ;;  %v3286_v61 = vld [vmem:[%s3623_s2 + $0x8] sm:$0xff]  ;;  %v727_v0 = vmax.f32 %v452_v51, 0.0 }
  0xe4   :  { %2528 = vmatpush3.bf16.msra.mxu0 %v2734_v56  ;;  %v458_v5 = vadd.f32 %v457_v1, %v3172_v39  ;;  %2556 = vmatpush3.bf16.msra.mxu1 %v2735_v59  ;;  %v509_v11 = vadd.f32 %v508_v6, %v3185_v50  ;;  %v503_v56 = vadd.f32 %v3190_v52, %v95_v36  ;;  %v2754_v52 = vld [vmem:[%s3622_s3 + $0x100] sm:$0xff]  }
  0xe5   :  { %2529 = vmatprep.subr.bf16.mxu0 %v2736_v60  ;;  %v3219_v12 = vpop.f32.mrf.mxu0  ;;  %2557 = vmatprep.subr.bf16.mxu1 %v2737_v63  ;;  %v3224_v15 = vpop.f32.mrf.mxu1  ;;  %v743_v1 = vmax.f32 %v456_v53, 0.0 }
  0xe6   :  { %v744_v14 = vmax.f32 %v458_v5, 0.0  ;;  %v746_v16 = vmax.f32 %v509_v11, 0.0  ;;  %v745_v5 = vmax.f32 %v507_v57, 0.0  ;;  %v462_v11 = vadd.f32 %v3219_v12, %v87_v32  ;;  %v2759_v12 = vld [vmem:[%s3622_s3 + $0x2b8] sm:$0xff]  }
  0xe7   :  { %v463_v17 = vpop.f32.mrf.mxu0  ;;  %v514_v19 = vpop.f32.mrf.mxu1 }
  0xe8   :  { %2530 = vmatpush3.bf16.msra.mxu0 %v2738_v2  ;;  %v776_v3 = vpack.c.bf16 %v744_v14, %v728_v4  ;;  %2558 = vmatpush3.bf16.msra.mxu1 %v2739_v7  ;;  %v778_v23 = vpack.c.bf16 %v746_v16, %v730_v9  ;;  %v464_v58 = vadd.f32 %v463_v17, %v3172_v39  ;;  %v2755_v39 = vld [vmem:[%s3622_s3 + $0x180] sm:$0xff]   ;;  %v729_v4 = vmax.f32 %v503_v56, 0.0  ;;  %v2757_v7 = vld [vmem:[%s3622_s3 + $0x2f8] sm:$0xff]  }
  0xe9   :  { %2531 = vmatprep.subr.bf16.mxu0 %v2740_v8  ;;  %v465_v24 = vpop.f32.mrf.mxu0  ;;  %2559 = vmatprep.subr.bf16.mxu1 %v2741_v13  ;;  %v516_v28 = vpop.f32.mrf.mxu1  ;;  %v515_v60 = vadd.f32 %v514_v19, %v3185_v50  ;;  %v2756_v50 = vld [vmem:[%s3622_s3 + $0x278] sm:$0xff]   ;;  %v3305_v8 = vrot.slane %v3286_v61, %v74_v42  ;;  %v3313_v14 = vrot.slane %v3286_v61, %v82_v44  ;;  %v2760_v44 = vld [vmem:[%s3622_s3 + $0x270] sm:$0xff]  }
  0xea   :  { %1962 = vmatprep.mubr.bf16.mxu0 %v776_v3  ;;  %2010 = vmatprep.mubr.bf16.mxu1 %v778_v23  ;;  %v760_v6 = vmax.f32 %v464_v58, 0.0  ;;  %v513_v17 = vadd.f32 %v3224_v15, %v95_v36  ;;  %v2758_v42 = vld [vmem:[%s3622_s3 + $0x238] sm:$0xff]   ;;  %v775_v3 = vpack.c.bf16 %v743_v1, %v727_v0  ;;  %v759_v28 = vmax.f32 %v462_v11, 0.0  ;;  %v2769_v1 = vld [vmem:[%s3622_s3 + $0x2e0] sm:$0xff]  }
  0xeb   :  { %v466_v29 = vpop.f32.mrf.mxu0  ;;  %v517_v31 = vpop.f32.mrf.mxu1  ;;  %v762_v13 = vmax.f32 %v515_v60, 0.0  ;;  %v2766_v60 = vld [vmem:[%s3622_s3 + $0x228] sm:$0xff]   ;;  %v2771_v11 = vld [vmem:[%s3622_s3 + $0x2a0] sm:$0xff]  }
  0xec   :  { %2532 = vmatpush3.bf16.msra.mxu0 %v2742_v18  ;;  %2560 = vmatpush3.bf16.msra.mxu1 %v2743_v21  ;;  %v777_v21 = vpack.c.bf16 %v745_v5, %v729_v4  ;;  %v792_v15 = vpack.c.bf16 %v760_v6, %v760_v6  ;;  %v2770_v6 = vld [vmem:[%s3622_s3 + $0x220] sm:$0xff]  }
  0xed   :  { %2533 = vmatprep.subr.bf16.mxu0 %v2744_v22  ;;  %v3252_v35 = vpop.f32.mrf.mxu0  ;;  %2561 = vmatprep.subr.bf16.mxu1 %v2745_v26  ;;  %v3260_v38 = vpop.f32.mrf.mxu1  ;;  %v2761_v22 = vld [vmem:[%s3622_s3 + $0x2f0] sm:$0xff]   ;;  %v794_v29 = vpack.c.bf16 %v762_v13, %v762_v13  ;;  %v2772_v13 = vld [vmem:[%s3622_s3 + $0x258] sm:$0xff]  }
  0xef   :  { %v555_v40 = vpop.f32.mrf.mxu0  ;;  %v606_v48 = vpop.f32.mrf.mxu1 }
  0xf0   :  { %2534 = vmatpush3.bf16.msra.mxu0 %v2746_v30  ;;  %2562 = vmatpush3.bf16.msra.mxu1 %v2747_v33  ;;  %v556_v23 = vadd.f32 %v555_v40, %v3305_v8  ;;  %v607_v30 = vadd.f32 %v606_v48, %v3313_v14  ;;  %v761_v33 = vmax.f32 %v513_v17, 0.0  ;;  %v2764_v40 = vld [vmem:[%s3622_s3 + $0x268] sm:$0xff]  }
  0xf1   :  { %2535 = vmatprep.subr.bf16.mxu0 %v2748_v34  ;;  %v3272_v55 = vpop.f32.mrf.mxu0  ;;  %2563 = vmatprep.subr.bf16.mxu1 %v2749_v37  ;;  %v3280_v59 = vpop.f32.mrf.mxu1  ;;  %v2762_v34 = vld [vmem:[%s3622_s3 + $0x230] sm:$0xff]   ;;  %v2765_v48 = vld [vmem:[%s3622_s3 + $0x2e8] sm:$0xff]  }
  0xf2   :  { %v2763_v37 = vld [vmem:[%s3622_s3 + $0x2b0] sm:$0xff]   ;;  %v732_v51 = vmax.f32 %v556_v23, 0.0  ;;  %v734_v56 = vmax.f32 %v607_v30, 0.0  ;;  %v793_v58 = vpack.c.bf16 %v761_v33, %v761_v33  ;;  %v103_v30 = vrot.slane %v3286_v61, %v70_v43  ;;  %v2782_v43 = vld [vmem:[%s3622_s3 + $0x208] sm:$0xff]  }
  0xf3   :  { %v559_v62 = vpop.f32.mrf.mxu0  ;;  %v610_v63 = vpop.f32.mrf.mxu1  ;;  %v2777_v23 = vld [vmem:[%s3622_s3 + $0x2d0] sm:$0xff]   ;;  %v111_v33 = vrot.slane %v3286_v61, %v78_v46  ;;  %v2783_v46 = vld [vmem:[%s3622_s3 + $0x288] sm:$0xff]  }
  0xf4   :  { %2536 = vmatpush3.bf16.msra.mxu0 %v2750_v47  ;;  %2564 = vmatpush3.bf16.msra.mxu1 %v2751_v45  ;;  %v560_v24 = vadd.f32 %v559_v62, %v3305_v8  ;;  %v611_v31 = vadd.f32 %v610_v63, %v3313_v14  ;;  %v2768_v63 = vld [vmem:[%s3622_s3 + $0x260] sm:$0xff]  }
  0xf5   :  { %2537 = vmatprep.subr.bf16.mxu0 %v2752_v54  ;;  %v3297_v2 = vpop.f32.mrf.mxu0  ;;  %2565 = vmatprep.subr.bf16.mxu1 %v2753_v49  ;;  %v3307_v9 = vpop.f32.mrf.mxu1  ;;  %v791_v54 = vpack.c.bf16 %v759_v28, %v759_v28  ;;  %v2778_v28 = vld [vmem:[%s3622_s3 + $0x210] sm:$0xff]  }
  0xf6   :  { %v748_v53 = vmax.f32 %v560_v24, 0.0  ;;  %v750_v57 = vmax.f32 %v611_v31, 0.0  ;;  %v2779_v31 = vld [vmem:[%s3622_s3 + $0x290] sm:$0xff]  }
  0xf7   :  { %v3315_v16 = vpop.f32.mrf.mxu0  ;;  %v3321_v18 = vpop.f32.mrf.mxu1 }
  0xf8   :  { %2538 = vmatpush3.bf16.msra.mxu0 %v2754_v52  ;;  %2566 = vmatpush3.bf16.msra.mxu1 %v2755_v39  ;;  %v2767_v52 = vld [vmem:[%s3622_s3 + $0x2a8] sm:$0xff]   ;;  %v780_v39 = vpack.c.bf16 %v748_v53, %v732_v51  ;;  %v782_v4 = vpack.c.bf16 %v750_v57, %v734_v56  ;;  %v609_v51 = vadd.f32 %v3280_v59, %v111_v33  ;;  %v2787_v59 = vld [vmem:[%s3622_s3 + $0x280] sm:$0xff]  }
  0xf9   :  { %2579 = vmatprep.subr.bf16.mxu0 %v2756_v50  ;;  %v567_v19 = vpop.f32.mrf.mxu0  ;;  %2607 = vmatprep.subr.bf16.mxu1 %v2757_v7  ;;  %v618_v26 = vpop.f32.mrf.mxu1  ;;  %v617_v53 = vadd.f32 %v3321_v18, %v3313_v14  ;;  %v2789_v18 = vld [vmem:[%s3622_s3 + $0x3f8] sm:$0xff]  }
  0xfa   :  { %v749_v57 = vmax.f32 %v609_v51, 0.0  ;;  %v2806_v51 = vld [vmem:[%s3622_s3 + $0x318] sm:$0xff]  }
  0xfb   :  { %1963 = vmatmul.mubr.bf16.vlgmr.msra.gmra.mxu0 %v775_v3  ;;  %v568_v32 = vpop.f32.mrf.mxu0  ;;  %2011 = vmatmul.mubr.bf16.vlgmr.msra.gmra.mxu1 %v777_v21  ;;  %v619_v36 = vpop.f32.mrf.mxu1  ;;  %v2775_v21 = vld [vmem:[%s3622_s3 + $0x298] sm:$0xff]  }
  0xfc   :  { %2580 = vmatpush3.bf16.msra.mxu0 %v2758_v42  ;;  %2608 = vmatpush3.bf16.msra.mxu1 %v2759_v12  ;;  %v2773_v42 = vld [vmem:[%s3622_s3 + $0x2d8] sm:$0xff]   ;;  %v2780_v32 = vld [vmem:[%s3622_s3 + $0x248] sm:$0xff]   ;;  %v554_v36 = vadd.f32 %v3252_v35, %v103_v30  ;;  %v2785_v35 = vld [vmem:[%s3622_s3 + $0x2c0] sm:$0xff]  }
  0xfd   :  { %2581 = vmatprep.subr.bf16.mxu0 %v2760_v44  ;;  %v3345_v47 = vpop.f32.mrf.mxu0  ;;  %2609 = vmatprep.subr.bf16.mxu1 %v2761_v22  ;;  %v3350_v45 = vpop.f32.mrf.mxu1  ;;  %v2774_v44 = vld [vmem:[%s3622_s3 + $0x218] sm:$0xff]  }
  0xfe   :  { %1970 = vmatprep.mubr.bf16.mxu0 %v792_v15  ;;  %2018 = vmatprep.mubr.bf16.mxu1 %v794_v29  ;;  %v2776_v15 = vld [vmem:[%s3622_s3 + $0x250] sm:$0xff]   ;;  %v731_v56 = vmax.f32 %v554_v36, 0.0 }
  0xff   :  { %v3352_v49 = vpop.f32.mrf.mxu0  ;;  %v3357_v62 = vpop.f32.mrf.mxu1 }
 0x100   :  { %2582 = vmatpush3.bf16.msra.mxu0 %v2762_v34  ;;  %2610 = vmatpush3.bf16.msra.mxu1 %v2763_v37  ;;  %v2781_v34 = vld [vmem:[%s3622_s3 + $0x2c8] sm:$0xff]   ;;  %v558_v37 = vadd.f32 %v3272_v55, %v103_v30  ;;  %v566_v55 = vadd.f32 %v3315_v16, %v3305_v8  ;;  %v2788_v8 = vld [vmem:[%s3622_s3 + $0x378] sm:$0xff]  }
 0x101   :  { %2583 = vmatprep.subr.bf16.mxu0 %v2764_v40  ;;  %v3365_v0 = vpop.f32.mrf.mxu0  ;;  %2611 = vmatprep.subr.bf16.mxu1 %v2765_v48  ;;  %v3370_v50 = vpop.f32.mrf.mxu1  ;;  %v2784_v40 = vld [vmem:[%s3622_s3 + $0x240] sm:$0xff]   ;;  %v605_v48 = vadd.f32 %v3260_v38, %v111_v33 }
 0x102   :  { %v747_v38 = vmax.f32 %v558_v37, 0.0  ;;  %v764_v14 = vmax.f32 %v566_v55, 0.0  ;;  %v2802_v37 = vld [vmem:[%s3622_s3 + $0x320] sm:$0xff]   ;;  %v2808_v55 = vld [vmem:[%s3622_s3 + $0x350] sm:$0xff]  }
 0x103   :  { %1971 = vmatmul.mubr.bf16.gmra.mxu0 %v791_v54  ;;  %v3372_v5 = vpop.f32.mrf.mxu0  ;;  %2019 = vmatmul.mubr.bf16.gmra.mxu1 %v793_v58  ;;  %v3377_v7 = vpop.f32.mrf.mxu1  ;;  %v2786_v54 = vld [vmem:[%s3622_s3 + $0x200] sm:$0xff]   ;;  %v733_v16 = vmax.f32 %v605_v48, 0.0  ;;  %v3461_v58 = vrot.slane %v3286_v61, %v90_v10  ;;  %v2791_v10 = vld [vmem:[%s3622_s3 + $0x3b8] sm:$0xff]  }
 0x104   :  { %2584 = vmatpush3.bf16.msra.mxu0 %v2766_v60  ;;  %2612 = vmatpush3.bf16.msra.mxu1 %v2767_v52  ;;  %v564_v60 = vadd.f32 %v3297_v2, %v103_v30  ;;  %v766_v52 = vmax.f32 %v617_v53, 0.0  ;;  %v2792_v2 = vld [vmem:[%s3622_s3 + $0x370] sm:$0xff]   ;;  %v2805_v48 = vld [vmem:[%s3622_s3 + $0x3d8] sm:$0xff]  }
 0x105   :  { %2585 = vmatprep.subr.bf16.mxu0 %v2768_v63  ;;  %v3385_v17 = vpop.f32.mrf.mxu0  ;;  %2613 = vmatprep.subr.bf16.mxu1 %v2769_v1  ;;  %v3390_v3 = vpop.f32.mrf.mxu1  ;;  %v3467_v63 = vrot.slane %v3286_v61, %v98_v27  ;;  %v615_v1 = vadd.f32 %v3307_v9, %v111_v33  ;;  %v781_v27 = vpack.c.bf16 %v749_v57, %v733_v16  ;;  %v2793_v9 = vld [vmem:[%s3622_s3 + $0x3f0] sm:$0xff]   ;;  %v2800_v33 = vld [vmem:[%s3622_s3 + $0x360] sm:$0xff]   ;;  %v2813_v16 = vld [vmem:[%s3622_s3 + $0x3c8] sm:$0xff]  }
 0x106   :  { %2058 = vmatprep.mubr.bf16.mxu0 %v780_v39  ;;  %2106 = vmatprep.mubr.bf16.mxu1 %v782_v4  ;;  %v2790_v39 = vld [vmem:[%s3622_s3 + $0x338] sm:$0xff]   ;;  %v779_v4 = vpack.c.bf16 %v747_v38, %v731_v56  ;;  %v2809_v53 = vld [vmem:[%s3622_s3 + $0x3d0] sm:$0xff]   ;;  %v119_v56 = vrot.slane %v3286_v61, %v86_v20  ;;  %v2814_v20 = vld [vmem:[%s3622_s3 + $0x308] sm:$0xff]  }
 0x107   :  { %v3392_v12 = vpop.f32.mrf.mxu0  ;;  %v3397_v19 = vpop.f32.mrf.mxu1  ;;  %v2811_v38 = vld [vmem:[%s3622_s3 + $0x390] sm:$0xff]  }
 0x108   :  { %2586 = vmatpush3.bf16.msra.mxu0 %v2770_v6  ;;  %2614 = vmatpush3.bf16.msra.mxu1 %v2771_v11  ;;  %v796_v6 = vpack.c.bf16 %v764_v14, %v764_v14  ;;  %v658_v11 = vadd.f32 %v3352_v49, %v3461_v58  ;;  %v2795_v49 = vld [vmem:[%s3622_s3 + $0x3b0] sm:$0xff]   ;;  %v668_v57 = vadd.f32 %v3392_v12, %v3461_v58 }
 0x109   :  { %2587 = vmatprep.subr.bf16.mxu0 %v2772_v13  ;;  %v669_v22 = vpop.f32.mrf.mxu0  ;;  %2615 = vmatprep.subr.bf16.mxu1 %v2773_v42  ;;  %v720_v24 = vpop.f32.mrf.mxu1  ;;  %v662_v13 = vadd.f32 %v3372_v5, %v3461_v58  ;;  %v763_v42 = vmax.f32 %v564_v60, 0.0  ;;  %v2797_v5 = vld [vmem:[%s3622_s3 + $0x3e8] sm:$0xff]   ;;  %v656_v14 = vadd.f32 %v3345_v47, %v119_v56  ;;  %v2817_v47 = vld [vmem:[%s3622_s3 + $0x3c0] sm:$0xff]  }
 0x10a   :  { %v765_v22 = vmax.f32 %v615_v1, 0.0  ;;  %v2818_v58 = vld [vmem:[%s3622_s3 + $0x300] sm:$0xff]  }
 0x10b   :  { %v670_v26 = vpop.f32.mrf.mxu0  ;;  %v721_v29 = vpop.f32.mrf.mxu1  ;;  %v752_v24 = vmax.f32 %v662_v13, 0.0 }
 0x10c   :  { %2588 = vmatpush3.bf16.msra.mxu0 %v2774_v44  ;;  %2616 = vmatpush3.bf16.msra.mxu1 %v2775_v21  ;;  %v798_v44 = vpack.c.bf16 %v766_v52, %v766_v52  ;;  %v709_v21 = vadd.f32 %v3357_v62, %v3467_v63  ;;  %v2796_v62 = vld [vmem:[%s3622_s3 + $0x368] sm:$0xff]   ;;  %v795_v26 = vpack.c.bf16 %v763_v42, %v763_v42 }
 0x10d   :  { %2589 = vmatprep.subr.bf16.mxu0 %v2776_v15  ;;  %2617 = vmatprep.subr.bf16.mxu1 %v2777_v23  ;;  %v713_v15 = vadd.f32 %v3377_v7, %v3467_v63  ;;  %v2794_v23 = vld [vmem:[%s3622_s3 + $0x330] sm:$0xff]   ;;  %v736_v7 = vmax.f32 %v658_v11, 0.0  ;;  %v797_v30 = vpack.c.bf16 %v765_v22, %v765_v22 }
 0x10f   :  { %v754_v29 = vmax.f32 %v713_v15, 0.0 }
 0x110   :  { %2590 = vmatpush3.bf16.msra.mxu0 %v2778_v28  ;;  %2618 = vmatpush3.bf16.msra.mxu1 %v2779_v31  ;;  %v738_v28 = vmax.f32 %v709_v21, 0.0  ;;  %v2798_v31 = vld [vmem:[%s3622_s3 + $0x328] sm:$0xff]  }
 0x111   :  { %2591 = vmatprep.subr.bf16.mxu0 %v2780_v32  ;;  %2619 = vmatprep.subr.bf16.mxu1 %v2781_v34  ;;  %v2799_v32 = vld [vmem:[%s3622_s3 + $0x3a8] sm:$0xff]   ;;  %v2801_v34 = vld [vmem:[%s3622_s3 + $0x3e0] sm:$0xff]  }
 0x112   :  { %v786_v36 = vpack.c.bf16 %v754_v29, %v738_v28 }
 0x114   :  { %2592 = vmatpush3.bf16.msra.mxu0 %v2782_v43  ;;  %2620 = vmatpush3.bf16.msra.mxu1 %v2783_v46  ;;  %v784_v43 = vpack.c.bf16 %v752_v24, %v736_v7  ;;  %v2803_v46 = vld [vmem:[%s3622_s3 + $0x3a0] sm:$0xff]  }
 0x115   :  { %2593 = vmatprep.subr.bf16.mxu0 %v2784_v40  ;;  %2621 = vmatprep.subr.bf16.mxu1 %v2785_v35  ;;  %v2804_v40 = vld [vmem:[%s3622_s3 + $0x358] sm:$0xff]  }
 0x116   :  { %v2807_v35 = vld [vmem:[%s3622_s3 + $0x398] sm:$0xff]  }
 0x118   :  { %2594 = vmatpush3.bf16.msra.mxu0 %v2786_v54  ;;  %2622 = vmatpush3.bf16.msra.mxu1 %v2787_v59  ;;  %v2810_v54 = vld [vmem:[%s3622_s3 + $0x310] sm:$0xff]   ;;  %v2812_v59 = vld [vmem:[%s3622_s3 + $0x348] sm:$0xff]  }
 0x119   :  { %2635 = vmatprep.subr.bf16.mxu0 %v2788_v8  ;;  %2663 = vmatprep.subr.bf16.mxu1 %v2789_v18  ;;  %v127_v8 = vrot.slane %v3286_v61, %v94_v25  ;;  %v660_v18 = vadd.f32 %v3365_v0, %v119_v56  ;;  %v719_v25 = vadd.f32 %v3397_v19, %v3467_v63  ;;  %v2816_v61 = vld [vmem:[%s3622_s3 + $0x340] sm:$0xff]   ;;  %v768_v0 = vmax.f32 %v668_v57, 0.0 }
 0x11a   :  { %v735_v19 = vmax.f32 %v656_v14, 0.0 }
 0x11b   :  { %2059 = vmatmul.mubr.bf16.vlgmr.msra.gmra.mxu0 %v779_v4  ;;  %2107 = vmatmul.mubr.bf16.vlgmr.msra.gmra.mxu1 %v781_v27  ;;  %v707_v60 = vadd.f32 %v3350_v45, %v127_v8  ;;  %v711_v12 = vadd.f32 %v3370_v50, %v127_v8  ;;  %v751_v52 = vmax.f32 %v660_v18, 0.0  ;;  %v770_v63 = vmax.f32 %v719_v25, 0.0  ;;  %v2819_v45 = vld [vmem:[%s3622_s3 + $0x380] sm:$0xff]  }
 0x11c   :  { %2636 = vmatpush3.bf16.msra.mxu0 %v2790_v39  ;;  %2664 = vmatpush3.bf16.msra.mxu1 %v2791_v10  ;;  %v800_v39 = vpack.c.bf16 %v768_v0, %v768_v0  ;;  %v717_v4 = vadd.f32 %v3390_v3, %v127_v8  ;;  %v2336_v3 = vld [vmem:[%s3624_s4] ss:$0 sm:$0xff] }
 0x11d   :  { %2637 = vmatprep.subr.bf16.mxu0 %v2792_v2  ;;  %2665 = vmatprep.subr.bf16.mxu1 %v2793_v9  ;;  %v737_v50 = vmax.f32 %v707_v60, 0.0  ;;  %v753_v1 = vmax.f32 %v711_v12, 0.0  ;;  %v783_v10 = vpack.c.bf16 %v751_v52, %v735_v19  ;;  %v666_v2 = vadd.f32 %v3385_v17, %v119_v56 }
 0x11e   :  { %2066 = vmatprep.mubr.bf16.mxu0 %v796_v6  ;;  %2114 = vmatprep.mubr.bf16.mxu1 %v798_v44  ;;  %v802_v27 = vpack.c.bf16 %v770_v63, %v770_v63  ;;  %v769_v9 = vmax.f32 %v717_v4, 0.0 }
 0x11f   :  { %v785_v6 = vpack.c.bf16 %v753_v1, %v737_v50  ;;  %v767_v11 = vmax.f32 %v666_v2, 0.0 }
 0x120   :  { %2638 = vmatpush3.bf16.msra.mxu0 %v2794_v23  ;;  %2666 = vmatpush3.bf16.msra.mxu1 %v2795_v49  ;;  %v801_v13 = vpack.c.bf16 %v769_v9, %v769_v9 }
 0x121   :  { %2639 = vmatprep.subr.bf16.mxu0 %v2796_v62  ;;  %2667 = vmatprep.subr.bf16.mxu1 %v2797_v5  ;;  %v799_v42 = vpack.c.bf16 %v767_v11, %v767_v11 }
 0x123   :  { %2067 = vmatmul.mubr.bf16.gmra.mxu0 %v795_v26  ;;  %2115 = vmatmul.mubr.bf16.gmra.mxu1 %v797_v30 }
 0x124   :  { %2640 = vmatpush3.bf16.msra.mxu0 %v2798_v31  ;;  %2668 = vmatpush3.bf16.msra.mxu1 %v2799_v32 }
 0x125   :  { %2641 = vmatprep.subr.bf16.mxu0 %v2800_v33  ;;  %2669 = vmatprep.subr.bf16.mxu1 %v2801_v34 }
 0x126   :  { %2154 = vmatprep.mubr.bf16.mxu0 %v784_v43  ;;  %2202 = vmatprep.mubr.bf16.mxu1 %v786_v36 }
 0x128   :  { %2642 = vmatpush3.bf16.msra.mxu0 %v2802_v37  ;;  %2670 = vmatpush3.bf16.msra.mxu1 %v2803_v46 }
 0x129   :  { %2643 = vmatprep.subr.bf16.mxu0 %v2804_v40  ;;  %2671 = vmatprep.subr.bf16.mxu1 %v2805_v48 }
 0x12c   :  { %2644 = vmatpush3.bf16.msra.mxu0 %v2806_v51  ;;  %2672 = vmatpush3.bf16.msra.mxu1 %v2807_v35 }
 0x12d   :  { %2645 = vmatprep.subr.bf16.mxu0 %v2808_v55  ;;  %2673 = vmatprep.subr.bf16.mxu1 %v2809_v53 }
 0x130   :  { %2646 = vmatpush3.bf16.msra.mxu0 %v2810_v54  ;;  %2674 = vmatpush3.bf16.msra.mxu1 %v2811_v38 }
 0x131   :  { %2647 = vmatprep.subr.bf16.mxu0 %v2812_v59  ;;  %2675 = vmatprep.subr.bf16.mxu1 %v2813_v16 }
 0x134   :  { %2648 = vmatpush3.bf16.msra.mxu0 %v2814_v20  ;;  %2676 = vmatpush3.bf16.msra.mxu1 %v2815_v41 }
 0x135   :  { %2649 = vmatprep.subr.bf16.mxu0 %v2816_v61  ;;  %2677 = vmatprep.subr.bf16.mxu1 %v2817_v47 }
 0x138   :  { %2650 = vmatpush3.bf16.msra.mxu0 %v2818_v58  ;;  %2678 = vmatpush3.bf16.msra.mxu1 %v2819_v45 }
 0x13b   :  { %2155 = vmatmul.mubr.bf16.vlgmr.msra.gmra.mxu0 %v783_v10  ;;  %2203 = vmatmul.mubr.bf16.vlgmr.msra.gmra.mxu1 %v785_v6 }
 0x13c   :  { %2162 = vmatprep.mubr.bf16.mxu0 %v800_v39  ;;  %2210 = vmatprep.mubr.bf16.mxu1 %v802_v27 }
 0x143   :  { %2163 = vmatmul.mubr.bf16.gmra.mxu0 %v799_v42  ;;  %2211 = vmatmul.mubr.bf16.gmra.mxu1 %v801_v13 }
 0x19b   :  { %v2483_v44 = vpop.f32.mrf.mxu0  ;;  %v2511_v21 = vpop.f32.mrf.mxu1 }
 0x19d   :  { %v2484_v17 = vpop.f32.mrf.mxu0  ;;  %v2512_v22 = vpop.f32.mrf.mxu1 }
 0x19e   :  { %v2485_v15 = vadd.f32 %v2484_v17, %v2483_v44  ;;  %v2513_v23 = vadd.f32 %v2512_v22, %v2511_v21 }
 0x19f   :  { %v2486_v49 = vpop.f32.mrf.mxu0  ;;  %v2514_v5 = vpop.f32.mrf.mxu1 }
 0x1a0   :  { %v1869_v62 = vadd.f32 %v2485_v15, %v2336_v3 }
 0x1a1   :  { %v2487_v7 = vpop.f32.mrf.mxu0  ;;  %v2515_v28 = vpop.f32.mrf.mxu1 }
 0x1a2   :  { %v1917_v24 = vadd.f32 %v2513_v23, %v1869_v62  ;;  %v2488_v26 = vadd.f32 %v2487_v7, %v2486_v49  ;;  %v2516_v29 = vadd.f32 %v2515_v28, %v2514_v5 }
 0x1a3   :  { %v2489_v30 = vpop.f32.mrf.mxu0  ;;  %v2517_v32 = vpop.f32.mrf.mxu1 }
 0x1a4   :  { %v1872_v31 = vadd.f32 %v2488_v26, %v2336_v3 }
 0x1a5   :  { %v2490_v33 = vpop.f32.mrf.mxu0  ;;  %v2518_v36 = vpop.f32.mrf.mxu1 }
 0x1a6   :  { %v1920_v34 = vadd.f32 %v2516_v29, %v1872_v31  ;;  %v2491_v43 = vadd.f32 %v2490_v33, %v2489_v30  ;;  %v2519_v46 = vadd.f32 %v2518_v36, %v2517_v32 }
 0x1a7   :  { %v2492_v37 = vpop.f32.mrf.mxu0  ;;  %v2520_v48 = vpop.f32.mrf.mxu1 }
 0x1a8   :  { %v1877_v40 = vadd.f32 %v2491_v43, %v2336_v3 }
 0x1a9   :  { %v2493_v51 = vpop.f32.mrf.mxu0  ;;  %v2521_v55 = vpop.f32.mrf.mxu1 }
 0x1aa   :  { %v1925_v35 = vadd.f32 %v2519_v46, %v1877_v40 }
 0x1bb   :  { %v2539_v53 = vpop.f32.mrf.mxu0  ;;  %v2567_v54 = vpop.f32.mrf.mxu1 }
 0x1bd   :  { %v2540_v56 = vpop.f32.mrf.mxu0  ;;  %v2568_v38 = vpop.f32.mrf.mxu1 }
 0x1be   :  { %v2541_v11 = vadd.f32 %v2540_v56, %v2539_v53  ;;  %v2569_v44 = vadd.f32 %v2568_v38, %v2567_v54 }
 0x1bf   :  { %v2542_v59 = vpop.f32.mrf.mxu0  ;;  %v2570_v8 = vpop.f32.mrf.mxu1 }
 0x1c0   :  { %v1965_v42 = vadd.f32 %v2541_v11, %v1917_v24 }
 0x1c1   :  { %v2543_v16 = vpop.f32.mrf.mxu0  ;;  %v2571_v20 = vpop.f32.mrf.mxu1 }
 0x1c2   :  { %v2544_v13 = vadd.f32 %v2543_v16, %v2542_v59  ;;  %v2013_v17 = vadd.f32 %v2569_v44, %v1965_v42  ;;  %v2572_v22 = vadd.f32 %v2571_v20, %v2570_v8 }
 0x1c3   :  { %v2545_v57 = vpop.f32.mrf.mxu0  ;;  %v2573_v14 = vpop.f32.mrf.mxu1 }
 0x1c4   :  { %v1968_v3 = vadd.f32 %v2544_v13, %v1920_v34 }
 0x1c5   :  { %v2546_v18 = vpop.f32.mrf.mxu0  ;;  %v2574_v41 = vpop.f32.mrf.mxu1 }
 0x1c6   :  { %v2547_v15 = vadd.f32 %v2546_v18, %v2545_v57  ;;  %v2016_v62 = vadd.f32 %v2572_v22, %v1968_v3  ;;  %v2575_v26 = vadd.f32 %v2574_v41, %v2573_v14  ;;  %v2826_v57 = vld [vmem:[%s3621_s0] sm:$0xff] }
 0x1c7   :  { %v2548_v25 = vpop.f32.mrf.mxu0  ;;  %v2576_v61 = vpop.f32.mrf.mxu1 }
 0x1c8   :  { %v1973_v7 = vadd.f32 %v2547_v15, %v1925_v35 }
 0x1c9   :  { %v2549_v60 = vpop.f32.mrf.mxu0  ;;  %v2577_v12 = vpop.f32.mrf.mxu1 }
 0x1ca   :  { %v2021_v34 = vadd.f32 %v2575_v26, %v1973_v7 }
 0x1db   :  { %v2595_v47 = vpop.f32.mrf.mxu0  ;;  %v2623_v0 = vpop.f32.mrf.mxu1 }
 0x1dd   :  { %v2596_v58 = vpop.f32.mrf.mxu0  ;;  %v2624_v19 = vpop.f32.mrf.mxu1 }
 0x1de   :  { %v2597_v21 = vadd.f32 %v2596_v58, %v2595_v47  ;;  %v2625_v28 = vadd.f32 %v2624_v19, %v2623_v0 }
 0x1df   :  { %v2598_v52 = vpop.f32.mrf.mxu0  ;;  %v2626_v63 = vpop.f32.mrf.mxu1 }
 0x1e0   :  { %v2061_v49 = vadd.f32 %v2597_v21, %v2013_v17 }
 0x1e1   :  { %v2599_v45 = vpop.f32.mrf.mxu0  ;;  %v2627_v50 = vpop.f32.mrf.mxu1 }
 0x1e2   :  { %v2600_v23 = vadd.f32 %v2599_v45, %v2598_v52  ;;  %v2109_v32 = vadd.f32 %v2625_v28, %v2061_v49  ;;  %v2628_v36 = vadd.f32 %v2627_v50, %v2626_v63  ;;  %v2827_v52 = vld [vmem:[%s3621_s0 + $0x8] sm:$0xff] }
 0x1e3   :  { %v2601_v1 = vpop.f32.mrf.mxu0  ;;  %v2629_v39 = vpop.f32.mrf.mxu1 }
 0x1e4   :  { %v2064_v30 = vadd.f32 %v2600_v23, %v2016_v62 }
 0x1e5   :  { %v2602_v4 = vpop.f32.mrf.mxu0  ;;  %v2630_v10 = vpop.f32.mrf.mxu1 }
 0x1e6   :  { %v2603_v33 = vadd.f32 %v2602_v4, %v2601_v1  ;;  %v2112_v51 = vadd.f32 %v2628_v36, %v2064_v30  ;;  %v2631_v54 = vadd.f32 %v2630_v10, %v2629_v39  ;;  %v2828_v4 = vld [vmem:[%s3621_s0 + $0x10] sm:$0xff] }
 0x1e7   :  { %v2604_v2 = vpop.f32.mrf.mxu0  ;;  %v2632_v27 = vpop.f32.mrf.mxu1 }
 0x1e8   :  { %v2069_v53 = vadd.f32 %v2603_v33, %v2021_v34 }
 0x1e9   :  { %v2605_v6 = vpop.f32.mrf.mxu0  ;;  %v2633_v9 = vpop.f32.mrf.mxu1 }
 0x1ea   :  { %v2117_v41 = vadd.f32 %v2631_v54, %v2069_v53 }
 0x1fb   :  { %v2651_v5 = vpop.f32.mrf.mxu0  ;;  %v2679_v29 = vpop.f32.mrf.mxu1 }
 0x1fd   :  { %v2652_v31 = vpop.f32.mrf.mxu0  ;;  %v2680_v24 = vpop.f32.mrf.mxu1 }
 0x1fe   :  { %v2653_v43 = vadd.f32 %v2652_v31, %v2651_v5  ;;  %v2681_v40 = vadd.f32 %v2680_v24, %v2679_v29  ;;  %v2465_v24 = vld [vmem:[%s3625_s5] ss:$0 sm:$0xff] }
 0x1ff   :  { %v2654_v37 = vpop.f32.mrf.mxu0  ;;  %v2682_v48 = vpop.f32.mrf.mxu1 }
 0x200   :  { %v2157_v46 = vadd.f32 %v2653_v43, %v2109_v32 }
 0x201   :  { %v2655_v55 = vpop.f32.mrf.mxu0  ;;  %v2683_v38 = vpop.f32.mrf.mxu1 }
 0x202   :  { %v2205_v35 = vadd.f32 %v2681_v40, %v2157_v46  ;;  %v2656_v56 = vadd.f32 %v2655_v55, %v2654_v37  ;;  %v2684_v16 = vadd.f32 %v2683_v38, %v2682_v48  ;;  %v2466_v37 = vld [vmem:[%s3626_s6] ss:$0 sm:$0xff] }
 0x203   :  { %v2657_v59 = vpop.f32.mrf.mxu0  ;;  %v2685_v20 = vpop.f32.mrf.mxu1 }
 0x204   :  { %v2160_v8 = vadd.f32 %v2656_v56, %v2112_v51  ;;  %v2218_v14 = vadd.f32 %v2826_v57, %v2205_v35 }
 0x205   :  { %v2658_v18 = vpop.f32.mrf.mxu0  ;;  %v2686_v60 = vpop.f32.mrf.mxu1 }
 0x206   :  { %v2208_v25 = vadd.f32 %v2684_v16, %v2160_v8  ;;  %v2659_v61 = vadd.f32 %v2658_v18, %v2657_v59  ;;  %v2221_v12 = vsel %vm308_vm0, %v2218_v14, 0.0  ;;  %v2687_v58 = vadd.f32 %v2686_v60, %v2685_v20 }
 0x207   :  { %v2660_v47 = vpop.f32.mrf.mxu0  ;;  %2222 = vadd.xlane.f32.xlu0 %v2221_v12  ;;  %v2688_v19 = vpop.f32.mrf.mxu1 }
 0x208   :  { %v2165_v0 = vadd.f32 %v2659_v61, %v2117_v41  ;;  %v2219_v63 = vadd.f32 %v2827_v52, %v2208_v25 }
 0x209   :  { %v2661_v45 = vpop.f32.mrf.mxu0  ;;  %v2689_v1 = vpop.f32.mrf.mxu1 }
 0x20a   :  { %v2213_v50 = vadd.f32 %v2687_v58, %v2165_v0  ;;  %v2224_v39 = vsel %vm308_vm0, %v2219_v63, 0.0 }
 0x20b   :  { %2225 = vadd.xlane.f32.xlu0 %v2224_v39 }
 0x20c   :  { %v2220_v10 = vadd.f32 %v2828_v4, %v2213_v50 }
 0x20e   :  { %v2227_v2 = vsel %vm308_vm0, %v2220_v10, 0.0 }
 0x20f   :  { %2228 = vadd.xlane.f32.xlu1 %v2227_v2 }
 0x290   :  { %v2223_v27 = vpop.xlane.xlu0 %2222 }
 0x291   :  { %v2231_v6 = vmul.f32 0.03125, %v2223_v27 }
 0x293   :  { %v2234_v9 = vsub.f32 %v2218_v14, %v2231_v6 }
 0x294   :  { %v2226_v11 = vpop.xlane.xlu0 %2225 }
 0x295   :  { %v2232_v13 = vmul.f32 0.03125, %v2226_v11  ;;  %v2237_v42 = vmul.f32 %v2234_v9, %v2234_v9 }
 0x297   :  { %v2235_v44 = vsub.f32 %v2219_v63, %v2232_v13  ;;  %v2240_v21 = vsel %vm308_vm0, %v2237_v42, 0.0 }
 0x298   :  { %v2229_v3 = vpop.xlane.xlu1 %2228  ;;  %2241 = vadd.xlane.f32.xlu1 %v2240_v21 }
 0x299   :  { %v2233_v17 = vmul.f32 0.03125, %v2229_v3  ;;  %v2238_v15 = vmul.f32 %v2235_v44, %v2235_v44 }
 0x29b   :  { %v2236_v22 = vsub.f32 %v2220_v10, %v2233_v17  ;;  %v2243_v23 = vsel %vm308_vm0, %v2238_v15, 0.0 }
 0x29c   :  { %2244 = vadd.xlane.f32.xlu0 %v2243_v23 }
 0x29d   :  { %v2239_v49 = vmul.f32 %v2236_v22, %v2236_v22 }
 0x29f   :  { %v2246_v62 = vsel %vm308_vm0, %v2239_v49, 0.0 }
 0x2a0   :  { %2247 = vadd.xlane.f32.xlu1 %v2246_v62 }
 0x321   :  { %v2242_v5 = vpop.xlane.xlu1 %2241 }
 0x322   :  { %v2249_v7 = vmul.f32 0.03125, %v2242_v5 }
 0x324   :  { %v2252_v26 = vadd.f32 1e-05, %v2249_v7 }
 0x325   :  { %v2245_v28 = vpop.xlane.xlu0 %2244 }
 0x326   :  { %2820 = vrsqrt.f32 %v2252_v26  ;;  %v2250_v29 = vmul.f32 0.03125, %v2245_v28 }
 0x328   :  { %v2253_v30 = vadd.f32 1e-05, %v2250_v29 }
 0x329   :  { %v2248_v31 = vpop.xlane.xlu1 %2247 }
 0x32a   :  { %2822 = vrsqrt.f32 %v2253_v30  ;;  %v2251_v32 = vmul.f32 0.03125, %v2248_v31 }
 0x32c   :  { %v2254_v33 = vadd.f32 1e-05, %v2251_v32 }
 0x32e   :  { %2824 = vrsqrt.f32 %v2254_v33 }
 0x333   :  { %v2821_v43 = vpop.eup %2820 }
 0x334   :  { %v2258_v36 = vmul.f32 %v2821_v43, %v2234_v9 }
 0x336   :  { %v2268_v34 = vmul.f32 %v2465_v24, %v2258_v36 }
 0x337   :  { %v2823_v46 = vpop.eup %2822 }
 0x338   :  { %v2278_v40 = vadd.f32 %v2466_v37, %v2268_v34  ;;  %v2259_v48 = vmul.f32 %v2823_v46, %v2235_v44 }
 0x33a   :  { %2281 = vst.msk [vmem:[%s3627_s7] sm:$0xff] %vm308_vm0, %v2278_v40  ;;  %v2269_v51 = vmul.f32 %v2465_v24, %v2259_v48 }
 0x33b   :  { %v2825_v55 = vpop.eup %2824 }
 0x33c   :  { %v2279_v53 = vadd.f32 %v2466_v37, %v2269_v51  ;;  %v2260_v54 = vmul.f32 %v2825_v55, %v2236_v22 }
 0x33e   :  { %2282 = vst.msk [vmem:[%s3627_s7 + $0x8] sm:$0xff] %vm308_vm0, %v2279_v53  ;;  %v2270_v35 = vmul.f32 %v2465_v24, %v2260_v54 }
 0x340   :  { %v2280_v56 = vadd.f32 %v2466_v37, %v2270_v35 }
 0x342   :  { %2283 = vst.msk [vmem:[%s3627_s7 + $0x10] sm:$0xff] %vm308_vm0, %v2280_v56 }

// kernel: transformer_forward.28
= control target key start
LH: loop header
LB: loop body
LE: loop exit
PB: predicated region body
PF: predicated region fallthrough
CT: control target
= control target key end

     0   :  { %vm19_vm0 = vcmask 785408   ;;  %v145_v0 = vmov 0.0   ;;  %vm146_vm1 = vmmov 0   ;;  %vm43_vm2 = vcmask 261120   ;;  %s192_s1 = inlined_call_operand.vmem [shape: bf16[32,96], index: 1, kind: input, shape index: {}]   ;;  %s193_s0 = inlined_call_operand.vmem [shape: f32[16,32], index: 0, kind: input, shape index: {}]   ;;  %s194_s2 = inlined_call_operand.vmem [shape: f32[1,96], index: 2, kind: input, shape index: {}]   ;;  %s195_s3 = inlined_call_operand.vmem [shape: bf16[16,96], index: 3, kind: output, shape index: {}]  }
   0x1   :  { %133 = vmatprep.subr.bf16.mxu0 %v145_v0  ;;  %v143_v1 = vld [vmem:[%s192_s1 + $0x8] sm:$0xff]   ;;  %137 = vmatprep.mubr.msk.bf16.mxu0 %vm146_vm1, %v145_v0  ;;  %20 = vst.msk [vmem:[#allocation2] sm:$0xff] %vm19_vm0, %v145_v0  ;;  %21 = vst.msk [vmem:[#allocation2 + $0x8] sm:$0xff] %vm19_vm0, %v145_v0  ;;  %v144_v2 = vld [vmem:[%s192_s1] sm:$0xff]   ;;  %vm115_vm3 = vcmask 781312  }
   0x2   :  { %134 = vmatpush3.bf16.msra.mxu0 %v143_v1  ;;  %v24_v3 = vld [vmem:[%s193_s0] sm:$0xff]  ;;  %v25_v4 = vld [vmem:[%s193_s0 + $0x8] sm:$0xff] }
   0x3   :  { %135 = vmatprep.subr.bf16.mxu0 %v145_v0  ;;  %v26_v5 = vpack.c.bf16 %v25_v4, %v24_v3  ;;  %v125_v14 = vld [vmem:[%s194_s2] ss:$0 sm:$0xff] }
   0x6   :  { %136 = vmatpush3.bf16.msra.mxu0 %v144_v2 }
   0x8   :  { %v22_v6 = vld [vmem:[#allocation2] sm:$0xff]  ;;  %v23_v10 = vld [vmem:[#allocation2 + $0x8] sm:$0xff] }
   0x9   :  { %138 = vmatmul.mubr.msk.bf16.vlgmr.msra.gmra.mxu0 %vm43_vm2, %v26_v5 }
  0xc9   :  { %v81_v7 = vpop.f32.mrf.mxu0 }
  0xca   :  { %v88_v8 = vadd.f32 %v81_v7, %v22_v6 }
  0xcb   :  { %v139_v9 = vpop.f32.mrf.mxu0 }
  0xcc   :  { %91 = vst.msk [vmem:[#allocation2] sm:$0xff] %vm19_vm0, %v88_v8 }
  0xcd   :  { %v84_v11 = vpop.f32.mrf.mxu0 }
  0xce   :  { %v89_v12 = vadd.f32 %v84_v11, %v23_v10 }
  0xcf   :  { %v140_v13 = vpop.f32.mrf.mxu0 }
  0xd0   :  { %92 = vst.msk [vmem:[#allocation2 + $0x8] sm:$0xff] %vm19_vm0, %v89_v12 }
  0xd3   :  { %v96_v15 = vld [vmem:[#allocation2] sm:$0xff] }
  0xd4   :  { %v105_v16 = vadd.f32 %v125_v14, %v96_v15 }
  0xd6   :  { %v128_v17 = vpack.c.bf16 %v105_v16, %v105_v16 }
  0xd7   :  { %v97_v18 = vld [vmem:[#allocation2 + $0x8] sm:$0xff] }
  0xd8   :  { %116 = vst.msk [vmem:[%s195_s3] sm:$0xf] %vm115_vm3, %v128_v17  ;;  %v106_v19 = vadd.f32 %v125_v14, %v97_v18 }
  0xda   :  { %v129_v20 = vpack.c.bf16 %v106_v19, %v106_v19 }
  0xdc   :  { %117 = vst.msk [vmem:[%s195_s3 + $0x4] sm:$0xf] %vm115_vm3, %v129_v20 }

// kernel: transformer_forward.30
= control target key start
LH: loop header
LB: loop body
LE: loop exit
PB: predicated region body
PF: predicated region fallthrough
CT: control target
= control target key end

     0   :  { %vm19_vm0 = vcmask 261120   ;;  %v144_v0 = vmov 0.0   ;;  %vm145_vm1 = vmmov 0   ;;  %vm114_vm2 = vcmask 257024   ;;  %s192_s1 = inlined_call_operand.vmem [shape: bf16[32,32], index: 1, kind: input, shape index: {}]   ;;  %s193_s0 = inlined_call_operand.vmem [shape: f32[16,32], index: 0, kind: input, shape index: {}]   ;;  %s194_s2 = inlined_call_operand.vmem [shape: f32[1,32], index: 2, kind: input, shape index: {}]   ;;  %s195_s3 = inlined_call_operand.vmem [shape: bf16[16,32], index: 3, kind: output, shape index: {}]  }
   0x1   :  { %132 = vmatprep.subr.bf16.mxu0 %v144_v0  ;;  %v142_v1 = vld [vmem:[%s192_s1 + $0x8] sm:$0xff]   ;;  %136 = vmatprep.mubr.msk.bf16.mxu0 %vm145_vm1, %v144_v0  ;;  %20 = vst.msk [vmem:[#allocation2] sm:$0xff] %vm19_vm0, %v144_v0  ;;  %21 = vst.msk [vmem:[#allocation2 + $0x8] sm:$0xff] %vm19_vm0, %v144_v0  ;;  %v143_v2 = vld [vmem:[%s192_s1] sm:$0xff]  }
   0x2   :  { %133 = vmatpush3.bf16.msra.mxu0 %v142_v1  ;;  %v24_v3 = vld [vmem:[%s193_s0] sm:$0xff]  ;;  %v25_v4 = vld [vmem:[%s193_s0 + $0x8] sm:$0xff] }
   0x3   :  { %134 = vmatprep.subr.bf16.mxu0 %v144_v0  ;;  %v26_v5 = vpack.c.bf16 %v25_v4, %v24_v3  ;;  %v124_v14 = vld [vmem:[%s194_s2] ss:$0 sm:$0xff] }
   0x6   :  { %135 = vmatpush3.bf16.msra.mxu0 %v143_v2 }
   0x8   :  { %v22_v6 = vld [vmem:[#allocation2] sm:$0xff]  ;;  %v23_v10 = vld [vmem:[#allocation2 + $0x8] sm:$0xff] }
   0x9   :  { %137 = vmatmul.mubr.msk.bf16.vlgmr.msra.gmra.mxu0 %vm19_vm0, %v26_v5 }
  0xc9   :  { %v81_v7 = vpop.f32.mrf.mxu0 }
  0xca   :  { %v88_v8 = vadd.f32 %v81_v7, %v22_v6 }
  0xcb   :  { %v138_v9 = vpop.f32.mrf.mxu0 }
  0xcc   :  { %90 = vst.msk [vmem:[#allocation2] sm:$0xff] %vm19_vm0, %v88_v8 }
  0xcd   :  { %v84_v11 = vpop.f32.mrf.mxu0 }
  0xce   :  { %v89_v12 = vadd.f32 %v84_v11, %v23_v10 }
  0xcf   :  { %v139_v13 = vpop.f32.mrf.mxu0 }
  0xd0   :  { %91 = vst.msk [vmem:[#allocation2 + $0x8] sm:$0xff] %vm19_vm0, %v89_v12 }
  0xd3   :  { %v95_v15 = vld [vmem:[#allocation2] sm:$0xff] }
  0xd4   :  { %v104_v16 = vadd.f32 %v124_v14, %v95_v15 }
  0xd6   :  { %v127_v17 = vpack.c.bf16 %v104_v16, %v104_v16 }
  0xd7   :  { %v96_v18 = vld [vmem:[#allocation2 + $0x8] sm:$0xff] }
  0xd8   :  { %115 = vst.msk [vmem:[%s195_s3] sm:$0xf] %vm114_vm2, %v127_v17  ;;  %v105_v19 = vadd.f32 %v124_v14, %v96_v18 }
  0xda   :  { %v128_v20 = vpack.c.bf16 %v105_v19, %v105_v19 }
  0xdc   :  { %116 = vst.msk [vmem:[%s195_s3 + $0x4] sm:$0xf] %vm114_vm2, %v128_v20 }

// kernel: transformer_forward.29
= control target key start
LH: loop header
LB: loop body
LE: loop exit
PB: predicated region body
PF: predicated region fallthrough
CT: control target
= control target key end

     0   :  { %s1502_s30 = smov 0   ;;  %s1504_s10 = smov 0   ;;  %s1662_s0 = inlined_call_operand.vmem [shape: bf16[2,4,8,8], index: 0, kind: input, shape index: {}]   ;;  %s1663_s1 = inlined_call_operand.vmem [shape: bf16[2,4,8,8], index: 1, kind: input, shape index: {}]   ;;  %s1664_s2 = inlined_call_operand.vmem [shape: bf16[2,4,8,8], index: 2, kind: input, shape index: {}]   ;;  %s1665_s3 = inlined_call_operand.vmem [shape: f32[8,8], index: 3, kind: input, shape index: {}]   ;;  %s1666_s4 = inlined_call_operand.vmem [shape: bf16[4,8,32], index: 4, kind: input, shape index: {}]   ;;  %s1667_s5 = inlined_call_operand.vmem [shape: f32[1,32], index: 5, kind: input, shape index: {}]   ;;  %s1668_s6 = inlined_call_operand.vmem [shape: f32[2,8,32], index: 6, kind: input, shape index: {}]   ;;  %s1669_s7 = inlined_call_operand.vmem [shape: f32[1,32], index: 7, kind: input, shape index: {}]   ;;  %s1670_s8 = inlined_call_operand.vmem [shape: f32[1,32], index: 8, kind: input, shape index: {}]   ;;  %s1671_s9 = inlined_call_operand.vmem [shape: f32[2,8,32], index: 9, kind: output, shape index: {}]  }
   0x1   :  { %s1506_s11 = smov 0  }
   0x2 LB: > { %s31_s12 = sadd.s32 1, %s1444_s10  ;;  %p1257_p0 = scmp.ge.s32.totalorder %s1448_s11, 1  ;;  %s1448_s11 = sphi %s1506_s11, %s19_s11   ;;  %s1444_s10 = sphi %s1504_s10, %s1673_s10   ;;  %s1440_s30 = sphi %s1502_s30, %s1672_s30  }
   0x3   : > { %p33_p1 = scmp.ge.s32.totalorder %s31_s12, 2  ;;  %p349_p2 = scmp.lt.s32.totalorder %s1448_s11, 3 }
   0x5   : > { %s1675_s12 = smov (%p33_p1, %s31_s12), 0  ;;  %p350_p3 = pnand %p1257_p0, %p349_p2 }
   0x6   : > { %p411_p4 = scmp.lt.s32.totalorder (!%p350_p3), %s1440_s30, 1 }
   0x7   : > { %353 = sbr.rel (%p350_p3) target bundleno = 1096 (0x448), region = 56 }
   0xc   : > { %v1450_v0 = vmov 0.0   ;;  %s1677_s30 = smov (!%p411_p4, %s1440_s30), 1  ;;  %vm1451_vm0 = vmmov 0   ;;  %vm461_vm1 = vcmask 64512   ;;  %v460_v13 = vld [vmem:[%s1665_s3] sm:$0xff]  ;;  %vm689_vm2 = vcmask 1043456  }
   0xd   : > { %1310 = vmatprep.subr.bf16.mxu0 %v1450_v0  ;;  %1316 = vmatprep.subr.bf16.mxu1 %v1450_v0  ;;  %s1529_s13 = sshll.u32 %s1677_s30, 4  ;;  %vm1071_vm3 = vcmask 261120  }
   0xe   : > { %1312 = vmatprep.mubr.msk.bf16.mxu0 %vm1451_vm0, %v1450_v0  ;;  %1318 = vmatprep.mubr.msk.bf16.mxu1 %vm1451_vm0, %v1450_v0  ;;  %s423_s16 = scalar_lea.vmem %s1663_s1, %s1529_s13  ;;  %s418_s19 = scalar_lea.vmem %s1662_s0, %s1529_s13 }
   0xf   : > { %v452_v1 = vld [vmem:[%s423_s16] sm:$0xf]  ;;  %v453_v2 = vld [vmem:[%s423_s16 + $0x4] sm:$0xf]  ;;  %v454_v5 = vld [vmem:[%s423_s16 + $0x8] sm:$0xf]  ;;  %s1570_s24 = scalar_lea.vmem %s1664_s2, %s1529_s13 }
  0x10   : > { %v466_v3 = vsel %vm461_vm1, %v452_v1, 0  ;;  %v512_v4 = vsel %vm461_vm1, %v453_v2, 0  ;;  %v455_v6 = vld [vmem:[%s423_s16 + $0xc] sm:$0xf]  ;;  %v448_v7 = vld [vmem:[%s418_s19] sm:$0xf] }
  0x11   : > { %1311 = vmatpush3.bf16.xpose.msra.mxu0 %v466_v3  ;;  %1317 = vmatpush3.bf16.xpose.msra.mxu1 %v512_v4  ;;  %v449_v8 = vld [vmem:[%s418_s19 + $0x4] sm:$0xf]  ;;  %v558_v9 = vsel %vm461_vm1, %v454_v5, 0  ;;  %v604_v10 = vsel %vm461_vm1, %v455_v6, 0  ;;  %v450_v11 = vld [vmem:[%s418_s19 + $0x8] sm:$0xf] }
  0x12   : > { %1322 = vmatprep.subr.bf16.mxu0 %v1450_v0  ;;  %1328 = vmatprep.subr.bf16.mxu1 %v1450_v0  ;;  %v451_v12 = vld [vmem:[%s418_s19 + $0xc] sm:$0xf]  ;;  %v456_v38 = vld [vmem:[%s1570_s24] sm:$0xf]  ;;  %v457_v40 = vld [vmem:[%s1570_s24 + $0x4] sm:$0xf] }
  0x13   : > { %v691_v39 = vsel %vm689_vm2, %v456_v38, 0  ;;  %v737_v41 = vsel %vm689_vm2, %v457_v40, 0  ;;  %v458_v54 = vld [vmem:[%s1570_s24 + $0x8] sm:$0xf]  ;;  %v459_v59 = vld [vmem:[%s1570_s24 + $0xc] sm:$0xf] }
  0x14   : > { %v783_v58 = vsel %vm689_vm2, %v458_v54, 0  ;;  %v829_v63 = vsel %vm689_vm2, %v459_v59, 0  ;;  %s1264_s16 = sshll.u32 %s1677_s30, 3 }
  0x15   : > { %s439_s19 = scalar_lea.vmem %s1668_s6, %s1264_s16  ;;  %s446_s28 = scalar_lea.vmem %s1671_s9, %s1264_s16 }
  0x18   : > { %1313 = vmatmul.mubr.msk.bf16.vlgmr.msra.gmra.mxu0 %vm461_vm1, %v448_v7  ;;  %1319 = vmatmul.mubr.msk.bf16.vlgmr.msra.gmra.mxu1 %vm461_vm1, %v449_v8  ;;  %v883_v7 = vld [vmem:[%s1666_s4] sm:$0xf] }
  0x19   : > { %1323 = vmatpush3.bf16.xpose.msra.mxu0 %v558_v9  ;;  %1329 = vmatpush3.bf16.xpose.msra.mxu1 %v604_v10  ;;  %v891_v8 = vsel %vm689_vm2, %v883_v7, 0  ;;  %v884_v9 = vld [vmem:[%s1666_s4 + $0x4] sm:$0xf] }
  0x1a   : > { %1324 = vmatprep.mubr.msk.bf16.mxu0 %vm1451_vm0, %v1450_v0  ;;  %1330 = vmatprep.mubr.msk.bf16.mxu1 %vm1451_vm0, %v1450_v0  ;;  %v937_v10 = vsel %vm689_vm2, %v884_v9, 0 }
  0x1b   : > { %1334 = vmatprep.subr.bf16.mxu0 %v1450_v0  ;;  %1340 = vmatprep.subr.bf16.mxu1 %v1450_v0 }
  0x20   : > { %1325 = vmatmul.mubr.msk.bf16.vlgmr.msra.gmra.mxu0 %vm461_vm1, %v450_v11  ;;  %1331 = vmatmul.mubr.msk.bf16.vlgmr.msra.gmra.mxu1 %vm461_vm1, %v451_v12 }
  0x21   : > { %1336 = vmatprep.mubr.msk.bf16.mxu0 %vm1451_vm0, %v1450_v0  ;;  %1342 = vmatprep.mubr.msk.bf16.mxu1 %vm1451_vm0, %v1450_v0 }
  0x22   : > { %1335 = vmatpush3.bf16.msra.mxu0 %v691_v39  ;;  %1341 = vmatpush3.bf16.msra.mxu1 %v737_v41 }
  0x23   : > { %1346 = vmatprep.subr.bf16.mxu0 %v1450_v0  ;;  %1352 = vmatprep.subr.bf16.mxu1 %v1450_v0 }
  0xd8   : > { %v502_v14 = vpop.f32.mrf.mxu0  ;;  %v548_v15 = vpop.f32.mrf.mxu1 }
  0xd9   : > { %v503_v16 = vadd.f32 %v502_v14, %v460_v13  ;;  %v549_v17 = vadd.f32 %v548_v15, %v460_v13 }
  0xda   : > { %v1314_v18 = vpop.f32.mrf.mxu0  ;;  %v1320_v19 = vpop.f32.mrf.mxu1 }
  0xdb   : > { %v646_v20 = vsel %vm461_vm1, %v503_v16, -inf  ;;  %v649_v23 = vsel %vm461_vm1, %v549_v17, -inf }
  0xdc   : > { %v551_v21 = vpop.f32.mrf.mxu1  ;;  %647 = vmax.xlane.f32.xlu0 %v646_v20  ;;  %v505_v22 = vpop.f32.mrf.mxu0 }
  0xde   : > { %v1315_v24 = vpop.f32.mrf.mxu0  ;;  %v1321_v25 = vpop.f32.mrf.mxu1 }
  0xdf   : > { %v886_v25 = vld [vmem:[%s1666_s4 + $0xc] sm:$0xf] }
  0xe0   : > { %v640_v26 = vpop.f32.mrf.mxu1  ;;  %650 = vmax.xlane.f32.xlu0 %v649_v23  ;;  %v594_v27 = vpop.f32.mrf.mxu0 }
  0xe1   : > { %v641_v28 = vadd.f32 %v640_v26, %v460_v13  ;;  %v595_v29 = vadd.f32 %v594_v27, %v460_v13 }
  0xe2   : > { %v1326_v30 = vpop.f32.mrf.mxu0  ;;  %v1332_v31 = vpop.f32.mrf.mxu1 }
  0xe3   : > { %v652_v32 = vsel %vm461_vm1, %v595_v29, -inf  ;;  %v655_v35 = vsel %vm461_vm1, %v641_v28, -inf  ;;  %v1029_v30 = vsel %vm689_vm2, %v886_v25, 0 }
  0xe4   : > { %v643_v33 = vpop.f32.mrf.mxu1  ;;  %653 = vmax.xlane.f32.xlu1 %v652_v32  ;;  %v597_v34 = vpop.f32.mrf.mxu0 }
  0xe6   : > { %v1327_v36 = vpop.f32.mrf.mxu0  ;;  %v1333_v37 = vpop.f32.mrf.mxu1 }
  0xe8   : > { %656 = vmax.xlane.f32.xlu1 %v655_v35 }
 0x165   : > { %v648_v42 = vpop.xlane.xlu0 %647 }
 0x166   : > { %v658_v43 = vsub.f32 %v503_v16, %v648_v42 }
 0x168   : > { %v662_v44 = vmul.f32 1.442695, %v658_v43 }
 0x169   : > { %v651_v45 = vpop.xlane.xlu0 %650 }
 0x16a   : > { %1408 = vpow2.f32 %v662_v44  ;;  %v659_v46 = vsub.f32 %v549_v17, %v651_v45  ;;  %v885_v17 = vld [vmem:[%s1666_s4 + $0x8] sm:$0xf] }
 0x16b   : > { %v983_v21 = vsel %vm689_vm2, %v885_v17, 0 }
 0x16c   : > { %v664_v47 = vmul.f32 1.442695, %v659_v46 }
 0x16d   : > { %v654_v48 = vpop.xlane.xlu1 %653 }
 0x16e   : > { %1410 = vpow2.f32 %v664_v47  ;;  %v660_v49 = vsub.f32 %v595_v29, %v654_v48 }
 0x170   : > { %v666_v50 = vmul.f32 1.442695, %v660_v49 }
 0x171   : > { %v657_v51 = vpop.xlane.xlu1 %656 }
 0x172   : > { %1412 = vpow2.f32 %v666_v50  ;;  %v661_v52 = vsub.f32 %v641_v28, %v657_v51 }
 0x174   : > { %v668_v53 = vmul.f32 1.442695, %v661_v52 }
 0x176   : > { %1414 = vpow2.f32 %v668_v53 }
 0x177   : > { %v1409_v55 = vpop.eup %1408 }
 0x178   : > { %v670_v56 = vsel %vm461_vm1, %v1409_v55, 0.0  ;;  %v682_v57 = vpack.c.bf16 %v1409_v55, %v1409_v55 }
 0x179   : > { %671 = vadd.xlane.f32.xlu0 %v670_v56 }
 0x17a   : > { %1337 = vmatmul.mubr.msk.bf16.vlgmr.msra.gmra.mxu0 %vm461_vm1, %v682_v57 }
 0x17b   : > { %v1411_v60 = vpop.eup %1410  ;;  %1347 = vmatpush3.bf16.msra.mxu0 %v783_v58  ;;  %1348 = vmatprep.mubr.msk.bf16.mxu0 %vm1451_vm0, %v1450_v0 }
 0x17c   : > { %v673_v61 = vsel %vm461_vm1, %v1411_v60, 0.0  ;;  %v683_v62 = vpack.c.bf16 %v1411_v60, %v1411_v60  ;;  %1358 = vmatprep.subr.bf16.mxu0 %v1450_v0 }
 0x17d   : > { %674 = vadd.xlane.f32.xlu1 %v673_v61 }
 0x17e   : > { %1343 = vmatmul.mubr.msk.bf16.vlgmr.msra.gmra.mxu1 %vm461_vm1, %v683_v62 }
 0x17f   : > { %v1413_v1 = vpop.eup %1412  ;;  %1353 = vmatpush3.bf16.msra.mxu1 %v829_v63  ;;  %1354 = vmatprep.mubr.msk.bf16.mxu1 %vm1451_vm0, %v1450_v0 }
 0x180   : > { %v676_v2 = vsel %vm461_vm1, %v1413_v1, 0.0  ;;  %v684_v3 = vpack.c.bf16 %v1413_v1, %v1413_v1  ;;  %1364 = vmatprep.subr.bf16.mxu1 %v1450_v0  ;;  %v1278_v1 = vld [vmem:[%s1667_s5] ss:$0 sm:$0xff] }
 0x181   : > { %677 = vadd.xlane.f32.xlu0 %v676_v2 }
 0x182   : > { %1349 = vmatmul.mubr.msk.bf16.vlgmr.msra.gmra.mxu0 %vm461_vm1, %v684_v3 }
 0x183   : > { %v1415_v4 = vpop.eup %1414  ;;  %1360 = vmatprep.mubr.msk.bf16.mxu0 %vm1451_vm0, %v1450_v0  ;;  %1359 = vmatpush3.bf16.msra.mxu0 %v891_v8 }
 0x184   : > { %v679_v5 = vsel %vm461_vm1, %v1415_v4, 0.0  ;;  %v685_v6 = vpack.c.bf16 %v1415_v4, %v1415_v4  ;;  %1370 = vmatprep.subr.bf16.mxu0 %v1450_v0 }
 0x185   : > { %680 = vadd.xlane.f32.xlu1 %v679_v5  ;;  %v1087_v5 = vld [vmem:[%s439_s19] sm:$0xff] }
 0x186   : > { %1355 = vmatmul.mubr.msk.bf16.vlgmr.msra.gmra.mxu1 %vm461_vm1, %v685_v6 }
 0x187   : > { %1366 = vmatprep.mubr.msk.bf16.mxu1 %vm1451_vm0, %v1450_v0  ;;  %1365 = vmatpush3.bf16.msra.mxu1 %v937_v10 }
 0x188   : > { %1376 = vmatprep.subr.bf16.mxu1 %v1450_v0 }
 0x202   : > { %v672_v11 = vpop.xlane.xlu0 %671 }
 0x203   : > { %1416 = vrcp.f32 %v672_v11 }
 0x206   : > { %v675_v12 = vpop.xlane.xlu1 %674 }
 0x207   : > { %1418 = vrcp.f32 %v675_v12 }
 0x20a   : > { %v678_v13 = vpop.xlane.xlu0 %677 }
 0x20b   : > { %1420 = vrcp.f32 %v678_v13 }
 0x20e   : > { %v681_v14 = vpop.xlane.xlu1 %680 }
 0x20f   : > { %1422 = vrcp.f32 %v681_v14 }
 0x210   : > { %v1417_v15 = vpop.eup %1416 }
 0x214   : > { %v1419_v22 = vpop.eup %1418 }
 0x218   : > { %v1421_v31 = vpop.eup %1420 }
 0x21c   : > { %v1423_v38 = vpop.eup %1422 }
 0x23a   : > { %v727_v16 = vpop.f32.mrf.mxu0 }
 0x23b   : > { %v875_v18 = vmul.f32 %v1417_v15, %v727_v16 }
 0x23c   : > { %v1338_v19 = vpop.f32.mrf.mxu0 }
 0x23d   : > { %v879_v20 = vpack.c.bf16 %v875_v18, %v875_v18 }
 0x23e   : > { %v730_v23 = vpop.f32.mrf.mxu0  ;;  %v773_v24 = vpop.f32.mrf.mxu1 }
 0x23f   : > { %v876_v26 = vmul.f32 %v1419_v22, %v773_v24  ;;  %1361 = vmatmul.mubr.msk.bf16.vlgmr.msra.gmra.mxu0 %vm461_vm1, %v879_v20  ;;  %v1279_v20 = vld [vmem:[%s1669_s7] ss:$0 sm:$0xff] }
 0x240   : > { %v1339_v27 = vpop.f32.mrf.mxu0  ;;  %v1344_v28 = vpop.f32.mrf.mxu1  ;;  %1371 = vmatpush3.bf16.msra.mxu0 %v983_v21  ;;  %1372 = vmatprep.mubr.msk.bf16.mxu0 %vm1451_vm0, %v1450_v0  ;;  %v1280_v22 = vld [vmem:[%s1670_s8] ss:$0 sm:$0xff] }
 0x241   : > { %v880_v29 = vpack.c.bf16 %v876_v26, %v876_v26 }
 0x242   : > { %v776_v32 = vpop.f32.mrf.mxu1  ;;  %v819_v33 = vpop.f32.mrf.mxu0 }
 0x243   : > { %v877_v34 = vmul.f32 %v1421_v31, %v819_v33  ;;  %1367 = vmatmul.mubr.msk.bf16.vlgmr.msra.gmra.mxu1 %vm461_vm1, %v880_v29 }
 0x244   : > { %v1345_v35 = vpop.f32.mrf.mxu1  ;;  %v1350_v36 = vpop.f32.mrf.mxu0  ;;  %1377 = vmatpush3.bf16.msra.mxu1 %v1029_v30  ;;  %1378 = vmatprep.mubr.msk.bf16.mxu1 %vm1451_vm0, %v1450_v0 }
 0x245   : > { %v881_v37 = vpack.c.bf16 %v877_v34, %v877_v34 }
 0x246   : > { %v822_v39 = vpop.f32.mrf.mxu0  ;;  %v865_v40 = vpop.f32.mrf.mxu1 }
 0x247   : > { %v878_v41 = vmul.f32 %v1423_v38, %v865_v40  ;;  %1373 = vmatmul.mubr.msk.bf16.vlgmr.msra.gmra.mxu0 %vm461_vm1, %v881_v37 }
 0x248   : > { %v1351_v42 = vpop.f32.mrf.mxu0  ;;  %v1356_v43 = vpop.f32.mrf.mxu1 }
 0x249   : > { %v882_v44 = vpack.c.bf16 %v878_v41, %v878_v41 }
 0x24a   : > { %v868_v45 = vpop.f32.mrf.mxu1 }
 0x24b   : > { %1379 = vmatmul.mubr.msk.bf16.vlgmr.msra.gmra.mxu1 %vm461_vm1, %v882_v44 }
 0x24c   : > { %v1357_v46 = vpop.f32.mrf.mxu1 }
 0x2ff   : > { %v927_v47 = vpop.f32.mrf.mxu0 }
 0x300   : > { %v1072_v55 = vsel %vm1071_vm3, %v927_v47, 0.0 }
 0x301   : > { %v1362_v48 = vpop.f32.mrf.mxu0 }
 0x303   : > { %v930_v49 = vpop.f32.mrf.mxu0  ;;  %v973_v50 = vpop.f32.mrf.mxu1 }
 0x304   : > { %v1073_v52 = vsel %vm1071_vm3, %v973_v50, 0.0 }
 0x305   : > { %v1363_v0 = vpop.f32.mrf.mxu0  ;;  %v1368_v51 = vpop.f32.mrf.mxu1  ;;  %v1074_v57 = vadd.f32 %v1073_v52, %v1072_v55 }
 0x307   : > { %v976_v53 = vpop.f32.mrf.mxu1  ;;  %v1019_v54 = vpop.f32.mrf.mxu0 }
 0x308   : > { %v1075_v56 = vsel %vm1071_vm3, %v1019_v54, 0.0 }
 0x309   : > { %v1369_v58 = vpop.f32.mrf.mxu1  ;;  %v1374_v59 = vpop.f32.mrf.mxu0  ;;  %v1076_v60 = vadd.f32 %v1075_v56, %v1074_v57 }
 0x30b   : > { %v1022_v61 = vpop.f32.mrf.mxu0  ;;  %v1065_v62 = vpop.f32.mrf.mxu1 }
 0x30c   : > { %v1077_v63 = vsel %vm1071_vm3, %v1065_v62, 0.0 }
 0x30d   : > { %v1078_v2 = vadd.f32 %v1077_v63, %v1076_v60  ;;  %v1375_v3 = vpop.f32.mrf.mxu0  ;;  %v1380_v4 = vpop.f32.mrf.mxu1 }
 0x30f   : > { %v1086_v6 = vadd.f32 %v1278_v1, %v1078_v2  ;;  %v1068_v7 = vpop.f32.mrf.mxu1 }
 0x311   : > { %v1381_v8 = vpop.f32.mrf.mxu1  ;;  %v1088_v9 = vadd.f32 %v1087_v5, %v1086_v6 }
 0x313   : > { %v1089_v10 = vsel %vm1071_vm3, %v1088_v9, 0.0 }
 0x314   : > { %1090 = vadd.xlane.f32.xlu0 %v1089_v10 }
 0x39d   : > { %v1091_v11 = vpop.xlane.xlu0 %1090 }
 0x39e   : > { %v1093_v12 = vmul.f32 0.03125, %v1091_v11 }
 0x3a0   : > { %v1094_v13 = vsub.f32 %v1088_v9, %v1093_v12 }
 0x3a2   : > { %v1095_v14 = vmul.f32 %v1094_v13, %v1094_v13 }
 0x3a4   : > { %v1096_v15 = vsel %vm1071_vm3, %v1095_v14, 0.0 }
 0x3a5   : > { %1097 = vadd.xlane.f32.xlu1 %v1096_v15 }
 0x42e   : > { %v1098_v16 = vpop.xlane.xlu1 %1097 }
 0x42f   : > { %v1099_v17 = vmul.f32 0.03125, %v1098_v16 }
 0x431   : > { %v1100_v18 = vadd.f32 1e-05, %v1099_v17 }
 0x433   : > { %1424 = vrsqrt.f32 %v1100_v18 }
 0x440   : > { %v1425_v19 = vpop.eup %1424 }
 0x441   : > { %v1102_v21 = vmul.f32 %v1425_v19, %v1094_v13 }
 0x443   : > { %v1110_v23 = vmul.f32 %v1279_v20, %v1102_v21 }
 0x445   : > { %v1118_v24 = vadd.f32 %v1280_v22, %v1110_v23 }
 0x447   : > { %1119 = vst.msk [vmem:[%s446_s28] sm:$0xff] %vm1071_vm3, %v1118_v24 }
 0x448 PF: > { %s19_s11 = sadd.s32 1, %s1448_s11   ;;  %s1672_s30 = smov %s1444_s10 }
 0x449   : > { %p16_p5 = scmp.ge.s32.totalorder %s19_s11, 4   ;;  %s1673_s10 = smov %s1675_s12 }
 0x44b   :  { %18 = sbr.rel (!%p16_p5) target bundleno = 2 (0x2), region = 98 }

// kernel: transformer_forward.40
= control target key start
LH: loop header
LB: loop body
LE: loop exit
PB: predicated region body
PF: predicated region fallthrough
CT: control target
= control target key end

     0   :  { %vm16_vm0 = vcmask 261120   ;;  %s118_s0 = inlined_call_operand.vmem [shape: f32[16,32], index: 0, kind: input, shape index: {}]   ;;  %s119_s1 = inlined_call_operand.vmem [shape: f32[1,32], index: 1, kind: input, shape index: {}]   ;;  %s120_s2 = inlined_call_operand.vmem [shape: f32[1,32], index: 2, kind: input, shape index: {}]   ;;  %s121_s3 = inlined_call_operand.vmem [shape: f32[16,32], index: 3, kind: output, shape index: {}]  }
   0x1   :  { %v14_v0 = vld [vmem:[%s118_s0] sm:$0xff]  ;;  %v15_v1 = vld [vmem:[%s118_s0 + $0x8] sm:$0xff] }
   0x2   :  { %v17_v2 = vsel %vm16_vm0, %v14_v0, 0.0  ;;  %v20_v3 = vsel %vm16_vm0, %v15_v1, 0.0  ;;  %v68_v21 = vld [vmem:[%s119_s1] ss:$0 sm:$0xff] }
   0x3   :  { %18 = vadd.xlane.f32.xlu0 %v17_v2  ;;  %v69_v23 = vld [vmem:[%s120_s2] ss:$0 sm:$0xff] }
   0x7   :  { %21 = vadd.xlane.f32.xlu0 %v20_v3 }
  0x8c   :  { %v19_v4 = vpop.xlane.xlu0 %18 }
  0x8d   :  { %v24_v5 = vmul.f32 0.03125, %v19_v4 }
  0x8f   :  { %v26_v6 = vsub.f32 %v14_v0, %v24_v5 }
  0x90   :  { %v22_v7 = vpop.xlane.xlu0 %21 }
  0x91   :  { %v25_v8 = vmul.f32 0.03125, %v22_v7  ;;  %v28_v9 = vmul.f32 %v26_v6, %v26_v6 }
  0x93   :  { %v27_v10 = vsub.f32 %v15_v1, %v25_v8  ;;  %v30_v11 = vsel %vm16_vm0, %v28_v9, 0.0 }
  0x94   :  { %31 = vadd.xlane.f32.xlu1 %v30_v11 }
  0x95   :  { %v29_v12 = vmul.f32 %v27_v10, %v27_v10 }
  0x97   :  { %v33_v13 = vsel %vm16_vm0, %v29_v12, 0.0 }
  0x98   :  { %34 = vadd.xlane.f32.xlu1 %v33_v13 }
 0x11d   :  { %v32_v14 = vpop.xlane.xlu1 %31 }
 0x11e   :  { %v36_v15 = vmul.f32 0.03125, %v32_v14 }
 0x120   :  { %v38_v16 = vadd.f32 1e-05, %v36_v15 }
 0x121   :  { %v35_v17 = vpop.xlane.xlu1 %34 }
 0x122   :  { %70 = vrsqrt.f32 %v38_v16  ;;  %v37_v18 = vmul.f32 0.03125, %v35_v17 }
 0x124   :  { %v39_v19 = vadd.f32 1e-05, %v37_v18 }
 0x126   :  { %72 = vrsqrt.f32 %v39_v19 }
 0x12f   :  { %v71_v20 = vpop.eup %70 }
 0x130   :  { %v42_v22 = vmul.f32 %v71_v20, %v26_v6 }
 0x132   :  { %v51_v24 = vmul.f32 %v68_v21, %v42_v22 }
 0x133   :  { %v73_v25 = vpop.eup %72 }
 0x134   :  { %v60_v26 = vadd.f32 %v69_v23, %v51_v24  ;;  %v43_v27 = vmul.f32 %v73_v25, %v27_v10 }
 0x136   :  { %62 = vst.msk [vmem:[%s121_s3] sm:$0xff] %vm16_vm0, %v60_v26  ;;  %v52_v28 = vmul.f32 %v68_v21, %v43_v27 }
 0x138   :  { %v61_v29 = vadd.f32 %v69_v23, %v52_v28 }
 0x13a   :  { %63 = vst.msk [vmem:[%s121_s3 + $0x8] sm:$0xff] %vm16_vm0, %v61_v29 }

// kernel: transformer_forward.32
= control target key start
LH: loop header
LB: loop body
LE: loop exit
PB: predicated region body
PF: predicated region fallthrough
CT: control target
= control target key end

     0   :  { %s1501_s27 = smov 0   ;;  %s1503_s28 = smov 0   ;;  %s1654_s0 = inlined_call_operand.vmem [shape: bf16[2,4,8,8], index: 0, kind: input, shape index: {}]   ;;  %s1655_s1 = inlined_call_operand.vmem [shape: bf16[2,4,12,8], index: 1, kind: input, shape index: {}]   ;;  %s1656_s2 = inlined_call_operand.vmem [shape: bf16[2,4,12,8], index: 2, kind: input, shape index: {}]   ;;  %s1657_s3 = inlined_call_operand.vmem [shape: bf16[4,8,32], index: 3, kind: input, shape index: {}]   ;;  %s1658_s4 = inlined_call_operand.vmem [shape: f32[1,32], index: 4, kind: input, shape index: {}]   ;;  %s1659_s5 = inlined_call_operand.vmem [shape: f32[2,8,32], index: 5, kind: input, shape index: {}]   ;;  %s1660_s6 = inlined_call_operand.vmem [shape: f32[1,32], index: 6, kind: input, shape index: {}]   ;;  %s1661_s7 = inlined_call_operand.vmem [shape: f32[1,32], index: 7, kind: input, shape index: {}]   ;;  %s1662_s8 = inlined_call_operand.vmem [shape: f32[2,8,32], index: 8, kind: output, shape index: {}]  }
   0x1   :  { %s1505_s29 = smov 0  }
   0x2 LB: > { %s30_s30 = sadd.s32 1, %s1448_s28  ;;  %p1245_p0 = scmp.ge.s32.totalorder %s1452_s29, 1  ;;  %s1452_s29 = sphi %s1505_s29, %s18_s29   ;;  %s1448_s28 = sphi %s1503_s28, %s1664_s28   ;;  %s1444_s27 = sphi %s1501_s27, %s1663_s27  }
   0x3   : > { %p32_p1 = scmp.ge.s32.totalorder %s30_s30, 2  ;;  %p315_p2 = scmp.lt.s32.totalorder %s1452_s29, 3 }
   0x5   : > { %s1666_s30 = smov (%p32_p1, %s30_s30), 0  ;;  %p316_p3 = pnand %p1245_p0, %p315_p2 }
   0x6   : > { %p371_p4 = scmp.lt.s32.totalorder (!%p316_p3), %s1444_s27, 1 }
   0x7   : > { %319 = sbr.rel (%p316_p3) target bundleno = 1094 (0x446), region = 52 }
   0xc   : > { %v1454_v0 = vmov 0.0   ;;  %s1668_s27 = smov (!%p371_p4, %s1444_s27), 1  ;;  %vm1455_vm0 = vmmov 0   ;;  %vm429_vm1 = vcmask 64512   ;;  %vm629_vm2 = vcmask 97280  }
   0xd   : > { %1306 = vmatprep.subr.bf16.mxu0 %v1454_v0  ;;  %1312 = vmatprep.subr.bf16.mxu1 %v1454_v0  ;;  %s1280_s9 = sshll.u32 %s1668_s27, 5  ;;  %s1279_s13 = sshll.u32 %s1668_s27, 4  ;;  %vm678_vm3 = vcmask 1045504   ;;  %vm894_vm4 = vcmask 1043456   ;;  %vm1076_vm5 = vcmask 261120  }
   0xe   : > { %1308 = vmatprep.mubr.msk.bf16.mxu0 %vm1455_vm0, %v1454_v0  ;;  %1314 = vmatprep.mubr.msk.bf16.mxu1 %vm1455_vm0, %v1454_v0  ;;  %s383_s12 = scalar_lea.vmem %s1655_s1, %s1280_s9  ;;  %s378_s16 = scalar_lea.vmem %s1654_s0, %s1279_s13 }
   0xf   : > { %v1404_v1 = vld [vmem:[%s383_s12] sm:$0x3f]   ;;  %v1405_v2 = vld [vmem:[%s383_s12 + $0x8] sm:$0x3f]   ;;  %v1406_v5 = vld [vmem:[%s383_s12 + $0x10] sm:$0x3f]   ;;  %s1541_s19 = scalar_lea.vmem %s1656_s2, %s1280_s9 }
  0x10   : > { %v434_v3 = vsel %vm429_vm1, %v1404_v1, 0  ;;  %v485_v4 = vsel %vm429_vm1, %v1405_v2, 0  ;;  %v404_v6 = vld [vmem:[%s378_s16] sm:$0xf]  ;;  %v1407_v7 = vld [vmem:[%s383_s12 + $0x18] sm:$0x3f]  }
  0x11   : > { %1307 = vmatpush3.bf16.xpose.msra.mxu0 %v434_v3  ;;  %1313 = vmatpush3.bf16.xpose.msra.mxu1 %v485_v4  ;;  %v405_v8 = vld [vmem:[%s378_s16 + $0x4] sm:$0xf]  ;;  %v536_v9 = vsel %vm429_vm1, %v1406_v5, 0  ;;  %v587_v10 = vsel %vm429_vm1, %v1407_v7, 0  ;;  %v406_v11 = vld [vmem:[%s378_s16 + $0x8] sm:$0xf] }
  0x12   : > { %1318 = vmatprep.subr.bf16.mxu0 %v1454_v0  ;;  %1324 = vmatprep.subr.bf16.mxu1 %v1454_v0  ;;  %v407_v12 = vld [vmem:[%s378_s16 + $0xc] sm:$0xf]  ;;  %v1408_v33 = vld [vmem:[%s1541_s19] sm:$0x3f]   ;;  %v1410_v49 = vld [vmem:[%s1541_s19 + $0x10] sm:$0x3f]  }
  0x13   : > { %v1409_v34 = vld [vmem:[%s1541_s19 + $0x8] sm:$0x3f]   ;;  %v680_v35 = vsel %vm678_vm3, %v1408_v33, 0  ;;  %v782_v53 = vsel %vm678_vm3, %v1410_v49, 0  ;;  %v1411_v54 = vld [vmem:[%s1541_s19 + $0x18] sm:$0x3f]  }
  0x14   : > { %v731_v36 = vsel %vm678_vm3, %v1409_v34, 0  ;;  %v833_v58 = vsel %vm678_vm3, %v1411_v54, 0  ;;  %v887_v2 = vld [vmem:[%s1657_s3] sm:$0xf]  ;;  %v888_v4 = vld [vmem:[%s1657_s3 + $0x4] sm:$0xf] }
  0x15   : > { %v896_v3 = vsel %vm894_vm4, %v887_v2, 0  ;;  %v942_v5 = vsel %vm894_vm4, %v888_v4, 0  ;;  %s1252_s10 = sshll.u32 %s1668_s27, 3 }
  0x16   : > { %s395_s13 = scalar_lea.vmem %s1659_s5, %s1252_s10  ;;  %s402_s22 = scalar_lea.vmem %s1662_s8, %s1252_s10 }
  0x18   : > { %1309 = vmatmul.mubr.msk.bf16.vlgmr.msra.gmra.mxu0 %vm429_vm1, %v404_v6  ;;  %1315 = vmatmul.mubr.msk.bf16.vlgmr.msra.gmra.mxu1 %vm429_vm1, %v405_v8 }
  0x19   : > { %1319 = vmatpush3.bf16.xpose.msra.mxu0 %v536_v9  ;;  %1325 = vmatpush3.bf16.xpose.msra.mxu1 %v587_v10 }
  0x1a   : > { %1320 = vmatprep.mubr.msk.bf16.mxu0 %vm1455_vm0, %v1454_v0  ;;  %1326 = vmatprep.mubr.msk.bf16.mxu1 %vm1455_vm0, %v1454_v0 }
  0x1b   : > { %1330 = vmatprep.subr.bf16.mxu0 %v1454_v0  ;;  %1336 = vmatprep.subr.bf16.mxu1 %v1454_v0 }
  0x20   : > { %1321 = vmatmul.mubr.msk.bf16.vlgmr.msra.gmra.mxu0 %vm429_vm1, %v406_v11  ;;  %1327 = vmatmul.mubr.msk.bf16.vlgmr.msra.gmra.mxu1 %vm429_vm1, %v407_v12  ;;  %v889_v12 = vld [vmem:[%s1657_s3 + $0x8] sm:$0xf] }
  0x21   : > { %1332 = vmatprep.mubr.msk.bf16.mxu0 %vm1455_vm0, %v1454_v0  ;;  %1338 = vmatprep.mubr.msk.bf16.mxu1 %vm1455_vm0, %v1454_v0 }
  0x22   : > { %1331 = vmatpush3.bf16.msra.mxu0 %v680_v35  ;;  %1337 = vmatpush3.bf16.msra.mxu1 %v731_v36 }
  0x23   : > { %1342 = vmatprep.subr.bf16.mxu0 %v1454_v0  ;;  %1348 = vmatprep.subr.bf16.mxu1 %v1454_v0 }
  0xd8   : > { %v470_v13 = vpop.f32.mrf.mxu0  ;;  %v521_v14 = vpop.f32.mrf.mxu1 }
  0xd9   : > { %v630_v15 = vsel %vm629_vm2, %v470_v13, -inf  ;;  %v633_v18 = vsel %vm629_vm2, %v521_v14, -inf }
  0xda   : > { %631 = vmax.xlane.f32.xlu0 %v630_v15  ;;  %v1310_v16 = vpop.f32.mrf.mxu0  ;;  %v1316_v17 = vpop.f32.mrf.mxu1 }
  0xdb   : > { %v988_v16 = vsel %vm894_vm4, %v889_v12, 0 }
  0xdc   : > { %v473_v19 = vpop.f32.mrf.mxu0  ;;  %v524_v20 = vpop.f32.mrf.mxu1 }
  0xdd   : > { %v890_v20 = vld [vmem:[%s1657_s3 + $0xc] sm:$0xf] }
  0xde   : > { %634 = vmax.xlane.f32.xlu0 %v633_v18  ;;  %v1311_v21 = vpop.f32.mrf.mxu0  ;;  %v1317_v22 = vpop.f32.mrf.mxu1 }
  0xe0   : > { %v572_v23 = vpop.f32.mrf.mxu0  ;;  %v623_v24 = vpop.f32.mrf.mxu1 }
  0xe1   : > { %v636_v25 = vsel %vm629_vm2, %v572_v23, -inf  ;;  %v639_v28 = vsel %vm629_vm2, %v623_v24, -inf }
  0xe2   : > { %637 = vmax.xlane.f32.xlu1 %v636_v25  ;;  %v1322_v26 = vpop.f32.mrf.mxu0  ;;  %v1328_v27 = vpop.f32.mrf.mxu1  ;;  %v1034_v25 = vsel %vm894_vm4, %v890_v20, 0 }
  0xe4   : > { %v575_v29 = vpop.f32.mrf.mxu0  ;;  %v626_v30 = vpop.f32.mrf.mxu1 }
  0xe6   : > { %640 = vmax.xlane.f32.xlu1 %v639_v28  ;;  %v1323_v31 = vpop.f32.mrf.mxu0  ;;  %v1329_v32 = vpop.f32.mrf.mxu1 }
 0x163   : > { %v632_v37 = vpop.xlane.xlu0 %631 }
 0x164   : > { %v642_v38 = vsub.f32 %v470_v13, %v632_v37 }
 0x166   : > { %v646_v39 = vmul.f32 1.442695, %v642_v38 }
 0x167   : > { %v635_v40 = vpop.xlane.xlu0 %634 }
 0x168   : > { %1412 = vpow2.f32 %v646_v39  ;;  %v643_v41 = vsub.f32 %v521_v14, %v635_v40 }
 0x16a   : > { %v648_v42 = vmul.f32 1.442695, %v643_v41 }
 0x16b   : > { %v638_v43 = vpop.xlane.xlu1 %637 }
 0x16c   : > { %1414 = vpow2.f32 %v648_v42  ;;  %v644_v44 = vsub.f32 %v572_v23, %v638_v43 }
 0x16e   : > { %v650_v45 = vmul.f32 1.442695, %v644_v44 }
 0x16f   : > { %v641_v46 = vpop.xlane.xlu1 %640 }
 0x170   : > { %1416 = vpow2.f32 %v650_v45  ;;  %v645_v47 = vsub.f32 %v623_v24, %v641_v46 }
 0x172   : > { %v652_v48 = vmul.f32 1.442695, %v645_v47 }
 0x174   : > { %1418 = vpow2.f32 %v652_v48 }
 0x175   : > { %v1413_v50 = vpop.eup %1412 }
 0x176   : > { %v654_v51 = vsel %vm629_vm2, %v1413_v50, 0.0  ;;  %v666_v52 = vpack.c.bf16 %v1413_v50, %v1413_v50 }
 0x177   : > { %655 = vadd.xlane.f32.xlu0 %v654_v51 }
 0x178   : > { %1333 = vmatmul.mubr.msk.bf16.vlgmr.msra.gmra.mxu0 %vm629_vm2, %v666_v52 }
 0x179   : > { %v1415_v55 = vpop.eup %1414  ;;  %1343 = vmatpush3.bf16.msra.mxu0 %v782_v53  ;;  %1344 = vmatprep.mubr.msk.bf16.mxu0 %vm1455_vm0, %v1454_v0 }
 0x17a   : > { %v657_v56 = vsel %vm629_vm2, %v1415_v55, 0.0  ;;  %v667_v57 = vpack.c.bf16 %v1415_v55, %v1415_v55  ;;  %1354 = vmatprep.subr.bf16.mxu0 %v1454_v0 }
 0x17b   : > { %658 = vadd.xlane.f32.xlu1 %v657_v56 }
 0x17c   : > { %1339 = vmatmul.mubr.msk.bf16.vlgmr.msra.gmra.mxu1 %vm629_vm2, %v667_v57 }
 0x17d   : > { %v1417_v59 = vpop.eup %1416  ;;  %1349 = vmatpush3.bf16.msra.mxu1 %v833_v58  ;;  %1350 = vmatprep.mubr.msk.bf16.mxu1 %vm1455_vm0, %v1454_v0 }
 0x17e   : > { %v660_v60 = vsel %vm629_vm2, %v1417_v59, 0.0  ;;  %v668_v61 = vpack.c.bf16 %v1417_v59, %v1417_v59  ;;  %1360 = vmatprep.subr.bf16.mxu1 %v1454_v0  ;;  %v1274_v59 = vld [vmem:[%s1658_s4] ss:$0 sm:$0xff] }
 0x17f   : > { %661 = vadd.xlane.f32.xlu0 %v660_v60 }
 0x180   : > { %1345 = vmatmul.mubr.msk.bf16.vlgmr.msra.gmra.mxu0 %vm629_vm2, %v668_v61 }
 0x181   : > { %v1419_v62 = vpop.eup %1418  ;;  %1356 = vmatprep.mubr.msk.bf16.mxu0 %vm1455_vm0, %v1454_v0  ;;  %1355 = vmatpush3.bf16.msra.mxu0 %v896_v3 }
 0x182   : > { %v663_v63 = vsel %vm629_vm2, %v1419_v62, 0.0  ;;  %v669_v1 = vpack.c.bf16 %v1419_v62, %v1419_v62  ;;  %1366 = vmatprep.subr.bf16.mxu0 %v1454_v0 }
 0x183   : > { %664 = vadd.xlane.f32.xlu1 %v663_v63  ;;  %v1092_v63 = vld [vmem:[%s395_s13] sm:$0xff] }
 0x184   : > { %1351 = vmatmul.mubr.msk.bf16.vlgmr.msra.gmra.mxu1 %vm629_vm2, %v669_v1 }
 0x185   : > { %1362 = vmatprep.mubr.msk.bf16.mxu1 %vm1455_vm0, %v1454_v0  ;;  %1361 = vmatpush3.bf16.msra.mxu1 %v942_v5 }
 0x186   : > { %1372 = vmatprep.subr.bf16.mxu1 %v1454_v0 }
 0x200   : > { %v656_v6 = vpop.xlane.xlu0 %655 }
 0x201   : > { %1420 = vrcp.f32 %v656_v6 }
 0x204   : > { %v659_v7 = vpop.xlane.xlu1 %658 }
 0x205   : > { %1422 = vrcp.f32 %v659_v7 }
 0x208   : > { %v662_v8 = vpop.xlane.xlu0 %661 }
 0x209   : > { %1424 = vrcp.f32 %v662_v8 }
 0x20c   : > { %v665_v9 = vpop.xlane.xlu1 %664 }
 0x20d   : > { %1426 = vrcp.f32 %v665_v9 }
 0x20e   : > { %v1421_v10 = vpop.eup %1420 }
 0x212   : > { %v1423_v17 = vpop.eup %1422 }
 0x216   : > { %v1425_v26 = vpop.eup %1424 }
 0x21a   : > { %v1427_v33 = vpop.eup %1426 }
 0x238   : > { %v716_v11 = vpop.f32.mrf.mxu0 }
 0x239   : > { %v879_v13 = vmul.f32 %v1421_v10, %v716_v11 }
 0x23a   : > { %v1334_v14 = vpop.f32.mrf.mxu0 }
 0x23b   : > { %v883_v15 = vpack.c.bf16 %v879_v13, %v879_v13 }
 0x23c   : > { %v719_v18 = vpop.f32.mrf.mxu0  ;;  %v767_v19 = vpop.f32.mrf.mxu1 }
 0x23d   : > { %v880_v21 = vmul.f32 %v1423_v17, %v767_v19  ;;  %1357 = vmatmul.mubr.msk.bf16.vlgmr.msra.gmra.mxu0 %vm429_vm1, %v883_v15  ;;  %v1275_v15 = vld [vmem:[%s1660_s6] ss:$0 sm:$0xff] }
 0x23e   : > { %v1335_v22 = vpop.f32.mrf.mxu0  ;;  %v1340_v23 = vpop.f32.mrf.mxu1  ;;  %1367 = vmatpush3.bf16.msra.mxu0 %v988_v16  ;;  %1368 = vmatprep.mubr.msk.bf16.mxu0 %vm1455_vm0, %v1454_v0  ;;  %v1276_v17 = vld [vmem:[%s1661_s7] ss:$0 sm:$0xff] }
 0x23f   : > { %v884_v24 = vpack.c.bf16 %v880_v21, %v880_v21 }
 0x240   : > { %v770_v27 = vpop.f32.mrf.mxu1  ;;  %v818_v28 = vpop.f32.mrf.mxu0 }
 0x241   : > { %v881_v29 = vmul.f32 %v1425_v26, %v818_v28  ;;  %1363 = vmatmul.mubr.msk.bf16.vlgmr.msra.gmra.mxu1 %vm429_vm1, %v884_v24 }
 0x242   : > { %v1341_v30 = vpop.f32.mrf.mxu1  ;;  %v1346_v31 = vpop.f32.mrf.mxu0  ;;  %1373 = vmatpush3.bf16.msra.mxu1 %v1034_v25  ;;  %1374 = vmatprep.mubr.msk.bf16.mxu1 %vm1455_vm0, %v1454_v0 }
 0x243   : > { %v885_v32 = vpack.c.bf16 %v881_v29, %v881_v29 }
 0x244   : > { %v821_v34 = vpop.f32.mrf.mxu0  ;;  %v869_v35 = vpop.f32.mrf.mxu1 }
 0x245   : > { %v882_v36 = vmul.f32 %v1427_v33, %v869_v35  ;;  %1369 = vmatmul.mubr.msk.bf16.vlgmr.msra.gmra.mxu0 %vm429_vm1, %v885_v32 }
 0x246   : > { %v1347_v37 = vpop.f32.mrf.mxu0  ;;  %v1352_v38 = vpop.f32.mrf.mxu1 }
 0x247   : > { %v886_v39 = vpack.c.bf16 %v882_v36, %v882_v36 }
 0x248   : > { %v872_v40 = vpop.f32.mrf.mxu1 }
 0x249   : > { %1375 = vmatmul.mubr.msk.bf16.vlgmr.msra.gmra.mxu1 %vm429_vm1, %v886_v39 }
 0x24a   : > { %v1353_v41 = vpop.f32.mrf.mxu1 }
 0x2fd   : > { %v932_v42 = vpop.f32.mrf.mxu0 }
 0x2fe   : > { %v1077_v50 = vsel %vm1076_vm5, %v932_v42, 0.0 }
 0x2ff   : > { %v1358_v43 = vpop.f32.mrf.mxu0 }
 0x301   : > { %v935_v44 = vpop.f32.mrf.mxu0  ;;  %v978_v45 = vpop.f32.mrf.mxu1 }
 0x302   : > { %v1078_v47 = vsel %vm1076_vm5, %v978_v45, 0.0 }
 0x303   : > { %v1359_v0 = vpop.f32.mrf.mxu0  ;;  %v1364_v46 = vpop.f32.mrf.mxu1  ;;  %v1079_v52 = vadd.f32 %v1078_v47, %v1077_v50 }
 0x305   : > { %v981_v48 = vpop.f32.mrf.mxu1  ;;  %v1024_v49 = vpop.f32.mrf.mxu0 }
 0x306   : > { %v1080_v51 = vsel %vm1076_vm5, %v1024_v49, 0.0 }
 0x307   : > { %v1365_v53 = vpop.f32.mrf.mxu1  ;;  %v1370_v54 = vpop.f32.mrf.mxu0  ;;  %v1081_v55 = vadd.f32 %v1080_v51, %v1079_v52 }
 0x309   : > { %v1027_v56 = vpop.f32.mrf.mxu0  ;;  %v1070_v57 = vpop.f32.mrf.mxu1 }
 0x30a   : > { %v1082_v58 = vsel %vm1076_vm5, %v1070_v57, 0.0 }
 0x30b   : > { %v1083_v60 = vadd.f32 %v1082_v58, %v1081_v55  ;;  %v1371_v61 = vpop.f32.mrf.mxu0  ;;  %v1376_v62 = vpop.f32.mrf.mxu1 }
 0x30d   : > { %v1091_v1 = vadd.f32 %v1274_v59, %v1083_v60  ;;  %v1073_v2 = vpop.f32.mrf.mxu1 }
 0x30f   : > { %v1377_v3 = vpop.f32.mrf.mxu1  ;;  %v1093_v4 = vadd.f32 %v1092_v63, %v1091_v1 }
 0x311   : > { %v1094_v5 = vsel %vm1076_vm5, %v1093_v4, 0.0 }
 0x312   : > { %1095 = vadd.xlane.f32.xlu0 %v1094_v5 }
 0x39b   : > { %v1096_v6 = vpop.xlane.xlu0 %1095 }
 0x39c   : > { %v1098_v7 = vmul.f32 0.03125, %v1096_v6 }
 0x39e   : > { %v1099_v8 = vsub.f32 %v1093_v4, %v1098_v7 }
 0x3a0   : > { %v1100_v9 = vmul.f32 %v1099_v8, %v1099_v8 }
 0x3a2   : > { %v1101_v10 = vsel %vm1076_vm5, %v1100_v9, 0.0 }
 0x3a3   : > { %1102 = vadd.xlane.f32.xlu1 %v1101_v10 }
 0x42c   : > { %v1103_v11 = vpop.xlane.xlu1 %1102 }
 0x42d   : > { %v1104_v12 = vmul.f32 0.03125, %v1103_v11 }
 0x42f   : > { %v1105_v13 = vadd.f32 1e-05, %v1104_v12 }
 0x431   : > { %1428 = vrsqrt.f32 %v1105_v13 }
 0x43e   : > { %v1429_v14 = vpop.eup %1428 }
 0x43f   : > { %v1107_v16 = vmul.f32 %v1429_v14, %v1099_v8 }
 0x441   : > { %v1115_v18 = vmul.f32 %v1275_v15, %v1107_v16 }
 0x443   : > { %v1123_v19 = vadd.f32 %v1276_v17, %v1115_v18 }
 0x445   : > { %1124 = vst.msk [vmem:[%s402_s22] sm:$0xff] %vm1076_vm5, %v1123_v19 }
 0x446 PF: > { %s18_s29 = sadd.s32 1, %s1452_s29   ;;  %s1663_s27 = smov %s1448_s28 }
 0x447   : > { %p15_p5 = scmp.ge.s32.totalorder %s18_s29, 4   ;;  %s1664_s28 = smov %s1666_s30 }
 0x449   :  { %17 = sbr.rel (!%p15_p5) target bundleno = 2 (0x2), region = 91 }

// kernel: transformer_forward.41
= control target key start
LH: loop header
LB: loop body
LE: loop exit
PB: predicated region body
PF: predicated region fallthrough
CT: control target
= control target key end

     0   :  { %vm19_vm0 = vcmask 130048   ;;  %v132_v0 = vmov 0.0   ;;  %vm133_vm1 = vmmov 0   ;;  %vm43_vm2 = vcmask 261120   ;;  %s181_s1 = inlined_call_operand.vmem [shape: bf16[32,16], index: 1, kind: input, shape index: {}]   ;;  %s182_s0 = inlined_call_operand.vmem [shape: f32[16,32], index: 0, kind: input, shape index: {}]   ;;  %s183_s2 = inlined_call_operand.vmem [shape: f32[1,16], index: 2, kind: input, shape index: {}]   ;;  %s184_s3 = inlined_call_operand.vmem [shape: f32[16,16], index: 3, kind: output, shape index: {}]  }
   0x1   :  { %120 = vmatprep.subr.bf16.mxu0 %v132_v0  ;;  %v130_v1 = vld [vmem:[%s181_s1 + $0x8] sm:$0xff]   ;;  %124 = vmatprep.mubr.msk.bf16.mxu0 %vm133_vm1, %v132_v0  ;;  %20 = vst.msk [vmem:[#allocation2] sm:$0xff] %vm19_vm0, %v132_v0  ;;  %21 = vst.msk [vmem:[#allocation2 + $0x8] sm:$0xff] %vm19_vm0, %v132_v0  ;;  %v131_v2 = vld [vmem:[%s181_s1] sm:$0xff]  }
   0x2   :  { %121 = vmatpush3.bf16.msra.mxu0 %v130_v1  ;;  %v24_v3 = vld [vmem:[%s182_s0] sm:$0xff]  ;;  %v25_v4 = vld [vmem:[%s182_s0 + $0x8] sm:$0xff] }
   0x3   :  { %122 = vmatprep.subr.bf16.mxu0 %v132_v0  ;;  %v26_v5 = vpack.c.bf16 %v25_v4, %v24_v3  ;;  %v116_v14 = vld [vmem:[%s183_s2] ss:$0 sm:$0xff] }
   0x6   :  { %123 = vmatpush3.bf16.msra.mxu0 %v131_v2 }
   0x8   :  { %v22_v6 = vld [vmem:[#allocation2] sm:$0xff]  ;;  %v23_v10 = vld [vmem:[#allocation2 + $0x8] sm:$0xff] }
   0x9   :  { %125 = vmatmul.mubr.msk.bf16.vlgmr.msra.gmra.mxu0 %vm43_vm2, %v26_v5 }
  0xc9   :  { %v81_v7 = vpop.f32.mrf.mxu0 }
  0xca   :  { %v88_v8 = vadd.f32 %v81_v7, %v22_v6 }
  0xcb   :  { %v126_v9 = vpop.f32.mrf.mxu0 }
  0xcc   :  { %91 = vst.msk [vmem:[#allocation2] sm:$0xff] %vm19_vm0, %v88_v8 }
  0xcd   :  { %v84_v11 = vpop.f32.mrf.mxu0 }
  0xce   :  { %v89_v12 = vadd.f32 %v84_v11, %v23_v10 }
  0xcf   :  { %v127_v13 = vpop.f32.mrf.mxu0 }
  0xd0   :  { %92 = vst.msk [vmem:[#allocation2 + $0x8] sm:$0xff] %vm19_vm0, %v89_v12 }
  0xd3   :  { %v96_v15 = vld [vmem:[#allocation2] sm:$0xff] }
  0xd4   :  { %v105_v16 = vadd.f32 %v116_v14, %v96_v15 }
  0xd6   :  { %107 = vst.msk [vmem:[%s184_s3] sm:$0xff] %vm19_vm0, %v105_v16 }
  0xd7   :  { %v97_v17 = vld [vmem:[#allocation2 + $0x8] sm:$0xff] }
  0xd8   :  { %v106_v18 = vadd.f32 %v116_v14, %v97_v17 }
  0xda   :  { %108 = vst.msk [vmem:[%s184_s3 + $0x8] sm:$0xff] %vm19_vm0, %v106_v18 }

// kernel: transformer_forward.33
= control target key start
LH: loop header
LB: loop body
LE: loop exit
PB: predicated region body
PF: predicated region fallthrough
CT: control target
= control target key end

     0   :  { %v2596_v3 = vmov 0   ;;  %vm306_vm0 = vcmask 261120   ;;  %s3280_s1 = inlined_call_operand.vmem [shape: bf16[32,2048], index: 1, kind: input, shape index: {}]   ;;  %s3281_s0 = inlined_call_operand.vmem [shape: f32[16,32], index: 0, kind: input, shape index: {}]   ;;  %s3282_s3 = inlined_call_operand.vmem [shape: bf16[2048,32], index: 3, kind: input, shape index: {}]   ;;  %s3283_s2 = inlined_call_operand.vmem [shape: f32[1,2048], index: 2, kind: input, shape index: {}]   ;;  %s3284_s4 = inlined_call_operand.vmem [shape: f32[1,32], index: 4, kind: input, shape index: {}]   ;;  %s3285_s5 = inlined_call_operand.vmem [shape: f32[1,32], index: 5, kind: input, shape index: {}]   ;;  %s3286_s6 = inlined_call_operand.vmem [shape: f32[1,32], index: 6, kind: input, shape index: {}]   ;;  %s3287_s7 = inlined_call_operand.vmem [shape: f32[16,32], index: 7, kind: output, shape index: {}]  }
   0x1   :  { %v46_v0 = vld [vmem:[%s3280_s1 + $0x80] sm:$0xff]  ;;  %v47_v2 = vld [vmem:[%s3280_s1 + $0x88] sm:$0xff]  ;;  %342 = vmatprep.mubr.bf16.mxu0 %v2596_v3  ;;  %385 = vmatprep.mubr.bf16.mxu1 %v2596_v3  ;;  %v48_v16 = vld [vmem:[%s3280_s1 + $0x90] sm:$0xff] }
   0x2   :  { %v54_v1 = vld [vmem:[%s3280_s1 + $0xc0] sm:$0xff]  ;;  %v55_v5 = vld [vmem:[%s3280_s1 + $0xc8] sm:$0xff]  ;;  %v56_v17 = vld [vmem:[%s3280_s1 + $0xd0] sm:$0xff] }
   0x3   :  { %v2131_v4 = vcombine.high %v46_v0, %v54_v1  ;;  %v2130_v6 = vcombine.low %v46_v0, %v54_v1  ;;  %v30_v7 = vld [vmem:[%s3280_s1] sm:$0xff]  ;;  %v2133_v9 = vcombine.high %v47_v2, %v55_v5  ;;  %v2132_v10 = vcombine.low %v47_v2, %v55_v5  ;;  %v31_v12 = vld [vmem:[%s3280_s1 + $0x8] sm:$0xff]  ;;  %v49_v20 = vld [vmem:[%s3280_s1 + $0x98] sm:$0xff] }
   0x4   :  { %v38_v8 = vld [vmem:[%s3280_s1 + $0x40] sm:$0xff]  ;;  %v39_v13 = vld [vmem:[%s3280_s1 + $0x48] sm:$0xff]  ;;  %v57_v21 = vld [vmem:[%s3280_s1 + $0xd8] sm:$0xff]  ;;  %v2135_v23 = vcombine.high %v48_v16, %v56_v17  ;;  %v2134_v30 = vcombine.low %v48_v16, %v56_v17 }
   0x5   :  { %v2115_v11 = vcombine.high %v30_v7, %v38_v8  ;;  %322 = vmatprep.subr.bf16.mxu0 %v2131_v4  ;;  %v2117_v14 = vcombine.high %v31_v12, %v39_v13  ;;  %v27_v15 = vld [vmem:[%s3281_s0] sm:$0xff]  ;;  %365 = vmatprep.subr.bf16.mxu1 %v2133_v9  ;;  %v2114_v18 = vcombine.low %v30_v7, %v38_v8  ;;  %v28_v19 = vld [vmem:[%s3281_s0 + $0x8] sm:$0xff]  ;;  %v32_v25 = vld [vmem:[%s3280_s1 + $0x10] sm:$0xff] }
   0x6   :  { %323 = vmatpush1.bf16.msra.mxu0 %v2130_v6  ;;  %366 = vmatpush1.bf16.msra.mxu1 %v2132_v10  ;;  %v2116_v22 = vcombine.low %v31_v12, %v39_v13  ;;  %v2137_v24 = vcombine.high %v49_v20, %v57_v21  ;;  %v40_v26 = vld [vmem:[%s3280_s1 + $0x50] sm:$0xff]  ;;  %v2687_v27 = vpack.c.bf16 %v28_v19, %v27_v15  ;;  %v33_v28 = vld [vmem:[%s3280_s1 + $0x18] sm:$0xff]  ;;  %v50_v34 = vld [vmem:[%s3280_s1 + $0xa0] sm:$0xff] }
   0x7   :  { %324 = vmatprep.subr.bf16.mxu0 %v2115_v11  ;;  %367 = vmatprep.subr.bf16.mxu1 %v2117_v14  ;;  %v41_v29 = vld [vmem:[%s3280_s1 + $0x58] sm:$0xff]  ;;  %v2136_v31 = vcombine.low %v49_v20, %v57_v21  ;;  %v2119_v32 = vcombine.high %v32_v25, %v40_v26  ;;  %v58_v35 = vld [vmem:[%s3280_s1 + $0xe0] sm:$0xff]  ;;  %v51_v36 = vld [vmem:[%s3280_s1 + $0xa8] sm:$0xff]  ;;  %v2118_v38 = vcombine.low %v32_v25, %v40_v26 }
   0x8   :  { %v2121_v33 = vcombine.high %v33_v28, %v41_v29  ;;  %v59_v37 = vld [vmem:[%s3280_s1 + $0xe8] sm:$0xff]  ;;  %v34_v39 = vld [vmem:[%s3280_s1 + $0x20] sm:$0xff]  ;;  %v2120_v40 = vcombine.low %v33_v28, %v41_v29  ;;  %v2139_v41 = vcombine.high %v50_v34, %v58_v35  ;;  %v2138_v46 = vcombine.low %v50_v34, %v58_v35  ;;  %v52_v47 = vld [vmem:[%s3280_s1 + $0xb0] sm:$0xff] }
   0x9   :  { %v42_v42 = vld [vmem:[%s3280_s1 + $0x60] sm:$0xff]  ;;  %v2141_v43 = vcombine.high %v51_v36, %v59_v37  ;;  %v35_v44 = vld [vmem:[%s3280_s1 + $0x28] sm:$0xff]  ;;  %v2140_v48 = vcombine.low %v51_v36, %v59_v37  ;;  %v60_v50 = vld [vmem:[%s3280_s1 + $0xf0] sm:$0xff] }
   0xa   :  { %325 = vmatpush1.bf16.msra.mxu0 %v2114_v18  ;;  %368 = vmatpush1.bf16.msra.mxu1 %v2116_v22  ;;  %v43_v45 = vld [vmem:[%s3280_s1 + $0x68] sm:$0xff]  ;;  %v2123_v49 = vcombine.high %v34_v39, %v42_v42  ;;  %v53_v52 = vld [vmem:[%s3280_s1 + $0xb8] sm:$0xff]  ;;  %v2122_v54 = vcombine.low %v34_v39, %v42_v42  ;;  %v36_v55 = vld [vmem:[%s3280_s1 + $0x30] sm:$0xff]  ;;  %v2143_v57 = vcombine.high %v52_v47, %v60_v50 }
   0xb   :  { %408 = vmatprep.subr.bf16.mxu0 %v2135_v23  ;;  %451 = vmatprep.subr.bf16.mxu1 %v2137_v24  ;;  %v2125_v51 = vcombine.high %v35_v44, %v43_v45  ;;  %v61_v53 = vld [vmem:[%s3280_s1 + $0xf8] sm:$0xff]  ;;  %v2124_v56 = vcombine.low %v35_v44, %v43_v45  ;;  %v44_v58 = vld [vmem:[%s3280_s1 + $0x70] sm:$0xff]  ;;  %v2142_v62 = vcombine.low %v52_v47, %v60_v50  ;;  %v2470_v12 = vld [vmem:[%s3282_s3 + $0x68] sm:$0xff]  }
   0xc   :  { %v2145_v59 = vcombine.high %v53_v52, %v61_v53  ;;  %v37_v60 = vld [vmem:[%s3280_s1 + $0x38] sm:$0xff]  ;;  %v2144_v63 = vcombine.low %v53_v52, %v61_v53  ;;  %v2127_v0 = vcombine.high %v36_v55, %v44_v58  ;;  %v2126_v2 = vcombine.low %v36_v55, %v44_v58  ;;  %v2466_v9 = vld [vmem:[%s3282_s3 + $0x70] sm:$0xff]   ;;  %v2471_v13 = vld [vmem:[%s3282_s3 + $0xe8] sm:$0xff]  }
   0xd   :  { %2146 = vmatmul.mubr.msk.bf16.vlgmr.msra.gmra.mxu0 %vm306_vm0, %v2687_v27  ;;  %2147 = vmatmul.mubr.msk.bf16.vlgmr.msra.gmra.mxu1 %vm306_vm0, %v2687_v27  ;;  %v45_v61 = vld [vmem:[%s3280_s1 + $0x78] sm:$0xff]  ;;  %v2467_v10 = vld [vmem:[%s3282_s3 + $0xf0] sm:$0xff]   ;;  %v2472_v14 = vld [vmem:[%s3282_s3 + $0x28] sm:$0xff]  }
   0xe   :  { %409 = vmatpush1.bf16.msra.mxu0 %v2134_v30  ;;  %452 = vmatpush1.bf16.msra.mxu1 %v2136_v31  ;;  %v2129_v1 = vcombine.high %v37_v60, %v45_v61  ;;  %v2462_v4 = vld [vmem:[%s3282_s3 + $0x78] sm:$0xff]   ;;  %v2128_v5 = vcombine.low %v37_v60, %v45_v61  ;;  %v2469_v11 = vld [vmem:[%s3282_s3 + $0xb0] sm:$0xff]   ;;  %v2473_v15 = vld [vmem:[%s3282_s3 + $0xa8] sm:$0xff]  }
   0xf   :  { %410 = vmatprep.subr.bf16.mxu0 %v2119_v32  ;;  %453 = vmatprep.subr.bf16.mxu1 %v2121_v33  ;;  %v2463_v6 = vld [vmem:[%s3282_s3 + $0xf8] sm:$0xff]   ;;  %v2474_v16 = vld [vmem:[%s3282_s3 + $0x60] sm:$0xff]   ;;  %v2482_v24 = vld [vmem:[%s3282_s3 + $0x50] sm:$0xff]  }
  0x10   :  { %428 = vmatprep.mubr.bf16.mxu0 %v2596_v3  ;;  %471 = vmatprep.mubr.bf16.mxu1 %v2596_v3  ;;  %v2464_v7 = vld [vmem:[%s3282_s3 + $0x38] sm:$0xff]   ;;  %v2475_v17 = vld [vmem:[%s3282_s3 + $0xe0] sm:$0xff]   ;;  %v2483_v25 = vld [vmem:[%s3282_s3 + $0xd0] sm:$0xff]  }
  0x11   :  { %v2465_v8 = vld [vmem:[%s3282_s3 + $0xb8] sm:$0xff]   ;;  %v2476_v18 = vld [vmem:[%s3282_s3 + $0x20] sm:$0xff]   ;;  %v2484_v26 = vld [vmem:[%s3282_s3 + $0x10] sm:$0xff]  }
  0x12   :  { %411 = vmatpush1.bf16.msra.mxu0 %v2118_v38  ;;  %454 = vmatpush1.bf16.msra.mxu1 %v2120_v40  ;;  %v2477_v19 = vld [vmem:[%s3282_s3 + $0xa0] sm:$0xff]   ;;  %v2478_v20 = vld [vmem:[%s3282_s3 + $0x58] sm:$0xff]   ;;  %v2486_v28 = vld [vmem:[%s3282_s3 + $0x48] sm:$0xff]   ;;  %v66_v38 = vlaneseq }
  0x13   :  { %494 = vmatprep.subr.bf16.mxu0 %v2139_v41  ;;  %537 = vmatprep.subr.bf16.mxu1 %v2141_v43  ;;  %v2479_v21 = vld [vmem:[%s3282_s3 + $0xd8] sm:$0xff]   ;;  %v2487_v29 = vld [vmem:[%s3282_s3 + $0xc8] sm:$0xff]   ;;  %v2490_v32 = vld [vmem:[%s3282_s3 + $0x40] sm:$0xff]  }
  0x14   :  { %v2480_v22 = vld [vmem:[%s3282_s3 + $0x18] sm:$0xff]   ;;  %v2488_v30 = vld [vmem:[%s3282_s3 + $0x8] sm:$0xff]   ;;  %v2491_v33 = vld [vmem:[%s3282_s3 + $0xc0] sm:$0xff]   ;;  %v2867_v39 = vshrl.u32 %v66_v38, 7 }
  0x15   :  { %2148 = vmatmul.mubr.msk.bf16.vlgmr.msra.gmra.mxu0 %vm306_vm0, %v2687_v27  ;;  %2149 = vmatmul.mubr.msk.bf16.vlgmr.msra.gmra.mxu1 %vm306_vm0, %v2687_v27  ;;  %v2481_v23 = vld [vmem:[%s3282_s3 + $0x98] sm:$0xff]   ;;  %v2489_v31 = vld [vmem:[%s3282_s3 + $0x88] sm:$0xff]   ;;  %v2492_v34 = vld [vmem:[%s3282_s3] sm:$0xff]  }
  0x16   :  { %495 = vmatpush1.bf16.msra.mxu0 %v2138_v46  ;;  %538 = vmatpush1.bf16.msra.mxu1 %v2140_v48  ;;  %v2493_v35 = vld [vmem:[%s3282_s3 + $0x80] sm:$0xff]   ;;  %v2494_v36 = vld [vmem:[%s3282_s3 + $0x178] sm:$0xff]   ;;  %v72_v40 = vsub.s32 1, %v2867_v39  ;;  %v68_v41 = vsub.s32 0, %v2867_v39  ;;  %v80_v42 = vsub.s32 3, %v2867_v39  ;;  %v76_v44 = vsub.s32 2, %v2867_v39 }
  0x17   :  { %496 = vmatprep.subr.bf16.mxu0 %v2123_v49  ;;  %539 = vmatprep.subr.bf16.mxu1 %v2125_v51  ;;  %v2495_v37 = vld [vmem:[%s3282_s3 + $0x1f8] sm:$0xff]   ;;  %v2875_v43 = vld [vmem:[%s3283_s2] sm:$0xff]  ;;  %v88_v53 = vsub.s32 5, %v2867_v39  ;;  %v96_v55 = vsub.s32 7, %v2867_v39  ;;  %v2503_v38 = vld [vmem:[%s3282_s3 + $0x1e8] sm:$0xff]  }
  0x18   :  { %514 = vmatprep.mubr.bf16.mxu0 %v2596_v3  ;;  %557 = vmatprep.mubr.bf16.mxu1 %v2596_v3  ;;  %v73_v47 = vrot.slane %v2875_v43, %v72_v40  ;;  %v69_v48 = vrot.slane %v2875_v43, %v68_v41  ;;  %v81_v50 = vrot.slane %v2875_v43, %v80_v42 }
  0x19   :  { %v77_v51 = vrot.slane %v2875_v43, %v76_v44 }
  0x1a   :  { %497 = vmatpush1.bf16.msra.mxu0 %v2122_v54  ;;  %540 = vmatpush1.bf16.msra.mxu1 %v2124_v56 }
  0x1b   :  { %580 = vmatprep.subr.bf16.mxu0 %v2143_v57  ;;  %623 = vmatprep.subr.bf16.mxu1 %v2145_v59 }
  0x1d   :  { %2150 = vmatmul.mubr.msk.bf16.vlgmr.msra.gmra.mxu0 %vm306_vm0, %v2687_v27  ;;  %2151 = vmatmul.mubr.msk.bf16.vlgmr.msra.gmra.mxu1 %vm306_vm0, %v2687_v27 }
  0x1e   :  { %581 = vmatpush1.bf16.msra.mxu0 %v2142_v62  ;;  %624 = vmatpush1.bf16.msra.mxu1 %v2144_v63 }
  0x1f   :  { %582 = vmatprep.subr.bf16.mxu0 %v2127_v0  ;;  %625 = vmatprep.subr.bf16.mxu1 %v2129_v1 }
  0x20   :  { %600 = vmatprep.mubr.bf16.mxu0 %v2596_v3  ;;  %643 = vmatprep.mubr.bf16.mxu1 %v2596_v3  ;;  %v2468_v3 = vld [vmem:[%s3282_s3 + $0x30] sm:$0xff]  }
  0x22   :  { %583 = vmatpush1.bf16.msra.mxu0 %v2126_v2  ;;  %626 = vmatpush1.bf16.msra.mxu1 %v2128_v5  ;;  %v89_v2 = vrot.slane %v2875_v43, %v88_v53 }
  0x23   :  { %2285 = vmatprep.subr.bf16.mxu0 %v2462_v4  ;;  %2307 = vmatprep.subr.bf16.mxu1 %v2463_v6 }
  0x25   :  { %2152 = vmatmul.mubr.msk.bf16.vlgmr.msra.gmra.mxu0 %vm306_vm0, %v2687_v27  ;;  %2153 = vmatmul.mubr.msk.bf16.vlgmr.msra.gmra.mxu1 %vm306_vm0, %v2687_v27  ;;  %v2485_v27 = vld [vmem:[%s3282_s3 + $0x90] sm:$0xff]  }
  0x26   :  { %2286 = vmatpush3.bf16.msra.mxu0 %v2464_v7  ;;  %2308 = vmatpush3.bf16.msra.mxu1 %v2465_v8  ;;  %v97_v7 = vrot.slane %v2875_v43, %v96_v55 }
  0x27   :  { %2287 = vmatprep.subr.bf16.mxu0 %v2466_v9  ;;  %2309 = vmatprep.subr.bf16.mxu1 %v2467_v10 }
  0x2a   :  { %2288 = vmatpush3.bf16.msra.mxu0 %v2468_v3  ;;  %2310 = vmatpush3.bf16.msra.mxu1 %v2469_v11 }
  0x2b   :  { %2289 = vmatprep.subr.bf16.mxu0 %v2470_v12  ;;  %2311 = vmatprep.subr.bf16.mxu1 %v2471_v13 }
  0x2e   :  { %2290 = vmatpush3.bf16.msra.mxu0 %v2472_v14  ;;  %2312 = vmatpush3.bf16.msra.mxu1 %v2473_v15 }
  0x2f   :  { %2291 = vmatprep.subr.bf16.mxu0 %v2474_v16  ;;  %2313 = vmatprep.subr.bf16.mxu1 %v2475_v17  ;;  %v2496_v17 = vld [vmem:[%s3282_s3 + $0x138] sm:$0xff]  }
  0x32   :  { %2292 = vmatpush3.bf16.msra.mxu0 %v2476_v18  ;;  %2314 = vmatpush3.bf16.msra.mxu1 %v2477_v19 }
  0x33   :  { %2293 = vmatprep.subr.bf16.mxu0 %v2478_v20  ;;  %2315 = vmatprep.subr.bf16.mxu1 %v2479_v21 }
  0x36   :  { %2294 = vmatpush3.bf16.msra.mxu0 %v2480_v22  ;;  %2316 = vmatpush3.bf16.msra.mxu1 %v2481_v23  ;;  %v2497_v22 = vld [vmem:[%s3282_s3 + $0x1b8] sm:$0xff]   ;;  %v2498_v23 = vld [vmem:[%s3282_s3 + $0x170] sm:$0xff]  }
  0x37   :  { %2295 = vmatprep.subr.bf16.mxu0 %v2482_v24  ;;  %2317 = vmatprep.subr.bf16.mxu1 %v2483_v25 }
  0x3a   :  { %2296 = vmatpush3.bf16.msra.mxu0 %v2484_v26  ;;  %2318 = vmatpush3.bf16.msra.mxu1 %v2485_v27  ;;  %v2499_v27 = vld [vmem:[%s3282_s3 + $0x1f0] sm:$0xff]  }
  0x3b   :  { %2297 = vmatprep.subr.bf16.mxu0 %v2486_v28  ;;  %2319 = vmatprep.subr.bf16.mxu1 %v2487_v29 }
  0x3e   :  { %2298 = vmatpush3.bf16.msra.mxu0 %v2488_v30  ;;  %2320 = vmatpush3.bf16.msra.mxu1 %v2489_v31  ;;  %v2500_v30 = vld [vmem:[%s3282_s3 + $0x130] sm:$0xff]  }
  0x3f   :  { %2299 = vmatprep.subr.bf16.mxu0 %v2490_v32  ;;  %2321 = vmatprep.subr.bf16.mxu1 %v2491_v33 }
  0x42   :  { %2300 = vmatpush3.bf16.msra.mxu0 %v2492_v34  ;;  %2322 = vmatpush3.bf16.msra.mxu1 %v2493_v35  ;;  %v2501_v34 = vld [vmem:[%s3282_s3 + $0x1b0] sm:$0xff]   ;;  %v2502_v35 = vld [vmem:[%s3282_s3 + $0x168] sm:$0xff]  }
  0x43   :  { %2329 = vmatprep.subr.bf16.mxu0 %v2494_v36  ;;  %2351 = vmatprep.subr.bf16.mxu1 %v2495_v37 }
  0xcd   :  { %v344_v45 = vpop.f32.mrf.mxu0  ;;  %v387_v46 = vpop.f32.mrf.mxu1 }
  0xce   :  { %v345_v59 = vadd.f32 %v344_v45, %v69_v48  ;;  %v388_v63 = vadd.f32 %v387_v46, %v77_v51 }
  0xcf   :  { %v346_v49 = vpop.f32.mrf.mxu0  ;;  %v389_v52 = vpop.f32.mrf.mxu1 }
  0xd0   :  { %v347_v56 = vadd.f32 %v346_v49, %v73_v47  ;;  %v390_v60 = vadd.f32 %v389_v52, %v81_v50  ;;  %v654_v11 = vmax.f32 %v345_v59, 0.0  ;;  %v656_v15 = vmax.f32 %v388_v63, 0.0  ;;  %v2505_v49 = vld [vmem:[%s3282_s3 + $0x1a8] sm:$0xff]   ;;  %v2507_v52 = vld [vmem:[%s3282_s3 + $0x1e0] sm:$0xff]   ;;  %v2510_v59 = vld [vmem:[%s3282_s3 + $0x158] sm:$0xff]  }
  0xd1   :  { %v348_v54 = vpop.f32.mrf.mxu0  ;;  %v391_v58 = vpop.f32.mrf.mxu1 }
  0xd2   :  { %v349_v57 = vadd.f32 %v348_v54, %v69_v48  ;;  %v392_v61 = vadd.f32 %v391_v58, %v77_v51  ;;  %v655_v8 = vmax.f32 %v347_v56, 0.0  ;;  %v657_v12 = vmax.f32 %v390_v60, 0.0  ;;  %v2508_v56 = vld [vmem:[%s3282_s3 + $0x120] sm:$0xff]   ;;  %v2511_v60 = vld [vmem:[%s3282_s3 + $0x1d8] sm:$0xff]  }
  0xd3   :  { %v350_v62 = vpop.f32.mrf.mxu0  ;;  %v393_v1 = vpop.f32.mrf.mxu1  ;;  %v2509_v58 = vld [vmem:[%s3282_s3 + $0x1a0] sm:$0xff]  }
  0xd4   :  { %v351_v0 = vadd.f32 %v350_v62, %v73_v47  ;;  %v670_v4 = vmax.f32 %v349_v57, 0.0  ;;  %v394_v5 = vadd.f32 %v393_v1, %v81_v50  ;;  %v672_v9 = vmax.f32 %v392_v61, 0.0  ;;  %v2504_v47 = vld [vmem:[%s3282_s3 + $0x128] sm:$0xff]   ;;  %v2506_v50 = vld [vmem:[%s3282_s3 + $0x160] sm:$0xff]   ;;  %v2512_v62 = vld [vmem:[%s3282_s3 + $0x118] sm:$0xff]  }
  0xd5   :  { %v2895_v6 = vpop.f32.mrf.mxu0  ;;  %v2900_v3 = vpop.f32.mrf.mxu1  ;;  %v2513_v1 = vld [vmem:[%s3282_s3 + $0x198] sm:$0xff]  }
  0xd6   :  { %v671_v10 = vmax.f32 %v351_v0, 0.0  ;;  %v673_v13 = vmax.f32 %v394_v5, 0.0  ;;  %v686_v20 = vpack.c.bf16 %v670_v4, %v654_v11  ;;  %v688_v26 = vpack.c.bf16 %v672_v9, %v656_v15  ;;  %v2515_v5 = vld [vmem:[%s3282_s3 + $0x1d0] sm:$0xff]   ;;  %v2519_v15 = vld [vmem:[%s3282_s3 + $0x1c8] sm:$0xff]  }
  0xd7   :  { %v432_v14 = vpop.f32.mrf.mxu0  ;;  %v475_v19 = vpop.f32.mrf.mxu1  ;;  %v84_v0 = vsub.s32 4, %v2867_v39  ;;  %v92_v4 = vsub.s32 6, %v2867_v39  ;;  %v2516_v9 = vld [vmem:[%s3282_s3 + $0x110] sm:$0xff]   ;;  %v2585_v39 = vld [vmem:[%s3282_s3 + $0x388] sm:$0xff]  }
  0xd8   :  { %v687_v16 = vpack.c.bf16 %v671_v10, %v655_v8  ;;  %v433_v18 = vadd.f32 %v432_v14, %v89_v2  ;;  %v689_v21 = vpack.c.bf16 %v673_v13, %v657_v12  ;;  %v476_v25 = vadd.f32 %v475_v19, %v97_v7  ;;  %v2517_v12 = vld [vmem:[%s3282_s3 + $0x190] sm:$0xff]   ;;  %v2518_v13 = vld [vmem:[%s3282_s3 + $0x148] sm:$0xff]  }
  0xd9   :  { %v2911_v24 = vpop.f32.mrf.mxu0  ;;  %v2916_v28 = vpop.f32.mrf.mxu1  ;;  %v85_v11 = vrot.slane %v2875_v43, %v84_v0  ;;  %v93_v14 = vrot.slane %v2875_v43, %v92_v4  ;;  %v2520_v19 = vld [vmem:[%s3282_s3 + $0x108] sm:$0xff]  }
  0xda   :  { %1765 = vmatprep.mubr.bf16.mxu0 %v687_v16  ;;  %1806 = vmatprep.mubr.bf16.mxu1 %v689_v21  ;;  %v659_v31 = vmax.f32 %v433_v18, 0.0  ;;  %v661_v36 = vmax.f32 %v476_v25, 0.0 }
  0xdb   :  { %1766 = vmatmul.mubr.bf16.vlgmr.msra.gmra.mxu0 %v686_v20  ;;  %v436_v29 = vpop.f32.mrf.mxu0  ;;  %1807 = vmatmul.mubr.bf16.vlgmr.msra.gmra.mxu1 %v688_v26  ;;  %v479_v33 = vpop.f32.mrf.mxu1  ;;  %v431_v20 = vadd.f32 %v2895_v6, %v85_v11  ;;  %v435_v21 = vadd.f32 %v2911_v24, %v85_v11  ;;  %v2523_v6 = vld [vmem:[%s3282_s3 + $0x1c0] sm:$0xff]  }
  0xdc   :  { %2330 = vmatpush3.bf16.msra.mxu0 %v2496_v17  ;;  %v437_v32 = vadd.f32 %v436_v29, %v89_v2  ;;  %2352 = vmatpush3.bf16.msra.mxu1 %v2497_v22  ;;  %v480_v37 = vadd.f32 %v479_v33, %v97_v7  ;;  %v2514_v2 = vld [vmem:[%s3282_s3 + $0x150] sm:$0xff]   ;;  %v2975_v7 = vld [vmem:[%s3283_s2 + $0x8] sm:$0xff]  ;;  %v474_v22 = vadd.f32 %v2900_v3, %v93_v14  ;;  %v2524_v29 = vld [vmem:[%s3282_s3 + $0x100] sm:$0xff]  }
  0xdd   :  { %2331 = vmatprep.subr.bf16.mxu0 %v2498_v23  ;;  %2353 = vmatprep.subr.bf16.mxu1 %v2499_v27  ;;  %v2942_v54 = vpop.f32.mrf.mxu0  ;;  %v2947_v57 = vpop.f32.mrf.mxu1  ;;  %v105_v16 = vrot.slane %v2975_v7, %v72_v40  ;;  %v113_v17 = vrot.slane %v2975_v7, %v80_v42  ;;  %v2521_v40 = vld [vmem:[%s3282_s3 + $0x188] sm:$0xff]   ;;  %v2522_v42 = vld [vmem:[%s3282_s3 + $0x140] sm:$0xff]   ;;  %v478_v23 = vadd.f32 %v2916_v28, %v93_v14  ;;  %v2526_v28 = vld [vmem:[%s3282_s3 + $0x278] sm:$0xff]  }
  0xde   :  { %v675_v45 = vmax.f32 %v437_v32, 0.0  ;;  %v677_v46 = vmax.f32 %v480_v37, 0.0  ;;  %v2525_v3 = vld [vmem:[%s3282_s3 + $0x180] sm:$0xff]   ;;  %v660_v32 = vmax.f32 %v474_v22, 0.0  ;;  %v2550_v22 = vld [vmem:[%s3282_s3 + $0x248] sm:$0xff]  }
  0xdf   :  { %v518_v61 = vpop.f32.mrf.mxu0  ;;  %v561_v63 = vpop.f32.mrf.mxu1  ;;  %v676_v33 = vmax.f32 %v478_v23, 0.0  ;;  %v2541_v11 = vld [vmem:[%s3282_s3 + $0x2a0] sm:$0xff]   ;;  %v109_v23 = vrot.slane %v2975_v7, %v76_v44 }
  0xe0   :  { %2332 = vmatpush3.bf16.msra.mxu0 %v2500_v30  ;;  %v691_v48 = vpack.c.bf16 %v675_v45, %v659_v31  ;;  %2354 = vmatpush3.bf16.msra.mxu1 %v2501_v34  ;;  %v693_v51 = vpack.c.bf16 %v677_v46, %v661_v36  ;;  %v519_v24 = vadd.f32 %v518_v61, %v105_v16  ;;  %v658_v30 = vmax.f32 %v431_v20, 0.0  ;;  %v2527_v34 = vld [vmem:[%s3282_s3 + $0x2f8] sm:$0xff]   ;;  %v2536_v61 = vld [vmem:[%s3282_s3 + $0x228] sm:$0xff]   ;;  %v2548_v20 = vld [vmem:[%s3282_s3 + $0x210] sm:$0xff]  }
  0xe1   :  { %2333 = vmatprep.subr.bf16.mxu0 %v2502_v35  ;;  %2355 = vmatprep.subr.bf16.mxu1 %v2503_v38  ;;  %v2977_v8 = vpop.f32.mrf.mxu0  ;;  %v2982_v10 = vpop.f32.mrf.mxu1  ;;  %v562_v26 = vadd.f32 %v561_v63, %v113_v17  ;;  %v674_v31 = vmax.f32 %v435_v21, 0.0  ;;  %v2528_v45 = vld [vmem:[%s3282_s3 + $0x238] sm:$0xff]   ;;  %v2538_v63 = vld [vmem:[%s3282_s3 + $0x260] sm:$0xff]  }
  0xe2   :  { %1847 = vmatprep.mubr.bf16.mxu0 %v691_v48  ;;  %1888 = vmatprep.mubr.bf16.mxu1 %v693_v51  ;;  %v663_v35 = vmax.f32 %v519_v24, 0.0  ;;  %v2530_v48 = vld [vmem:[%s3282_s3 + $0x270] sm:$0xff]   ;;  %v129_v24 = vrot.slane %v2975_v7, %v96_v55  ;;  %v2554_v55 = vld [vmem:[%s3282_s3 + $0x240] sm:$0xff]  }
  0xe3   :  { %v522_v18 = vpop.f32.mrf.mxu0  ;;  %v565_v43 = vpop.f32.mrf.mxu1  ;;  %v665_v37 = vmax.f32 %v562_v26, 0.0  ;;  %v690_v46 = vpack.c.bf16 %v674_v31, %v658_v30  ;;  %v2552_v26 = vld [vmem:[%s3282_s3 + $0x208] sm:$0xff]   ;;  %v560_v30 = vadd.f32 %v2947_v57, %v109_v23  ;;  %v564_v31 = vadd.f32 %v2982_v10, %v109_v23  ;;  %v2557_v57 = vld [vmem:[%s3282_s3 + $0x280] sm:$0xff]   ;;  %v2558_v10 = vld [vmem:[%s3282_s3 + $0x378] sm:$0xff]  }
  0xe4   :  { %2334 = vmatpush3.bf16.msra.mxu0 %v2504_v47  ;;  %2356 = vmatpush3.bf16.msra.mxu1 %v2505_v49  ;;  %v523_v25 = vadd.f32 %v522_v18, %v105_v16  ;;  %v566_v27 = vadd.f32 %v565_v43, %v113_v17  ;;  %v2529_v47 = vld [vmem:[%s3282_s3 + $0x2b8] sm:$0xff]   ;;  %v692_v49 = vpack.c.bf16 %v676_v33, %v660_v32  ;;  %v2546_v18 = vld [vmem:[%s3282_s3 + $0x250] sm:$0xff]   ;;  %v2556_v33 = vld [vmem:[%s3282_s3 + $0x200] sm:$0xff]  }
  0xe5   :  { %2335 = vmatprep.subr.bf16.mxu0 %v2506_v50  ;;  %2357 = vmatprep.subr.bf16.mxu1 %v2507_v52  ;;  %v2531_v50 = vld [vmem:[%s3282_s3 + $0x2f0] sm:$0xff]   ;;  %v2545_v17 = vld [vmem:[%s3282_s3 + $0x298] sm:$0xff]  }
  0xe6   :  { %v679_v36 = vmax.f32 %v523_v25, 0.0  ;;  %v681_v38 = vmax.f32 %v566_v27, 0.0  ;;  %v2581_v23 = vld [vmem:[%s3282_s3 + $0x390] sm:$0xff]  }
  0xe8   :  { %2336 = vmatpush3.bf16.msra.mxu0 %v2508_v56  ;;  %2358 = vmatpush3.bf16.msra.mxu1 %v2509_v58  ;;  %v695_v51 = vpack.c.bf16 %v679_v36, %v663_v35  ;;  %v697_v52 = vpack.c.bf16 %v681_v38, %v665_v37  ;;  %v2532_v56 = vld [vmem:[%s3282_s3 + $0x230] sm:$0xff]   ;;  %v664_v36 = vmax.f32 %v560_v30, 0.0  ;;  %v680_v37 = vmax.f32 %v564_v31, 0.0  ;;  %v2559_v38 = vld [vmem:[%s3282_s3 + $0x3f8] sm:$0xff]  }
  0xe9   :  { %2337 = vmatprep.subr.bf16.mxu0 %v2510_v59  ;;  %2359 = vmatprep.subr.bf16.mxu1 %v2511_v60  ;;  %v2533_v58 = vld [vmem:[%s3282_s3 + $0x2b0] sm:$0xff]   ;;  %v2534_v59 = vld [vmem:[%s3282_s3 + $0x268] sm:$0xff]  }
  0xea   :  { %v2535_v60 = vld [vmem:[%s3282_s3 + $0x2e8] sm:$0xff]  }
  0xec   :  { %2338 = vmatpush3.bf16.msra.mxu0 %v2512_v62  ;;  %2360 = vmatpush3.bf16.msra.mxu1 %v2513_v1  ;;  %v2537_v62 = vld [vmem:[%s3282_s3 + $0x2a8] sm:$0xff]   ;;  %v2539_v1 = vld [vmem:[%s3282_s3 + $0x2e0] sm:$0xff]  }
  0xed   :  { %2339 = vmatprep.subr.bf16.mxu0 %v2514_v2  ;;  %2361 = vmatprep.subr.bf16.mxu1 %v2515_v5  ;;  %v3069_v2 = vpop.f32.mrf.mxu0  ;;  %v2540_v5 = vld [vmem:[%s3282_s3 + $0x220] sm:$0xff]  }
  0xef   :  { %v604_v14 = vpop.f32.mrf.mxu0 }
  0xf0   :  { %2340 = vmatpush3.bf16.msra.mxu0 %v2516_v9  ;;  %2362 = vmatpush3.bf16.msra.mxu1 %v2517_v12  ;;  %v3074_v9 = vpop.f32.mrf.mxu1  ;;  %v2542_v12 = vld [vmem:[%s3282_s3 + $0x258] sm:$0xff]  }
  0xf1   :  { %2341 = vmatprep.subr.bf16.mxu0 %v2518_v13  ;;  %2363 = vmatprep.subr.bf16.mxu1 %v2519_v15  ;;  %v2543_v13 = vld [vmem:[%s3282_s3 + $0x2d8] sm:$0xff]   ;;  %v3097_v43 = vpop.f32.mrf.mxu0 }
  0xf2   :  { %v2544_v15 = vld [vmem:[%s3282_s3 + $0x218] sm:$0xff]   ;;  %v647_v16 = vpop.f32.mrf.mxu1 }
  0xf3   :  { %v608_v25 = vpop.f32.mrf.mxu0 }
  0xf4   :  { %2342 = vmatpush3.bf16.msra.mxu0 %v2520_v19  ;;  %2364 = vmatpush3.bf16.msra.mxu1 %v2521_v40  ;;  %v2547_v19 = vld [vmem:[%s3282_s3 + $0x2d0] sm:$0xff]   ;;  %v3102_v21 = vpop.f32.mrf.mxu1  ;;  %v101_v40 = vrot.slane %v2975_v7, %v68_v41  ;;  %v121_v41 = vrot.slane %v2975_v7, %v88_v53  ;;  %v2553_v53 = vld [vmem:[%s3282_s3 + $0x288] sm:$0xff]  }
  0xf5   :  { %2343 = vmatprep.subr.bf16.mxu0 %v2522_v42  ;;  %2365 = vmatprep.subr.bf16.mxu1 %v2523_v6  ;;  %v2549_v42 = vld [vmem:[%s3282_s3 + $0x290] sm:$0xff]   ;;  %v2551_v6 = vld [vmem:[%s3282_s3 + $0x2c8] sm:$0xff]  }
  0xf6   :  { %v651_v44 = vpop.f32.mrf.mxu1  ;;  %v517_v27 = vadd.f32 %v2942_v54, %v101_v40  ;;  %v2555_v54 = vld [vmem:[%s3282_s3 + $0x2c0] sm:$0xff]  }
  0xf7   :  { %v652_v32 = vadd.f32 %v651_v44, %v129_v24 }
  0xf8   :  { %2344 = vmatpush3.bf16.msra.mxu0 %v2524_v29  ;;  %2366 = vmatpush3.bf16.msra.mxu1 %v2525_v3  ;;  %v521_v29 = vadd.f32 %v2977_v8, %v101_v40  ;;  %v605_v8 = vadd.f32 %v604_v14, %v121_v41  ;;  %v609_v3 = vadd.f32 %v608_v25, %v121_v41  ;;  %v2572_v14 = vld [vmem:[%s3282_s3 + $0x320] sm:$0xff]   ;;  %v2579_v40 = vld [vmem:[%s3282_s3 + $0x3d0] sm:$0xff]  }
  0xf9   :  { %2373 = vmatprep.subr.bf16.mxu0 %v2526_v28  ;;  %2395 = vmatprep.subr.bf16.mxu1 %v2527_v34  ;;  %v648_v28 = vadd.f32 %v647_v16, %v129_v24  ;;  %v662_v34 = vmax.f32 %v517_v27, 0.0  ;;  %v2574_v16 = vld [vmem:[%s3282_s3 + $0x358] sm:$0xff]   ;;  %v125_v41 = vrot.slane %v2975_v7, %v92_v4  ;;  %v2583_v24 = vld [vmem:[%s3282_s3 + $0x3c8] sm:$0xff]   ;;  %v2586_v4 = vld [vmem:[%s3282_s3 + $0x340] sm:$0xff]  }
  0xfa   :  { %v678_v35 = vmax.f32 %v521_v29, 0.0 }
  0xfb   :  { %1848 = vmatmul.mubr.bf16.vlgmr.msra.gmra.mxu0 %v690_v46  ;;  %1889 = vmatmul.mubr.bf16.vlgmr.msra.gmra.mxu1 %v692_v49  ;;  %v683_v46 = vmax.f32 %v609_v3, 0.0  ;;  %v2560_v49 = vld [vmem:[%s3282_s3 + $0x338] sm:$0xff]   ;;  %v650_v44 = vadd.f32 %v3102_v21, %v125_v41 }
  0xfc   :  { %2374 = vmatpush3.bf16.msra.mxu0 %v2528_v45  ;;  %2396 = vmatpush3.bf16.msra.mxu1 %v2529_v47  ;;  %v667_v45 = vmax.f32 %v605_v8, 0.0  ;;  %v669_v47 = vmax.f32 %v648_v28, 0.0 }
  0xfd   :  { %2375 = vmatprep.subr.bf16.mxu0 %v2530_v48  ;;  %2397 = vmatprep.subr.bf16.mxu1 %v2531_v50  ;;  %v685_v48 = vmax.f32 %v652_v32, 0.0  ;;  %v694_v50 = vpack.c.bf16 %v678_v35, %v662_v34  ;;  %v684_v21 = vmax.f32 %v650_v44, 0.0 }
  0xfe   :  { %1929 = vmatprep.mubr.bf16.mxu0 %v695_v51  ;;  %1970 = vmatprep.mubr.bf16.mxu1 %v697_v52  ;;  %v2561_v51 = vld [vmem:[%s3282_s3 + $0x3b8] sm:$0xff]   ;;  %v2562_v52 = vld [vmem:[%s3282_s3 + $0x370] sm:$0xff]  }
 0x100   :  { %2376 = vmatpush3.bf16.msra.mxu0 %v2532_v56  ;;  %2398 = vmatpush3.bf16.msra.mxu1 %v2533_v58  ;;  %v696_v56 = vpack.c.bf16 %v680_v37, %v664_v36  ;;  %v2563_v58 = vld [vmem:[%s3282_s3 + $0x3f0] sm:$0xff]  }
 0x101   :  { %2377 = vmatprep.subr.bf16.mxu0 %v2534_v59  ;;  %2399 = vmatprep.subr.bf16.mxu1 %v2535_v60  ;;  %v699_v59 = vpack.c.bf16 %v683_v46, %v667_v45  ;;  %v701_v60 = vpack.c.bf16 %v685_v48, %v669_v47  ;;  %v2154_v47 = vld [vmem:[%s3284_s4] ss:$0 sm:$0xff] }
 0x104   :  { %2378 = vmatpush3.bf16.msra.mxu0 %v2536_v61  ;;  %2400 = vmatpush3.bf16.msra.mxu1 %v2537_v62  ;;  %v2564_v61 = vld [vmem:[%s3282_s3 + $0x330] sm:$0xff]  }
 0x105   :  { %2379 = vmatprep.subr.bf16.mxu0 %v2538_v63  ;;  %2401 = vmatprep.subr.bf16.mxu1 %v2539_v1  ;;  %v2565_v62 = vld [vmem:[%s3282_s3 + $0x3b0] sm:$0xff]   ;;  %v2566_v63 = vld [vmem:[%s3282_s3 + $0x368] sm:$0xff]  }
 0x106   :  { %v2567_v1 = vld [vmem:[%s3282_s3 + $0x3e8] sm:$0xff]  }
 0x108   :  { %2380 = vmatpush3.bf16.msra.mxu0 %v2540_v5  ;;  %2402 = vmatpush3.bf16.msra.mxu1 %v2541_v11  ;;  %v2568_v5 = vld [vmem:[%s3282_s3 + $0x328] sm:$0xff]  }
 0x109   :  { %2381 = vmatprep.subr.bf16.mxu0 %v2542_v12  ;;  %2403 = vmatprep.subr.bf16.mxu1 %v2543_v13  ;;  %v2569_v11 = vld [vmem:[%s3282_s3 + $0x3a8] sm:$0xff]   ;;  %v2570_v12 = vld [vmem:[%s3282_s3 + $0x360] sm:$0xff]  }
 0x10a   :  { %v2571_v13 = vld [vmem:[%s3282_s3 + $0x3e0] sm:$0xff]  }
 0x10c   :  { %2382 = vmatpush3.bf16.msra.mxu0 %v2544_v15  ;;  %2404 = vmatpush3.bf16.msra.mxu1 %v2545_v17  ;;  %v2573_v15 = vld [vmem:[%s3282_s3 + $0x3a0] sm:$0xff]   ;;  %v2575_v17 = vld [vmem:[%s3282_s3 + $0x3d8] sm:$0xff]  }
 0x10d   :  { %2383 = vmatprep.subr.bf16.mxu0 %v2546_v18  ;;  %2405 = vmatprep.subr.bf16.mxu1 %v2547_v19  ;;  %v2576_v18 = vld [vmem:[%s3282_s3 + $0x318] sm:$0xff]  }
 0x10e   :  { %v2577_v19 = vld [vmem:[%s3282_s3 + $0x398] sm:$0xff]  }
 0x110   :  { %2384 = vmatpush3.bf16.msra.mxu0 %v2548_v20  ;;  %2406 = vmatpush3.bf16.msra.mxu1 %v2549_v42  ;;  %v2578_v20 = vld [vmem:[%s3282_s3 + $0x350] sm:$0xff]  }
 0x111   :  { %2385 = vmatprep.subr.bf16.mxu0 %v2550_v22  ;;  %2407 = vmatprep.subr.bf16.mxu1 %v2551_v6  ;;  %v2580_v42 = vld [vmem:[%s3282_s3 + $0x310] sm:$0xff]   ;;  %v117_v22 = vrot.slane %v2975_v7, %v84_v0  ;;  %v2582_v6 = vld [vmem:[%s3282_s3 + $0x348] sm:$0xff]   ;;  %v646_v7 = vadd.f32 %v3074_v9, %v125_v41  ;;  %v2589_v9 = vld [vmem:[%s3282_s3 + $0x380] sm:$0xff]  }
 0x112   :  { %v2584_v0 = vld [vmem:[%s3282_s3 + $0x308] sm:$0xff]  }
 0x113   :  { %v603_v25 = vadd.f32 %v3069_v2, %v117_v22  ;;  %v2587_v2 = vld [vmem:[%s3282_s3 + $0x3c0] sm:$0xff]  }
 0x114   :  { %2386 = vmatpush3.bf16.msra.mxu0 %v2552_v26  ;;  %2408 = vmatpush3.bf16.msra.mxu1 %v2553_v53  ;;  %v607_v26 = vadd.f32 %v3097_v43, %v117_v22  ;;  %v2588_v43 = vld [vmem:[%s3282_s3 + $0x300] sm:$0xff]   ;;  %v668_v53 = vmax.f32 %v646_v7, 0.0 }
 0x115   :  { %2387 = vmatprep.subr.bf16.mxu0 %v2554_v55  ;;  %2409 = vmatprep.subr.bf16.mxu1 %v2555_v54  ;;  %v666_v27 = vmax.f32 %v603_v25, 0.0 }
 0x116   :  { %v682_v29 = vmax.f32 %v607_v26, 0.0  ;;  %v700_v30 = vpack.c.bf16 %v684_v21, %v668_v53 }
 0x118   :  { %2388 = vmatpush3.bf16.msra.mxu0 %v2556_v33  ;;  %2410 = vmatpush3.bf16.msra.mxu1 %v2557_v57  ;;  %v698_v55 = vpack.c.bf16 %v682_v29, %v666_v27 }
 0x119   :  { %2417 = vmatprep.subr.bf16.mxu0 %v2558_v10  ;;  %2439 = vmatprep.subr.bf16.mxu1 %v2559_v38 }
 0x11b   :  { %1930 = vmatmul.mubr.bf16.vlgmr.msra.gmra.mxu0 %v694_v50  ;;  %1971 = vmatmul.mubr.bf16.vlgmr.msra.gmra.mxu1 %v696_v56 }
 0x11c   :  { %2418 = vmatpush3.bf16.msra.mxu0 %v2560_v49  ;;  %2440 = vmatpush3.bf16.msra.mxu1 %v2561_v51 }
 0x11d   :  { %2419 = vmatprep.subr.bf16.mxu0 %v2562_v52  ;;  %2441 = vmatprep.subr.bf16.mxu1 %v2563_v58 }
 0x11e   :  { %2011 = vmatprep.mubr.bf16.mxu0 %v699_v59  ;;  %2052 = vmatprep.mubr.bf16.mxu1 %v701_v60 }
 0x120   :  { %2420 = vmatpush3.bf16.msra.mxu0 %v2564_v61  ;;  %2442 = vmatpush3.bf16.msra.mxu1 %v2565_v62 }
 0x121   :  { %2421 = vmatprep.subr.bf16.mxu0 %v2566_v63  ;;  %2443 = vmatprep.subr.bf16.mxu1 %v2567_v1 }
 0x124   :  { %2422 = vmatpush3.bf16.msra.mxu0 %v2568_v5  ;;  %2444 = vmatpush3.bf16.msra.mxu1 %v2569_v11 }
 0x125   :  { %2423 = vmatprep.subr.bf16.mxu0 %v2570_v12  ;;  %2445 = vmatprep.subr.bf16.mxu1 %v2571_v13 }
 0x128   :  { %2424 = vmatpush3.bf16.msra.mxu0 %v2572_v14  ;;  %2446 = vmatpush3.bf16.msra.mxu1 %v2573_v15 }
 0x129   :  { %2425 = vmatprep.subr.bf16.mxu0 %v2574_v16  ;;  %2447 = vmatprep.subr.bf16.mxu1 %v2575_v17 }
 0x12c   :  { %2426 = vmatpush3.bf16.msra.mxu0 %v2576_v18  ;;  %2448 = vmatpush3.bf16.msra.mxu1 %v2577_v19 }
 0x12d   :  { %2427 = vmatprep.subr.bf16.mxu0 %v2578_v20  ;;  %2449 = vmatprep.subr.bf16.mxu1 %v2579_v40 }
 0x130   :  { %2428 = vmatpush3.bf16.msra.mxu0 %v2580_v42  ;;  %2450 = vmatpush3.bf16.msra.mxu1 %v2581_v23 }
 0x131   :  { %2429 = vmatprep.subr.bf16.mxu0 %v2582_v6  ;;  %2451 = vmatprep.subr.bf16.mxu1 %v2583_v24 }
 0x134   :  { %2430 = vmatpush3.bf16.msra.mxu0 %v2584_v0  ;;  %2452 = vmatpush3.bf16.msra.mxu1 %v2585_v39 }
 0x135   :  { %2431 = vmatprep.subr.bf16.mxu0 %v2586_v4  ;;  %2453 = vmatprep.subr.bf16.mxu1 %v2587_v2 }
 0x138   :  { %2432 = vmatpush3.bf16.msra.mxu0 %v2588_v43  ;;  %2454 = vmatpush3.bf16.msra.mxu1 %v2589_v9 }
 0x13b   :  { %2012 = vmatmul.mubr.bf16.vlgmr.msra.gmra.mxu0 %v698_v55  ;;  %2053 = vmatmul.mubr.bf16.vlgmr.msra.gmra.mxu1 %v700_v30 }
 0x19b   :  { %v2301_v31 = vpop.f32.mrf.mxu0  ;;  %v2323_v54 = vpop.f32.mrf.mxu1 }
 0x19d   :  { %v2302_v8 = vpop.f32.mrf.mxu0  ;;  %v2324_v3 = vpop.f32.mrf.mxu1 }
 0x19e   :  { %v2303_v46 = vadd.f32 %v2302_v8, %v2301_v31  ;;  %v2325_v58 = vadd.f32 %v2324_v3, %v2323_v54  ;;  %v2594_v31 = vld [vmem:[%s3281_s0] sm:$0xff] }
 0x19f   :  { %v2304_v28 = vpop.f32.mrf.mxu0  ;;  %v2326_v32 = vpop.f32.mrf.mxu1 }
 0x1a0   :  { %v1768_v50 = vadd.f32 %v2303_v46, %v2154_v47 }
 0x1a1   :  { %v2305_v33 = vpop.f32.mrf.mxu0  ;;  %v2327_v35 = vpop.f32.mrf.mxu1 }
 0x1a2   :  { %v2306_v51 = vadd.f32 %v2305_v33, %v2304_v28  ;;  %v1809_v60 = vadd.f32 %v2325_v58, %v1768_v50  ;;  %v2328_v1 = vadd.f32 %v2327_v35, %v2326_v32  ;;  %v2595_v28 = vld [vmem:[%s3281_s0 + $0x8] sm:$0xff] }
 0x1a4   :  { %v1771_v61 = vadd.f32 %v2306_v51, %v2154_v47 }
 0x1a6   :  { %v1812_v12 = vadd.f32 %v2328_v1, %v1771_v61  ;;  %v2284_v61 = vld [vmem:[%s3286_s6] ss:$0 sm:$0xff] }
 0x1bb   :  { %v2345_v34 = vpop.f32.mrf.mxu0  ;;  %v2367_v57 = vpop.f32.mrf.mxu1 }
 0x1bd   :  { %v2346_v10 = vpop.f32.mrf.mxu0  ;;  %v2368_v36 = vpop.f32.mrf.mxu1 }
 0x1be   :  { %v2347_v59 = vadd.f32 %v2346_v10, %v2345_v34  ;;  %v2369_v13 = vadd.f32 %v2368_v36, %v2367_v57 }
 0x1bf   :  { %v2348_v37 = vpop.f32.mrf.mxu0  ;;  %v2370_v38 = vpop.f32.mrf.mxu1 }
 0x1c0   :  { %v1850_v5 = vadd.f32 %v2347_v59, %v1809_v60  ;;  %v2283_v59 = vld [vmem:[%s3285_s5] ss:$0 sm:$0xff] }
 0x1c1   :  { %v2349_v45 = vpop.f32.mrf.mxu0  ;;  %v2371_v49 = vpop.f32.mrf.mxu1 }
 0x1c2   :  { %v2350_v11 = vadd.f32 %v2349_v45, %v2348_v37  ;;  %v1891_v17 = vadd.f32 %v2369_v13, %v1850_v5  ;;  %v2372_v19 = vadd.f32 %v2371_v49, %v2370_v38 }
 0x1c4   :  { %v1853_v18 = vadd.f32 %v2350_v11, %v1812_v12 }
 0x1c6   :  { %v1894_v23 = vadd.f32 %v2372_v19, %v1853_v18 }
 0x1db   :  { %v2389_v48 = vpop.f32.mrf.mxu0  ;;  %v2411_v52 = vpop.f32.mrf.mxu1 }
 0x1dd   :  { %v2390_v56 = vpop.f32.mrf.mxu0  ;;  %v2412_v62 = vpop.f32.mrf.mxu1 }
 0x1de   :  { %v2391_v14 = vadd.f32 %v2390_v56, %v2389_v48  ;;  %v2413_v6 = vadd.f32 %v2412_v62, %v2411_v52 }
 0x1df   :  { %v2392_v63 = vpop.f32.mrf.mxu0  ;;  %v2414_v15 = vpop.f32.mrf.mxu1 }
 0x1e0   :  { %v1932_v20 = vadd.f32 %v2391_v14, %v1891_v17 }
 0x1e1   :  { %v2393_v16 = vpop.f32.mrf.mxu0  ;;  %v2415_v42 = vpop.f32.mrf.mxu1 }
 0x1e2   :  { %v2394_v40 = vadd.f32 %v2393_v16, %v2392_v63  ;;  %v1973_v0 = vadd.f32 %v2413_v6, %v1932_v20  ;;  %v2416_v7 = vadd.f32 %v2415_v42, %v2414_v15 }
 0x1e4   :  { %v1935_v25 = vadd.f32 %v2394_v40, %v1894_v23 }
 0x1e6   :  { %v1976_v29 = vadd.f32 %v2416_v7, %v1935_v25 }
 0x1fb   :  { %v2433_v22 = vpop.f32.mrf.mxu0  ;;  %v2455_v41 = vpop.f32.mrf.mxu1 }
 0x1fd   :  { %v2434_v24 = vpop.f32.mrf.mxu0  ;;  %v2456_v39 = vpop.f32.mrf.mxu1 }
 0x1fe   :  { %v2435_v26 = vadd.f32 %v2434_v24, %v2433_v22  ;;  %v2457_v2 = vadd.f32 %v2456_v39, %v2455_v41 }
 0x1ff   :  { %v2436_v4 = vpop.f32.mrf.mxu0  ;;  %v2458_v43 = vpop.f32.mrf.mxu1 }
 0x200   :  { %v2014_v44 = vadd.f32 %v2435_v26, %v1973_v0 }
 0x201   :  { %v2437_v27 = vpop.f32.mrf.mxu0  ;;  %v2459_v21 = vpop.f32.mrf.mxu1 }
 0x202   :  { %v2055_v9 = vadd.f32 %v2457_v2, %v2014_v44  ;;  %v2438_v53 = vadd.f32 %v2437_v27, %v2436_v4  ;;  %v2460_v30 = vadd.f32 %v2459_v21, %v2458_v43 }
 0x204   :  { %v2017_v55 = vadd.f32 %v2438_v53, %v1976_v29  ;;  %v2061_v54 = vadd.f32 %v2594_v31, %v2055_v9 }
 0x206   :  { %v2058_v8 = vadd.f32 %v2460_v30, %v2017_v55  ;;  %v2063_v3 = vsel %vm306_vm0, %v2061_v54, 0.0 }
 0x207   :  { %2064 = vadd.xlane.f32.xlu0 %v2063_v3 }
 0x208   :  { %v2062_v32 = vadd.f32 %v2595_v28, %v2058_v8 }
 0x20a   :  { %v2066_v33 = vsel %vm306_vm0, %v2062_v32, 0.0 }
 0x20b   :  { %2067 = vadd.xlane.f32.xlu0 %v2066_v33 }
 0x290   :  { %v2065_v34 = vpop.xlane.xlu0 %2064 }
 0x291   :  { %v2070_v35 = vmul.f32 0.03125, %v2065_v34 }
 0x293   :  { %v2072_v57 = vsub.f32 %v2061_v54, %v2070_v35 }
 0x294   :  { %v2068_v10 = vpop.xlane.xlu0 %2067 }
 0x295   :  { %v2071_v36 = vmul.f32 0.03125, %v2068_v10  ;;  %v2074_v37 = vmul.f32 %v2072_v57, %v2072_v57 }
 0x297   :  { %v2073_v38 = vsub.f32 %v2062_v32, %v2071_v36  ;;  %v2076_v45 = vsel %vm306_vm0, %v2074_v37, 0.0 }
 0x298   :  { %2077 = vadd.xlane.f32.xlu1 %v2076_v45 }
 0x299   :  { %v2075_v46 = vmul.f32 %v2073_v38, %v2073_v38 }
 0x29b   :  { %v2079_v47 = vsel %vm306_vm0, %v2075_v46, 0.0 }
 0x29c   :  { %2080 = vadd.xlane.f32.xlu1 %v2079_v47 }
 0x321   :  { %v2078_v48 = vpop.xlane.xlu1 %2077 }
 0x322   :  { %v2082_v49 = vmul.f32 0.03125, %v2078_v48 }
 0x324   :  { %v2084_v50 = vadd.f32 1e-05, %v2082_v49 }
 0x325   :  { %v2081_v51 = vpop.xlane.xlu1 %2080 }
 0x326   :  { %2590 = vrsqrt.f32 %v2084_v50  ;;  %v2083_v52 = vmul.f32 0.03125, %v2081_v51 }
 0x328   :  { %v2085_v56 = vadd.f32 1e-05, %v2083_v52 }
 0x32a   :  { %2592 = vrsqrt.f32 %v2085_v56 }
 0x333   :  { %v2591_v58 = vpop.eup %2590 }
 0x334   :  { %v2088_v60 = vmul.f32 %v2591_v58, %v2072_v57 }
 0x336   :  { %v2097_v62 = vmul.f32 %v2283_v59, %v2088_v60 }
 0x337   :  { %v2593_v63 = vpop.eup %2592 }
 0x338   :  { %v2106_v1 = vadd.f32 %v2284_v61, %v2097_v62  ;;  %v2089_v5 = vmul.f32 %v2593_v63, %v2073_v38 }
 0x33a   :  { %2108 = vst.msk [vmem:[%s3287_s7] sm:$0xff] %vm306_vm0, %v2106_v1  ;;  %v2098_v11 = vmul.f32 %v2283_v59, %v2089_v5 }
 0x33c   :  { %v2107_v12 = vadd.f32 %v2284_v61, %v2098_v11 }
 0x33e   :  { %2109 = vst.msk [vmem:[%s3287_s7 + $0x8] sm:$0xff] %vm306_vm0, %v2107_v12 }

</bundles_post_ra>
